<compile_context>
chip_gen: v7x
topology: tpu7x:2x2x1
jax: 0.10.0
libtpu: 0.0.40
codegen_flags: <defaults>
</compile_context>

<pallas_src>
import jax
import jax.numpy as jnp
from jax.experimental import pallas as pl
from jax.experimental.pallas import tpu as pltpu

C_IN = 1024          # Self_Attn in_dim (fixed by the module: fc1 = Linear(1024, 64))
C_QK = C_IN // 8     # 128, query/key projection dim
C_QK2 = 2 * C_QK     # fused q|k projection width (full 256-wide MXU tiles)
HID = 64             # fc1 out
OUT = 2              # fc2 out

VMEM_LIMIT_BYTES = 32 * 1024 * 1024


def vtf_sa_kernel(x_ref, wqk_ref, bqk_ref, wv_hbm_ref, bv_ref, gamma_ref,
                  w1_ref, b1_ref, w2_ref, b2_ref, out_ref, wv_vmem, wv_sem):
    # Wv (2 MiB) is only needed for the very last matmul of the body: start its
    # HBM->VMEM fetch now and overlap it with the q/k/energy/softmax compute.
    wv_copy = pltpu.make_async_copy(wv_hbm_ref, wv_vmem, wv_sem.at[0])
    wv_copy.start()

    bt, n, c = x_ref.shape                        # (Bt, N, C) block (bf16)
    x3 = x_ref[...]
    x2 = x3.reshape(bt * n, c)                    # pack Bt batch elems into one matmul

    # Fused q|k projection: one (Bt*N, 1024) x (1024, 256) bf16 matmul with f32
    # accumulation; the q/k split is a free slice on the 128-lane boundary.
    qk = (jnp.dot(x2, wqk_ref[...], preferred_element_type=jnp.float32)
          + bqk_ref[...]).reshape(bt, n, C_QK2)
    q = qk[:, :, :C_QK]
    k = qk[:, :, C_QK:]

    # energy[b,i,j] = q_i . k_j (no explicit k transpose); softmax over keys
    # == torch.softmax(dim=-1).
    energy = jnp.einsum("bnd,bmd->bnm", q, k,
                        preferred_element_type=jnp.float32)           # (Bt, N, N)
    energy = energy - jnp.max(energy, axis=-1, keepdims=True)
    p = jnp.exp(energy)
    attn = p * pl.reciprocal(jnp.sum(p, axis=-1, keepdims=True), approx=True)

    # AdaptiveAvgPool2d((1,1)) commuted through both attention matmuls:
    #   mean_i (attn @ (x@Wv + bv))[i] = ((mean_i attn[i,:]) @ x) @ Wv + bv
    # (rows of attn sum to 1), and the residual mean(x) is folded into the same
    # contraction via a stacked 1/N row -- no f32 copy of x and no (N, C)
    # value / attention-output materialization.
    a = jnp.mean(attn, axis=1, keepdims=True)                         # (Bt, 1, N)
    a2 = jnp.concatenate([a, jnp.full_like(a, 1.0 / n)], axis=1)      # (Bt, 2, N)
    pooled2 = jnp.einsum("bqn,bnc->bqc", a2.astype(x3.dtype), x3,
                         preferred_element_type=jnp.float32)          # (Bt, 2, C)
    ax = pooled2[:, 0, :]                                             # (mean_i attn) @ x
    mean_x = pooled2[:, 1, :]                                         # mean(x)

    # The overlapped Wv fetch is needed only now.
    wv_copy.wait()
    pooled_attn = jnp.dot(ax.astype(wv_vmem.dtype), wv_vmem[...],
                          preferred_element_type=jnp.float32) + bv_ref[...]
    pooled = gamma_ref[0, 0] * pooled_attn + mean_x                   # (Bt, C)

    # fc2(fc1(pooled))
    h = jnp.dot(pooled, w1_ref[...], preferred_element_type=jnp.float32) + b1_ref[...]
    y = jnp.dot(h, w2_ref[...], preferred_element_type=jnp.float32) + b2_ref[...]
    out_ref[0] = y.astype(out_ref.dtype)                              # (Bt, OUT)


def _multi_tensorcore_chip():
    """True on chips exposing >1 TensorCore behind one device (grid sharding via
    dimension_semantics): v4 / v5p / v7x.  v5e / v6e are single-core, so splitting
    the grid there only duplicates prologue/epilogue and per-step overhead."""
    try:
        kind = jax.devices()[0].device_kind.lower()
    except Exception:
        return False
    return ("v7" in kind) or ("v4" in kind) or ("v5p" in kind)


def _pick_block_batch(B, N, multi_core, vmem_budget):
    """Batch elements packed per grid step.  Aim for ~256 MXU rows per step
    (full 256-row projection tiles on v6e/v7x), subject to a VMEM estimate;
    keep >= 2 grid steps only on multi-TensorCore chips so
    dimension_semantics=("parallel",) can shard across cores."""
    divisors = [d for d in range(1, B + 1) if B % d == 0]

    def vmem_est(bt):
        x_blk = 2 * bt * N * C_IN * 2               # bf16 x block, double-buffered
        attn = 3 * bt * N * N * 4                   # energy / p / attn (f32)
        qk = 2 * bt * N * C_QK2 * 4                 # fused q|k activations
        wv = C_IN * C_IN * 2                        # manually-DMA'd Wv scratch (1 buffer)
        wgt = 2 * 2 * (C_IN * C_QK2 + C_IN * HID)   # remaining bf16 weights, 2 buffers
        return x_blk + attn + qk + wv + wgt

    target = max(1, 256 // max(N, 1))
    cand = [d for d in divisors if d <= target and vmem_est(d) <= vmem_budget]
    bt = max(cand) if cand else 1
    if multi_core and B // bt < 2:
        # NOTE: with constant index_maps each core streams its own copy of the
        # weights; for tiny, weight-stream-bound batches a single-core variant
        # (bt = B) can win on v7x -- benchmark if profiling shows DMA-bound.
        smaller = [d for d in divisors if d < bt and B // d >= 2]
        if smaller:
            bt = smaller[-1]
    return bt


def vtf_sa_forward(x_nchw, kp):
    """kp: packed kernel params from pack_params_for_kernel."""
    B, C, H, W = x_nchw.shape
    assert C == C_IN
    N = H * W
    # NCHW -> (B, N, C): the 1x1 convs become per-pixel matmuls over channels (lanes).
    x = jnp.transpose(x_nchw, (0, 2, 3, 1)).reshape(B, N, C)

    bt = _pick_block_batch(B, N, _multi_tensorcore_chip(), (3 * VMEM_LIMIT_BYTES) // 4)
    bg = B // bt

    args = (x, kp["wqk"], kp["bqk"], kp["wv"], kp["bv"], kp["gamma"],
            kp["w1"], kp["b1"], kp["w2"], kp["b2"])
    flops = int(2 * B * N * C * C_QK2            # fused q|k projection
                + 2 * B * N * N * C_QK           # energy
                + 2 * B * 2 * N * C              # pooled contraction (attn row + 1/N row)
                + 2 * B * C * C                  # Wv on the pooled vector
                + 2 * B * C * HID + 2 * B * HID * OUT)
    cost = pl.CostEstimate(
        flops=flops,
        transcendentals=int(B * N * N),          # softmax exp
        bytes_accessed=int(sum(a.size * a.dtype.itemsize for a in args) + B * OUT * 4),
    )

    out = pl.pallas_call(
        vtf_sa_kernel,
        out_shape=jax.ShapeDtypeStruct((bg, bt, OUT), jnp.float32),
        grid_spec=pltpu.PrefetchScalarGridSpec(
            num_scalar_prefetch=0,
            grid=(bg,),
            in_specs=[
                pl.BlockSpec((bt, N, C), lambda b: (b, 0, 0)),        # x (Bt per step)
                pl.BlockSpec((C, C_QK2), lambda b: (0, 0)),           # Wq|Wk fused
                pl.BlockSpec((1, C_QK2), lambda b: (0, 0)),           # bq|bk fused
                pl.BlockSpec(memory_space=pl.ANY),                    # Wv (manual DMA)
                pl.BlockSpec((1, C), lambda b: (0, 0)),               # bv
                pl.BlockSpec(memory_space=pltpu.MemorySpace.SMEM),    # gamma (scalar)
                pl.BlockSpec((C, HID), lambda b: (0, 0)),             # W1
                pl.BlockSpec((1, HID), lambda b: (0, 0)),             # b1
                pl.BlockSpec((HID, OUT), lambda b: (0, 0)),           # W2
                pl.BlockSpec((1, OUT), lambda b: (0, 0)),             # b2
            ],
            out_specs=pl.BlockSpec((1, bt, OUT), lambda b: (b, 0, 0)),
            scratch_shapes=[
                pltpu.VMEM((C_IN, C_IN), kp["wv"].dtype),             # Wv landing buffer
                pltpu.SemaphoreType.DMA((1,)),
            ],
        ),
        compiler_params=pltpu.CompilerParams(
            dimension_semantics=("parallel",),
            vmem_limit_bytes=VMEM_LIMIT_BYTES,
        ),
        cost_estimate=cost,
    )(*args)
    return out.reshape(B, OUT)


def vtf_sa_reference(x_nchw, params):
    """Pure-JAX f32 reference of the PyTorch forward (same stored params/input)."""
    f = lambda a: a.astype(jnp.float32)
    B, C, H, W = x_nchw.shape
    N = H * W
    x = jnp.transpose(f(x_nchw), (0, 2, 3, 1)).reshape(B, N, C)
    q = x @ f(params["wq"]) + f(params["bq"])
    k = x @ f(params["wk"]) + f(params["bk"])
    v = x @ f(params["wv"]) + f(params["bv"])
    energy = jnp.einsum("bnc,bmc->bnm", q, k)
    attn = jax.nn.softmax(energy, axis=-1)
    o = jnp.einsum("bnm,bmc->bnc", attn, v)
    o = f(params["gamma"])[0, 0] * o + x
    pooled = jnp.mean(o, axis=1)
    h = pooled @ f(params["w1"]) + f(params["b1"])
    return h @ f(params["w2"]) + f(params["b2"])


def init_params(key):
    """Deterministic synthetic init (PyTorch-style uniform bounds on fan_in)."""
    ks = jax.random.split(key, 10)

    def u(k, shape, fan_in):
        bound = 1.0 / jnp.sqrt(jnp.float32(fan_in))
        return jax.random.uniform(k, shape, jnp.float32, -bound, bound)

    return dict(
        wq=u(ks[0], (C_IN, C_QK), C_IN), bq=u(ks[1], (1, C_QK), C_IN),
        wk=u(ks[2], (C_IN, C_QK), C_IN), bk=u(ks[3], (1, C_QK), C_IN),
        wv=u(ks[4], (C_IN, C_IN), C_IN), bv=u(ks[5], (1, C_IN), C_IN),
        # PyTorch inits gamma to 0 (which would zero the attention branch);
        # use a nonzero deterministic value so the attention path is exercised.
        gamma=jnp.full((1, 1), 0.5, jnp.float32),
        w1=u(ks[6], (C_IN, HID), C_IN), b1=u(ks[7], (1, HID), C_IN),
        w2=u(ks[8], (HID, OUT), HID), b2=u(ks[9], (1, OUT), HID),
    )


def cast_params_for_storage(params):
    """bf16 storage for the large matmul weights (halves HBM weight traffic);
    biases / gamma / tiny fc2 weight stay f32 (bf16 only feeds the MXU)."""
    out = dict(params)
    for name in ("wq", "wk", "wv", "w1"):
        out[name] = params[name].astype(jnp.bfloat16)
    return out


def pack_params_for_kernel(params):
    """One-time packing for the kernel: fuse Wq|Wk into a single (1024, 256)
    weight (and bq|bk into (1, 256)) so the q/k projection is one full-width MXU
    matmul; the q/k split inside the kernel is a free 128-lane-boundary slice."""
    return dict(
        wqk=jnp.concatenate([params["wq"], params["wk"]], axis=1),
        bqk=jnp.concatenate([params["bq"], params["bk"]], axis=1),
        wv=params["wv"], bv=params["bv"], gamma=params["gamma"],
        w1=params["w1"], b1=params["b1"], w2=params["w2"], b2=params["b2"],
    )


if __name__ == "__main__":
    key = jax.random.PRNGKey(0)
    pkey, xkey = jax.random.split(key)

    params = cast_params_for_storage(init_params(pkey))   # stored model (bf16 big weights)
    kparams = pack_params_for_kernel(params)               # packed once for the kernel

    B, H, W = 4, 8, 8  # channels fixed at 1024 by the module; spatial kept small
    x = jax.random.normal(xkey, (B, C_IN, H, W), jnp.float32).astype(jnp.bfloat16)

    out = jax.block_until_ready(vtf_sa_forward(x, kparams))
    ref = vtf_sa_reference(x, params)

    assert out.shape == (B, OUT), out.shape
    # bf16 attention-pooling weights + approx softmax reciprocal => slightly looser
    # tolerance than pure f32; still tight enough to catch real bugs (outputs ~0.1).
    assert jnp.allclose(out, ref, atol=3e-3, rtol=3e-3), (out, ref)

    print("KERNEL_OK")
</pallas_src>

<mosaic_0001>
module attributes {stable_mosaic.version = 11 : i64} {
  func.func @vtf_sa_kernel(%arg0: i32, %arg1: memref<4x64x1024xbf16, #tpu.memory_space<vmem>>, %arg2: memref<1024x256xbf16, #tpu.memory_space<vmem>>, %arg3: memref<1x256xf32, #tpu.memory_space<vmem>>, %arg4: memref<1024x1024xbf16, #tpu.memory_space<any>>, %arg5: memref<1x1024xf32, #tpu.memory_space<vmem>>, %arg6: memref<1x1xf32, #tpu.memory_space<smem>>, %arg7: memref<1024x64xbf16, #tpu.memory_space<vmem>>, %arg8: memref<1x64xf32, #tpu.memory_space<vmem>>, %arg9: memref<64x2xf32, #tpu.memory_space<vmem>>, %arg10: memref<1x2xf32, #tpu.memory_space<vmem>>, %arg11: memref<1x4x2xf32, #tpu.memory_space<vmem>>, %arg12: memref<1024x1024xbf16, #tpu.memory_space<vmem>>, %arg13: memref<1x!tpu.dma_semaphore, #tpu.memory_space<semaphore_mem>>) attributes {dimension_semantics = [#tpu.dimension_semantics<parallel>], iteration_bounds = array<i64: 1>, scalar_prefetch = 0 : i64, scratch_operands = 2 : i64, tpu.core_type = #tpu.core_type<tc>, window_params = [{transform_indices = @transform_0, window_bounds = array<i64: 4, 64, 1024>}, {pipeline_mode = #tpu.pipeline_mode<synchronous>, transform_indices = @transform_1, window_bounds = array<i64: 1024, 256>}, {pipeline_mode = #tpu.pipeline_mode<synchronous>, transform_indices = @transform_2, window_bounds = array<i64: 1, 256>}, {}, {pipeline_mode = #tpu.pipeline_mode<synchronous>, transform_indices = @transform_4, window_bounds = array<i64: 1, 1024>}, {transform_indices = @transform_5, window_bounds = array<i64: 1, 1>}, {pipeline_mode = #tpu.pipeline_mode<synchronous>, transform_indices = @transform_6, window_bounds = array<i64: 1024, 64>}, {pipeline_mode = #tpu.pipeline_mode<synchronous>, transform_indices = @transform_7, window_bounds = array<i64: 1, 64>}, {pipeline_mode = #tpu.pipeline_mode<synchronous>, transform_indices = @transform_8, window_bounds = array<i64: 64, 2>}, {pipeline_mode = #tpu.pipeline_mode<synchronous>, transform_indices = @transform_9, window_bounds = array<i64: 1, 2>}, {transform_indices = @transform_10, window_bounds = array<i64: 1, 4, 2>}]} {
    %c0_i32 = arith.constant 0 : i32
    %0 = tpu.memref_slice %arg13[%c0_i32] : memref<1x!tpu.dma_semaphore, #tpu.memory_space<semaphore_mem>> -> memref<1x!tpu.dma_semaphore, #tpu.memory_space<semaphore_mem>>
    %1 = tpu.memref_squeeze %0 : memref<1x!tpu.dma_semaphore, #tpu.memory_space<semaphore_mem>> -> memref<!tpu.dma_semaphore, #tpu.memory_space<semaphore_mem>>
    tpu.enqueue_dma source(%arg4 : memref<1024x1024xbf16, #tpu.memory_space<any>>) target(%arg12 : memref<1024x1024xbf16, #tpu.memory_space<vmem>>) target_semaphore(%1 : memref<!tpu.dma_semaphore, #tpu.memory_space<semaphore_mem>>)
    %c0 = arith.constant 0 : index
    %c0_0 = arith.constant 0 : index
    %c0_1 = arith.constant 0 : index
    %2 = vector.load %arg1[%c0, %c0_0, %c0_1] : memref<4x64x1024xbf16, #tpu.memory_space<vmem>>, vector<4x64x1024xbf16>
    %3 = vector.shape_cast %2 : vector<4x64x1024xbf16> to vector<256x1024xbf16>
    %c0_2 = arith.constant 0 : index
    %c0_3 = arith.constant 0 : index
    %4 = vector.load %arg2[%c0_2, %c0_3] : memref<1024x256xbf16, #tpu.memory_space<vmem>>, vector<1024x256xbf16>
    %cst = arith.constant dense<0.000000e+00> : vector<256x256xf32>
    %5 = tpu.matmul %3, %4, %cst {dimension_numbers = #tpu.dot_dimension_numbers<[1], [0], [0], [1], [0, 0, 1, 1], [], []>} : vector<256x1024xbf16>, vector<1024x256xbf16>, vector<256x256xf32> -> vector<256x256xf32>
    %c0_4 = arith.constant 0 : index
    %c0_5 = arith.constant 0 : index
    %6 = vector.load %arg3[%c0_4, %c0_5] : memref<1x256xf32, #tpu.memory_space<vmem>>, vector<1x256xf32>
    %7 = vector.broadcast %6 : vector<1x256xf32> to vector<256x256xf32>
    %8 = arith.addf %5, %7 : vector<256x256xf32>
    %9 = vector.shape_cast %8 : vector<256x256xf32> to vector<4x64x256xf32>
    %10 = vector.extract_strided_slice %9 {offsets = [0, 0, 0], sizes = [4, 64, 128], strides = [1, 1, 1]} : vector<4x64x256xf32> to vector<4x64x128xf32>
    %11 = vector.extract_strided_slice %9 {offsets = [0, 0, 128], sizes = [4, 64, 128], strides = [1, 1, 1]} : vector<4x64x256xf32> to vector<4x64x128xf32>
    "tpu.trace_start"() <{level = 10 : i32, message = "bnd,bmd->bnm"}> : () -> ()
    %cst_6 = arith.constant dense<0.000000e+00> : vector<4x64x64xf32>
    %12 = tpu.matmul %10, %11, %cst_6 {dimension_numbers = #tpu.dot_dimension_numbers<[2], [2], [1], [1], [0, 0, 0, 1, 1, 1], [0], [0]>} : vector<4x64x128xf32>, vector<4x64x128xf32>, vector<4x64x64xf32> -> vector<4x64x64xf32>
    "tpu.trace_stop"() : () -> ()
    %cst_7 = arith.constant dense<0xFF800000> : vector<4x64xf32>
    %13 = vector.multi_reduction <maximumf>, %12, %cst_7 [2] : vector<4x64x64xf32> to vector<4x64xf32>
    %14 = vector.shape_cast %13 : vector<4x64xf32> to vector<4x64x1xf32>
    %15 = vector.broadcast %14 : vector<4x64x1xf32> to vector<4x64x64xf32>
    %16 = arith.subf %12, %15 : vector<4x64x64xf32>
    %17 = math.exp %16 : vector<4x64x64xf32>
    %cst_8 = arith.constant dense<0.000000e+00> : vector<4x64xf32>
    %18 = vector.multi_reduction <add>, %17, %cst_8 [2] : vector<4x64x64xf32> to vector<4x64xf32>
    %19 = vector.shape_cast %18 : vector<4x64xf32> to vector<4x64x1xf32>
    %20 = tpu.reciprocal %19 {approx = true} : vector<4x64x1xf32> -> vector<4x64x1xf32>
    %21 = vector.broadcast %20 : vector<4x64x1xf32> to vector<4x64x64xf32>
    %22 = arith.mulf %17, %21 : vector<4x64x64xf32>
    %cst_9 = arith.constant dense<0.000000e+00> : vector<4x64xf32>
    %23 = vector.multi_reduction <add>, %22, %cst_9 [1] : vector<4x64x64xf32> to vector<4x64xf32>
    %24 = vector.shape_cast %23 : vector<4x64xf32> to vector<4x1x64xf32>
    %cst_10 = arith.constant 6.400000e+01 : f32
    %25 = vector.broadcast %cst_10 : f32 to vector<4x1x64xf32>
    %26 = arith.divf %24, %25 : vector<4x1x64xf32>
    %cst_11 = arith.constant 1.562500e-02 : f32
    %27 = vector.broadcast %cst_11 : f32 to vector<4x1x64xf32>
    %28 = tpu.concatenate %26, %27 in 1 : vector<4x1x64xf32>, vector<4x1x64xf32> -> vector<4x2x64xf32>
    %29 = arith.truncf %28 : vector<4x2x64xf32> to vector<4x2x64xbf16>
    "tpu.trace_start"() <{level = 10 : i32, message = "bqn,bnc->bqc"}> : () -> ()
    %cst_12 = arith.constant dense<0.000000e+00> : vector<4x2x1024xf32>
    %30 = tpu.matmul %29, %2, %cst_12 {dimension_numbers = #tpu.dot_dimension_numbers<[2], [1], [1], [2], [0, 0, 0, 1, 1, 2], [0], [0]>} : vector<4x2x64xbf16>, vector<4x64x1024xbf16>, vector<4x2x1024xf32> -> vector<4x2x1024xf32>
    "tpu.trace_stop"() : () -> ()
    %31 = vector.extract_strided_slice %30 {offsets = [0, 0, 0], sizes = [4, 1, 1024], strides = [1, 1, 1]} : vector<4x2x1024xf32> to vector<4x1x1024xf32>
    %32 = vector.shape_cast %31 : vector<4x1x1024xf32> to vector<4x1024xf32>
    %33 = vector.extract_strided_slice %30 {offsets = [0, 1, 0], sizes = [4, 1, 1024], strides = [1, 1, 1]} : vector<4x2x1024xf32> to vector<4x1x1024xf32>
    %34 = vector.shape_cast %33 : vector<4x1x1024xf32> to vector<4x1024xf32>
    %c0_i32_13 = arith.constant 0 : i32
    %35 = tpu.memref_slice %arg13[%c0_i32_13] : memref<1x!tpu.dma_semaphore, #tpu.memory_space<semaphore_mem>> -> memref<1x!tpu.dma_semaphore, #tpu.memory_space<semaphore_mem>>
    %36 = tpu.memref_squeeze %35 : memref<1x!tpu.dma_semaphore, #tpu.memory_space<semaphore_mem>> -> memref<!tpu.dma_semaphore, #tpu.memory_space<semaphore_mem>>
    tpu.wait_dma2 semaphore(%36 : memref<!tpu.dma_semaphore, #tpu.memory_space<semaphore_mem>>) src(%arg4 : memref<1024x1024xbf16, #tpu.memory_space<any>>) dst(%arg12 : memref<1024x1024xbf16, #tpu.memory_space<vmem>>)
    %37 = arith.truncf %32 : vector<4x1024xf32> to vector<4x1024xbf16>
    %c0_14 = arith.constant 0 : index
    %c0_15 = arith.constant 0 : index
    %38 = vector.load %arg12[%c0_14, %c0_15] : memref<1024x1024xbf16, #tpu.memory_space<vmem>>, vector<1024x1024xbf16>
    %cst_16 = arith.constant dense<0.000000e+00> : vector<4x1024xf32>
    %39 = tpu.matmul %37, %38, %cst_16 {dimension_numbers = #tpu.dot_dimension_numbers<[1], [0], [0], [1], [0, 0, 1, 1], [], []>} : vector<4x1024xbf16>, vector<1024x1024xbf16>, vector<4x1024xf32> -> vector<4x1024xf32>
    %c0_17 = arith.constant 0 : index
    %c0_18 = arith.constant 0 : index
    %40 = vector.load %arg5[%c0_17, %c0_18] : memref<1x1024xf32, #tpu.memory_space<vmem>>, vector<1x1024xf32>
    %41 = vector.broadcast %40 : vector<1x1024xf32> to vector<4x1024xf32>
    %42 = arith.addf %39, %41 : vector<4x1024xf32>
    %c0_19 = arith.constant 0 : index
    %c0_20 = arith.constant 0 : index
    %43 = memref.load %arg6[%c0_19, %c0_20] : memref<1x1xf32, #tpu.memory_space<smem>>
    %44 = vector.broadcast %43 : f32 to vector<4x1024xf32>
    %45 = arith.mulf %44, %42 : vector<4x1024xf32>
    %46 = arith.addf %45, %34 : vector<4x1024xf32>
    %c0_21 = arith.constant 0 : index
    %c0_22 = arith.constant 0 : index
    %47 = vector.load %arg7[%c0_21, %c0_22] : memref<1024x64xbf16, #tpu.memory_space<vmem>>, vector<1024x64xbf16>
    %cst_23 = arith.constant dense<0.000000e+00> : vector<4x64xf32>
    %48 = tpu.matmul %46, %47, %cst_23 {dimension_numbers = #tpu.dot_dimension_numbers<[1], [0], [0], [1], [0, 0, 1, 1], [], []>} : vector<4x1024xf32>, vector<1024x64xbf16>, vector<4x64xf32> -> vector<4x64xf32>
    %c0_24 = arith.constant 0 : index
    %c0_25 = arith.constant 0 : index
    %49 = vector.load %arg8[%c0_24, %c0_25] : memref<1x64xf32, #tpu.memory_space<vmem>>, vector<1x64xf32>
    %50 = vector.broadcast %49 : vector<1x64xf32> to vector<4x64xf32>
    %51 = arith.addf %48, %50 : vector<4x64xf32>
    %c0_26 = arith.constant 0 : index
    %c0_27 = arith.constant 0 : index
    %52 = vector.load %arg9[%c0_26, %c0_27] : memref<64x2xf32, #tpu.memory_space<vmem>>, vector<64x2xf32>
    %cst_28 = arith.constant dense<0.000000e+00> : vector<4x2xf32>
    %53 = tpu.matmul %51, %52, %cst_28 {dimension_numbers = #tpu.dot_dimension_numbers<[1], [0], [0], [1], [0, 0, 1, 1], [], []>} : vector<4x64xf32>, vector<64x2xf32>, vector<4x2xf32> -> vector<4x2xf32>
    %c0_29 = arith.constant 0 : index
    %c0_30 = arith.constant 0 : index
    %54 = vector.load %arg10[%c0_29, %c0_30] : memref<1x2xf32, #tpu.memory_space<vmem>>, vector<1x2xf32>
    %55 = vector.broadcast %54 : vector<1x2xf32> to vector<4x2xf32>
    %56 = arith.addf %53, %55 : vector<4x2xf32>
    %c0_31 = arith.constant 0 : index
    %c0_32 = arith.constant 0 : index
    %c0_33 = arith.constant 0 : index
    %57 = vector.load %arg11[%c0_31, %c0_32, %c0_33] : memref<1x4x2xf32, #tpu.memory_space<vmem>>, vector<1x4x2xf32>
    %58 = vector.shape_cast %57 : vector<1x4x2xf32> to vector<4x2xf32>
    %59 = vector.shape_cast %56 : vector<4x2xf32> to vector<1x4x2xf32>
    tpu.vector_store %arg11[%c0_31, %c0_32, %c0_33], %59 {strides = array<i32>} : memref<1x4x2xf32, #tpu.memory_space<vmem>>, vector<1x4x2xf32>,
    return
  }
  func.func @transform_0(%arg0: i32) -> (i32, i32, i32) {
    %c0_i32 = arith.constant 0 : i32
    %c0_i32_0 = arith.constant 0 : i32
    %c0_i32_1 = arith.constant 0 : i32
    return %arg0, %c0_i32, %c0_i32_0 : i32, i32, i32
  }
  func.func @transform_1(%arg0: i32) -> (i32, i32) {
    %c0_i32 = arith.constant 0 : i32
    %c0_i32_0 = arith.constant 0 : i32
    %c0_i32_1 = arith.constant 0 : i32
    return %c0_i32, %c0_i32_0 : i32, i32
  }
  func.func @transform_2(%arg0: i32) -> (i32, i32) {
    %c0_i32 = arith.constant 0 : i32
    %c0_i32_0 = arith.constant 0 : i32
    %c0_i32_1 = arith.constant 0 : i32
    return %c0_i32, %c0_i32_0 : i32, i32
  }
  func.func @transform_4(%arg0: i32) -> (i32, i32) {
    %c0_i32 = arith.constant 0 : i32
    %c0_i32_0 = arith.constant 0 : i32
    %c0_i32_1 = arith.constant 0 : i32
    return %c0_i32, %c0_i32_0 : i32, i32
  }
  func.func @transform_5(%arg0: i32) -> (i32, i32) {
    %c0_i32 = arith.constant 0 : i32
    %c0_i32_0 = arith.constant 0 : i32
    %c0_i32_1 = arith.constant 0 : i32
    return %c0_i32, %c0_i32_0 : i32, i32
  }
  func.func @transform_6(%arg0: i32) -> (i32, i32) {
    %c0_i32 = arith.constant 0 : i32
    %c0_i32_0 = arith.constant 0 : i32
    %c0_i32_1 = arith.constant 0 : i32
    return %c0_i32, %c0_i32_0 : i32, i32
  }
  func.func @transform_7(%arg0: i32) -> (i32, i32) {
    %c0_i32 = arith.constant 0 : i32
    %c0_i32_0 = arith.constant 0 : i32
    %c0_i32_1 = arith.constant 0 : i32
    return %c0_i32, %c0_i32_0 : i32, i32
  }
  func.func @transform_8(%arg0: i32) -> (i32, i32) {
    %c0_i32 = arith.constant 0 : i32
    %c0_i32_0 = arith.constant 0 : i32
    %c0_i32_1 = arith.constant 0 : i32
    return %c0_i32, %c0_i32_0 : i32, i32
  }
  func.func @transform_9(%arg0: i32) -> (i32, i32) {
    %c0_i32 = arith.constant 0 : i32
    %c0_i32_0 = arith.constant 0 : i32
    %c0_i32_1 = arith.constant 0 : i32
    return %c0_i32, %c0_i32_0 : i32, i32
  }
  func.func @transform_10(%arg0: i32) -> (i32, i32, i32) {
    %c0_i32 = arith.constant 0 : i32
    %c0_i32_0 = arith.constant 0 : i32
    %c0_i32_1 = arith.constant 0 : i32
    return %arg0, %c0_i32, %c0_i32_0 : i32, i32, i32
  }
}

</mosaic_0001>

<bundles_post_ra>
// kernel: tpu_custom_call.1
= control target key start
LH: loop header
LB: loop body
LE: loop exit
PB: predicated region body
PF: predicated region fallthrough
CT: control target
= control target key end

     0   :  { %16 = vsyncpa [#allocation6], 0  ;;  %s9486_s0 = inlined_call_operand.hbm [shape: bf16[4,64,1024], index: 0, kind: input, shape index: {}]   ;;  %s9487_s1 = inlined_call_operand.hbm [shape: bf16[1024,256], index: 1, kind: input, shape index: {}]   ;;  %s9488_s2 = inlined_call_operand.hbm [shape: f32[1,256], index: 2, kind: input, shape index: {}]   ;;  %s9489_s3 = inlined_call_operand.hbm [shape: bf16[1024,1024], index: 3, kind: input, shape index: {}]   ;;  %s9490_s4 = inlined_call_operand.hbm [shape: f32[1,1024], index: 4, kind: input, shape index: {}]   ;;  %s9491_s5 = inlined_call_operand.<no memory space> [shape: f32[1,1], index: 5, kind: input, shape index: {}]   ;;  %s9492_s6 = inlined_call_operand.vmem [shape: bf16[1024,64], index: 6, kind: input, shape index: {}]   ;;  %s9493_s7 = inlined_call_operand.hbm [shape: f32[1,64], index: 7, kind: input, shape index: {}]   ;;  %s9494_s8 = inlined_call_operand.vmem [shape: f32[64,2], index: 8, kind: input, shape index: {}]   ;;  %s9495_s9 = inlined_call_operand.hbm [shape: f32[1,2], index: 9, kind: input, shape index: {}]   ;;  %s9496_s10 = inlined_call_operand.vmem [shape: f32[1,4,2], index: 10, kind: output, shape index: {}]  }
   0x1   :  { %17 = vsyncpa [#allocation8], 0 }
   0x2   :  { %18 = vsyncpa [#allocation11], 0 }
   0x3   :  { %19 = vsyncpa [#allocation14], 0  ;;  %s7818_s13 = smov [#allocation7]   ;;  %s7676_s17 = scalar_lea.hbm %s9487_s1, 16384 }
   0x4   :  { %s37_s14 = sshll.u32 %s7818_s13, 4  ;;  %p7677_p0 = scmp.ne.s32.totalorder %s9487_s1, %s7676_s17  ;;  %s38_s14 = int_to_ptr.vmem [resolvable:$true] %s37_s14 }
   0x5   :  { %p7680_p1 = scmp.lt.u32.totalorder %s7676_s17, %s9487_s1 }
   0x7   :  { %p7682_p2 = pnand %p7680_p1, %p7677_p0 }
   0x9   :  { %7685 = shalt.err (!%p7682_p2)
}
   0xa   :  { %s7686_s22 = scalar_lea.vmem %s38_s14, 16384  ;;  %p7691_p4 = scmp.lt.s32.totalorder %s38_s14, %s38_s14 }
   0xb   :  { %p7687_p3 = scmp.ne.s32.totalorder %s38_s14, %s7686_s22  ;;  %p7692_p5 = scmp.lt.s32.totalorder %s7686_s22, %s7686_s22 }
   0xd   :  { %p7693_p6 = por %p7692_p5, %p7691_p4 }
   0xf   :  { %p7694_p7 = pnand %p7693_p6, %p7687_p3 }
  0x11   :  { %7697 = shalt.err (!%p7694_p7)
}
  0x12   :  { %s7819_s23 = smov 128   ;;  %s7820_s24 = smov 8  }
  0x13   :  { %43 = dma.hbm_to_vmem [thread:$0]  %s9487_s1, 16384, %s38_s14, [#allocation8], %s7819_s23, %s7819_s23, %s7820_s24  }
  0x14   :  { %s7821_s27 = smov [#allocation10]   ;;  %s7822_s29 = smov [#allocation5]  }
  0x15   :  { %s60_s28 = sshll.u32 %s7821_s27, 4  ;;  %s25_s30 = sshll.u32 %s7822_s29, 4  ;;  %s61_s28 = int_to_ptr.vmem [resolvable:$true] %s60_s28  ;;  %s26_s30 = int_to_ptr.vmem [resolvable:$true] %s25_s30 }
  0x16   :  { %s7698_s13 = scalar_lea.hbm %s9490_s4, 128 }
  0x17   :  { %p7699_p8 = scmp.ne.s32.totalorder %s9490_s4, %s7698_s13  ;;  %p7702_p9 = scmp.lt.u32.totalorder %s7698_s13, %s9490_s4 }
  0x19   :  { %p7704_p10 = pnand %p7702_p9, %p7699_p8 }
  0x1b   :  { %7707 = shalt.err (!%p7704_p10)
}
  0x1c   :  { %s7708_s1 = scalar_lea.vmem %s61_s28, 128  ;;  %p7713_p12 = scmp.lt.s32.totalorder %s61_s28, %s61_s28 }
  0x1d   :  { %p7709_p11 = scmp.ne.s32.totalorder %s61_s28, %s7708_s1  ;;  %p7714_p13 = scmp.lt.s32.totalorder %s7708_s1, %s7708_s1 }
  0x1f   :  { %p7715_p0 = por %p7714_p13, %p7713_p12 }
  0x21   :  { %p7716_p1 = pnand %p7715_p0, %p7709_p11 }
  0x23   :  { %7719 = shalt.err (!%p7716_p1)
}
  0x24   :  { %63 = dma.hbm_to_vmem [thread:$0]  %s9490_s4, 128, %s61_s28, [#allocation11]  }
  0x25   :  { %s7720_s22 = scalar_lea.hbm %s9486_s0, 16384 }
  0x26   :  { %p7721_p2 = scmp.ne.s32.totalorder %s9486_s0, %s7720_s22  ;;  %p7724_p3 = scmp.lt.u32.totalorder %s7720_s22, %s9486_s0 }
  0x28   :  { %p7726_p4 = pnand %p7724_p3, %p7721_p2 }
  0x2a   :  { %7729 = shalt.err (!%p7726_p4)
}
  0x2b   :  { %s7730_s11 = scalar_lea.vmem %s26_s30, 16384  ;;  %p7735_p6 = scmp.lt.s32.totalorder %s26_s30, %s26_s30 }
  0x2c   :  { %p7731_p5 = scmp.ne.s32.totalorder %s26_s30, %s7730_s11  ;;  %p7736_p7 = scmp.lt.s32.totalorder %s7730_s11, %s7730_s11 }
  0x2e   :  { %p7737_p8 = por %p7736_p7, %p7735_p6 }
  0x30   :  { %p7738_p9 = pnand %p7737_p8, %p7731_p5 }
  0x32   :  { %7741 = shalt.err (!%p7738_p9)
}
  0x33   :  { %s7823_s4 = smov 512   ;;  %s7824_s28 = smov 32  }
  0x34   :  { %31 = dma.hbm_to_vmem [thread:$0]  %s9486_s0, 16384, %s26_s30, [#allocation6], %s7823_s4, %s7823_s4, %s7824_s28  }
  0x35   :  { %s7825_s15 = smov [#allocation9]   ;;  %s7826_s17 = smov [#allocation12]  }
  0x36   :  { %s50_s16 = sshll.u32 %s7825_s15, 4  ;;  %s74_s18 = sshll.u32 %s7826_s17, 4  ;;  %s51_s16 = int_to_ptr.vmem [resolvable:$true] %s50_s16  ;;  %s75_s18 = int_to_ptr.vmem [resolvable:$true] %s74_s18 }
  0x37   :  { %s7742_s19 = scalar_lea.hbm %s9488_s2, 32 }
  0x38   :  { %p7743_p10 = scmp.ne.s32.totalorder %s9488_s2, %s7742_s19  ;;  %p7746_p11 = scmp.lt.u32.totalorder %s7742_s19, %s9488_s2 }
  0x3a   :  { %p7748_p12 = pnand %p7746_p11, %p7743_p10 }
  0x3c   :  { %7751 = shalt.err (!%p7748_p12)
}
  0x3d   :  { %s7752_s0 = scalar_lea.vmem %s51_s16, 32  ;;  %p7757_p0 = scmp.lt.s32.totalorder %s51_s16, %s51_s16 }
  0x3e   :  { %p7753_p13 = scmp.ne.s32.totalorder %s51_s16, %s7752_s0  ;;  %p7758_p1 = scmp.lt.s32.totalorder %s7752_s0, %s7752_s0 }
  0x40   :  { %p7759_p2 = por %p7758_p1, %p7757_p0 }
  0x42   :  { %p7760_p3 = pnand %p7759_p2, %p7753_p13 }
  0x44   :  { %7763 = shalt.err (!%p7760_p3)
}
  0x45   :  { %53 = dma.hbm_to_vmem [thread:$0]  %s9488_s2, 32, %s51_s16, [#allocation8]  }
  0x46   :  { %s7764_s11 = scalar_lea.hbm %s9493_s7, 16 }
  0x47   :  { %p7765_p4 = scmp.ne.s32.totalorder %s9493_s7, %s7764_s11  ;;  %p7768_p5 = scmp.lt.u32.totalorder %s7764_s11, %s9493_s7 }
  0x49   :  { %p7770_p6 = pnand %p7768_p5, %p7765_p4 }
  0x4b   :  { %7773 = shalt.err (!%p7770_p6)
}
  0x4c   :  { %s7774_s17 = scalar_lea.vmem %s75_s18, 16  ;;  %s7778_s1 = scalar_lea.vmem %s75_s18, 32 }
  0x4d   :  { %p7775_p7 = scmp.ne.s32.totalorder %s75_s18, %s7774_s17  ;;  %p7779_p8 = scmp.lt.s32.totalorder %s75_s18, %s75_s18 }
  0x4e   :  { %p7780_p9 = scmp.lt.s32.totalorder %s7778_s1, %s7774_s17 }
  0x50   :  { %p7781_p10 = por %p7780_p9, %p7779_p8 }
  0x52   :  { %p7782_p11 = pnand %p7781_p10, %p7775_p7 }
  0x54   :  { %7785 = shalt.err (!%p7782_p11)
}
  0x55   :  { %77 = dma.hbm_to_vmem [thread:$0]  %s9493_s7, 16, %s75_s18, [#allocation11]  }
  0x56   :  { %s7827_s14 = smov [#allocation13]   ;;  %s7786_s22 = scalar_lea.hbm %s9495_s9, 16 }
  0x57   :  { %s86_s19 = sshll.u32 %s7827_s14, 4  ;;  %p7787_p12 = scmp.ne.s32.totalorder %s9495_s9, %s7786_s22  ;;  %s87_s19 = int_to_ptr.vmem [resolvable:$true] %s86_s19 }
  0x58   :  { %p7790_p13 = scmp.lt.u32.totalorder %s7786_s22, %s9495_s9 }
  0x5a   :  { %p7792_p0 = pnand %p7790_p13, %p7787_p12 }
  0x5c   :  { %7795 = shalt.err (!%p7792_p0)
}
  0x5d   :  { %s7796_s27 = scalar_lea.vmem %s87_s19, 16  ;;  %s7800_s7 = scalar_lea.vmem %s87_s19, 32 }
  0x5e   :  { %p7797_p1 = scmp.ne.s32.totalorder %s87_s19, %s7796_s27  ;;  %p7801_p2 = scmp.lt.s32.totalorder %s87_s19, %s87_s19 }
  0x5f   :  { %p7802_p3 = scmp.lt.s32.totalorder %s7800_s7, %s7796_s27 }
  0x61   :  { %p7803_p4 = por %p7802_p3, %p7801_p2 }
  0x63   :  { %p7804_p5 = pnand %p7803_p4, %p7797_p1 }
  0x65   :  { %7807 = shalt.err (!%p7804_p5)
}
  0x66   :  { %89 = dma.hbm_to_vmem [thread:$0]  %s9495_s9, 16, %s87_s19, [#allocation14]  }
  0x67   :  { %7808 = dma.done.wait [#allocation6], 16384  }
  0x68   :  { %7809 = vsyncadd [#allocation6], 4294950912 }
  0x69   :  { %7810 = dma.done.wait [#allocation8], 16416  }
  0x6a   :  { %7811 = vsyncadd [#allocation8], 4294950880 }
  0x6b   :  { %7812 = dma.done.wait [#allocation11], 144  }
  0x6c   :  { %7813 = vsyncadd [#allocation11], 4294967152 }
  0x6d   :  { %7814 = dma.done.wait [#allocation14], 16  }
  0x6e   :  { %7815 = vsyncadd [#allocation14], 4294967280  ;;  %s113_s11 = sld [smem:[#allocation0]]   ;;  %s7828_s28 = smov 1024   ;;  %vm2884_vm0 = vcmask 523264   ;;  %vm3326_vm1 = vcmask 1040384  }
  0x6f   :  { %125 = sst [smem:[#allocation16]] %s7828_s28  ;;  %s7829_s12 = smov 64  }
  0x70   :  { %127 = sst [smem:[#allocation16 + $0x1]] %s7828_s28  ;;  %s7830_s13 = smov [#allocation2]  }
  0x71   :  { %129 = sst [smem:[#allocation16 + $0x2]] %s7820_s24  ;;  %s121_s9 = sshll.u32 %s7830_s13, 4  ;;  %s122_s9 = int_to_ptr.vmem [resolvable:$true] %s121_s9 }
  0x72   :  { %131 = sst [smem:[#allocation16 + $0x3]] %s7829_s12  ;;  %s7831_s15 = smov 2  }
  0x73   :  { %133 = sst [smem:[#allocation16 + $0x4]] %s7819_s23  ;;  %s7832_s2 = smov 4  }
  0x74   :  { %135 = sst [smem:[#allocation16 + $0x5]] %s7831_s15  ;;  %s6261_s17 = sshll.u32 %s113_s11, 26 }
  0x75   :  { %137 = sst [smem:[#allocation16 + $0x6]] %s7823_s4  ;;  %s6262_s1 = sadd.s32 134217728, %s6261_s17 }
  0x76   :  { %139 = sst [smem:[#allocation16 + $0x7]] %s7829_s12  ;;  %s7833_s16 = smov [#allocation3]  }
  0x77   :  { %141 = sst [smem:[#allocation16 + $0x8]] %s7832_s2  ;;  %s7834_s14 = smov [#allocation15]  }
  0x78   :  { %143 = dma.general %s9489_s3, 65536, %s122_s9, %s7833_s16, %s7834_s14, [#allocation16], %s6262_s1, 0  }
  0x79   :  { %v7292_v0 = vld [vmem:[#allocation7 + $0x4] ss:$8 sps:$4 sm:$0xff]   ;;  %v7294_v1 = vld [vmem:[#allocation7] ss:$8 sps:$4 sm:$0xff]   ;;  %v7295_v2 = vld [vmem:[#allocation7 + $0x14] ss:$8 sps:$4 sm:$0xff]  }
  0x7a   :  { %1692 = vmatprep.subr.bf16.mxu0 %v7292_v0  ;;  %v7297_v3 = vld [vmem:[#allocation7 + $0x10] ss:$8 sps:$4 sm:$0xff]   ;;  %v7298_v4 = vld [vmem:[#allocation7 + $0x24] ss:$8 sps:$4 sm:$0xff]   ;;  %v7300_v5 = vld [vmem:[#allocation7 + $0x20] ss:$8 sps:$4 sm:$0xff]  }
  0x7b   :  { %1693 = vmatpush1.bf16.msra.mxu0 %v7294_v1  ;;  %v7301_v6 = vld [vmem:[#allocation7 + $0x34] ss:$8 sps:$4 sm:$0xff]   ;;  %v7303_v7 = vld [vmem:[#allocation7 + $0x30] ss:$8 sps:$4 sm:$0xff]   ;;  %v7304_v8 = vld [vmem:[#allocation7 + $0x44] ss:$8 sps:$4 sm:$0xff]  }
  0x7c   :  { %1694 = vmatprep.subr.bf16.mxu0 %v7295_v2  ;;  %v7306_v9 = vld [vmem:[#allocation7 + $0x40] ss:$8 sps:$4 sm:$0xff]   ;;  %v7307_v10 = vld [vmem:[#allocation7 + $0x54] ss:$8 sps:$4 sm:$0xff]   ;;  %v7309_v11 = vld [vmem:[#allocation7 + $0x50] ss:$8 sps:$4 sm:$0xff]  }
  0x7d   :  { %v7310_v12 = vld [vmem:[#allocation7 + $0x64] ss:$8 sps:$4 sm:$0xff]   ;;  %v7312_v16 = vld [vmem:[#allocation7 + $0x60] ss:$8 sps:$4 sm:$0xff]   ;;  %v7313_v17 = vld [vmem:[#allocation7 + $0x74] ss:$8 sps:$4 sm:$0xff]  }
  0x7e   :  { %v144_v13 = vld [vmem:[#allocation5] sm:$0xff]  ;;  %v7315_v18 = vld [vmem:[#allocation7 + $0x70] ss:$8 sps:$4 sm:$0xff]   ;;  %v7319_v21 = vld [vmem:[#allocation7 + $0x94] ss:$8 sps:$4 sm:$0xff]  }
  0x7f   :  { %1695 = vmatpush1.bf16.msra.mxu0 %v7297_v3  ;;  %v148_v14 = vld [vmem:[#allocation5 + $0x20] sm:$0xff]  ;;  %v7321_v22 = vld [vmem:[#allocation7 + $0x90] ss:$8 sps:$4 sm:$0xff]   ;;  %v7325_v25 = vld [vmem:[#allocation7 + $0xb4] ss:$8 sps:$4 sm:$0xff]  }
  0x80   :  { %1696 = vmatprep.subr.bf16.mxu0 %v7298_v4  ;;  %v7977_v15 = vcombine.high %v144_v13, %v148_v14  ;;  %v7316_v19 = vld [vmem:[#allocation7 + $0x84] ss:$8 sps:$4 sm:$0xff]   ;;  %v7318_v20 = vld [vmem:[#allocation7 + $0x80] ss:$8 sps:$4 sm:$0xff]   ;;  %v7327_v26 = vld [vmem:[#allocation7 + $0xb0] ss:$8 sps:$4 sm:$0xff]   ;;  %v7980_v39 = vcombine.low %v144_v13, %v148_v14 }
  0x81   :  { %v7322_v23 = vld [vmem:[#allocation7 + $0xa4] ss:$8 sps:$4 sm:$0xff]   ;;  %v7324_v24 = vld [vmem:[#allocation7 + $0xa0] ss:$8 sps:$4 sm:$0xff]   ;;  %v7331_v29 = vld [vmem:[#allocation7 + $0xd4] ss:$8 sps:$4 sm:$0xff]  }
  0x82   :  { %1724 = vmatprep.mubr.bf16.mxu0 %v7977_v15  ;;  %v7328_v27 = vld [vmem:[#allocation7 + $0xc4] ss:$8 sps:$4 sm:$0xff]   ;;  %v7330_v28 = vld [vmem:[#allocation7 + $0xc0] ss:$8 sps:$4 sm:$0xff]   ;;  %v7333_v30 = vld [vmem:[#allocation7 + $0xd0] ss:$8 sps:$4 sm:$0xff]  }
  0x83   :  { %1697 = vmatpush1.bf16.msra.mxu0 %v7300_v5  ;;  %v7334_v31 = vld [vmem:[#allocation7 + $0xe4] ss:$8 sps:$4 sm:$0xff]   ;;  %v7336_v32 = vld [vmem:[#allocation7 + $0xe0] ss:$8 sps:$4 sm:$0xff]   ;;  %v7337_v33 = vld [vmem:[#allocation7 + $0xf4] ss:$8 sps:$4 sm:$0xff]  }
  0x84   :  { %1698 = vmatprep.subr.bf16.mxu0 %v7301_v6  ;;  %v7339_v34 = vld [vmem:[#allocation7 + $0xf0] ss:$8 sps:$4 sm:$0xff]   ;;  %v7342_v35 = vld [vmem:[#allocation7 + $0x104] ss:$8 sps:$4 sm:$0xff]   ;;  %v7340_v38 = vld [vmem:[#allocation7 + $0x100] ss:$8 sps:$4 sm:$0xff]  }
  0x85   :  { %v152_v36 = vld [vmem:[#allocation5 + $0x40] sm:$0xff]  ;;  %v7345_v40 = vld [vmem:[#allocation7 + $0x114] ss:$8 sps:$4 sm:$0xff]   ;;  %v7343_v42 = vld [vmem:[#allocation7 + $0x110] ss:$8 sps:$4 sm:$0xff]  }
  0x86   :  { %v156_v37 = vld [vmem:[#allocation5 + $0x60] sm:$0xff]  ;;  %v7351_v48 = vld [vmem:[#allocation7 + $0x134] ss:$8 sps:$4 sm:$0xff]   ;;  %v7349_v52 = vld [vmem:[#allocation7 + $0x130] ss:$8 sps:$4 sm:$0xff]  }
  0x87   :  { %1699 = vmatpush1.bf16.msra.mxu0 %v7303_v7  ;;  %v7982_v41 = vcombine.high %v152_v36, %v156_v37  ;;  %v160_v43 = vld [vmem:[#allocation5 + $0x80] sm:$0xff]  ;;  %v7986_v47 = vcombine.low %v152_v36, %v156_v37  ;;  %v7357_v57 = vld [vmem:[#allocation7 + $0x154] ss:$8 sps:$4 sm:$0xff]   ;;  %v7355_v58 = vld [vmem:[#allocation7 + $0x150] ss:$8 sps:$4 sm:$0xff]  }
  0x88   :  { %1700 = vmatprep.subr.bf16.mxu0 %v7304_v8  ;;  %v164_v44 = vld [vmem:[#allocation5 + $0xa0] sm:$0xff]  ;;  %v7363_v1 = vld [vmem:[#allocation7 + $0x174] ss:$8 sps:$4 sm:$0xff]   ;;  %v7361_v2 = vld [vmem:[#allocation7 + $0x170] ss:$8 sps:$4 sm:$0xff]  }
  0x89   :  { %v7348_v45 = vld [vmem:[#allocation7 + $0x124] ss:$8 sps:$4 sm:$0xff]   ;;  %v7346_v46 = vld [vmem:[#allocation7 + $0x120] ss:$8 sps:$4 sm:$0xff]   ;;  %v7988_v49 = vcombine.high %v160_v43, %v164_v44  ;;  %v7992_v54 = vcombine.low %v160_v43, %v164_v44 }
  0x8a   :  { %v168_v50 = vld [vmem:[#allocation5 + $0xc0] sm:$0xff] }
  0x8b   :  { %1701 = vmatpush1.bf16.msra.mxu0 %v7306_v9  ;;  %v172_v51 = vld [vmem:[#allocation5 + $0xe0] sm:$0xff]  ;;  %v7369_v9 = vld [vmem:[#allocation7 + $0x194] ss:$8 sps:$4 sm:$0xff]  }
  0x8c   :  { %1702 = vmatprep.subr.bf16.mxu0 %v7307_v10  ;;  %v7354_v53 = vld [vmem:[#allocation7 + $0x144] ss:$8 sps:$4 sm:$0xff]   ;;  %v7994_v55 = vcombine.high %v168_v50, %v172_v51  ;;  %v7352_v56 = vld [vmem:[#allocation7 + $0x140] ss:$8 sps:$4 sm:$0xff]   ;;  %v7998_v62 = vcombine.low %v168_v50, %v172_v51  ;;  %v7367_v10 = vld [vmem:[#allocation7 + $0x190] ss:$8 sps:$4 sm:$0xff]  }
  0x8d   :  { %v176_v59 = vld [vmem:[#allocation5 + $0x100] sm:$0xff] }
  0x8e   :  { %v180_v60 = vld [vmem:[#allocation5 + $0x120] sm:$0xff] }
  0x8f   :  { %1703 = vmatpush1.bf16.msra.mxu0 %v7309_v11  ;;  %v7360_v61 = vld [vmem:[#allocation7 + $0x164] ss:$8 sps:$4 sm:$0xff]   ;;  %v8000_v63 = vcombine.high %v176_v59, %v180_v60  ;;  %v7358_v0 = vld [vmem:[#allocation7 + $0x160] ss:$8 sps:$4 sm:$0xff]   ;;  %v8004_v6 = vcombine.low %v176_v59, %v180_v60 }
  0x90   :  { %1704 = vmatprep.subr.bf16.mxu0 %v7310_v12  ;;  %v184_v3 = vld [vmem:[#allocation5 + $0x140] sm:$0xff] }
  0x91   :  { %9605 = vst [vmem:[#allocation22_spill] sm:$0xff] %v8000_v63  ;;  %v188_v4 = vld [vmem:[#allocation5 + $0x160] sm:$0xff]  ;;  %9606 = vst [vmem:[#allocation23_spill] sm:$0xff] %v8004_v6 }
  0x92   :  { %v7366_v5 = vld [vmem:[#allocation7 + $0x184] ss:$8 sps:$4 sm:$0xff]   ;;  %v8006_v7 = vcombine.high %v184_v3, %v188_v4  ;;  %v7364_v8 = vld [vmem:[#allocation7 + $0x180] ss:$8 sps:$4 sm:$0xff]   ;;  %v8010_v14 = vcombine.low %v184_v3, %v188_v4 }
  0x93   :  { %1705 = vmatpush1.bf16.msra.mxu0 %v7312_v16  ;;  %v192_v11 = vld [vmem:[#allocation5 + $0x180] sm:$0xff] }
  0x94   :  { %1706 = vmatprep.subr.bf16.mxu0 %v7313_v17  ;;  %9607 = vst [vmem:[#allocation24_spill] sm:$0xff] %v8006_v7  ;;  %v196_v12 = vld [vmem:[#allocation5 + $0x1a0] sm:$0xff]  ;;  %9608 = vst [vmem:[#allocation25_spill] sm:$0xff] %v8010_v14 }
  0x95   :  { %v7372_v13 = vld [vmem:[#allocation7 + $0x1a4] ss:$8 sps:$4 sm:$0xff]   ;;  %v8012_v16 = vcombine.high %v192_v11, %v196_v12  ;;  %v7370_v17 = vld [vmem:[#allocation7 + $0x1a0] ss:$8 sps:$4 sm:$0xff]  }
  0x96   :  { %v216_v36 = vld [vmem:[#allocation5 + $0x240] sm:$0xff] }
  0x97   :  { %1707 = vmatpush1.bf16.msra.mxu0 %v7315_v18  ;;  %9609 = vst [vmem:[#allocation26_spill] sm:$0xff] %v8012_v16  ;;  %v7375_v18 = vld [vmem:[#allocation7 + $0x1b4] ss:$8 sps:$4 sm:$0xff]   ;;  %v220_v37 = vld [vmem:[#allocation5 + $0x260] sm:$0xff] }
  0x98   :  { %1708 = vmatprep.subr.bf16.mxu0 %v7316_v19  ;;  %v7373_v19 = vld [vmem:[#allocation7 + $0x1b0] ss:$8 sps:$4 sm:$0xff]   ;;  %v224_v43 = vld [vmem:[#allocation5 + $0x280] sm:$0xff] }
  0x99   :  { %v228_v44 = vld [vmem:[#allocation5 + $0x2a0] sm:$0xff] }
  0x9a   :  { %v236_v50 = vld [vmem:[#allocation5 + $0x2e0] sm:$0xff]  ;;  %v8040_v51 = vcombine.low %v224_v43, %v228_v44 }
  0x9b   :  { %1709 = vmatpush1.bf16.msra.mxu0 %v7318_v20  ;;  %v200_v20 = vld [vmem:[#allocation5 + $0x1c0] sm:$0xff] }
  0x9c   :  { %1710 = vmatprep.subr.bf16.mxu0 %v7319_v21  ;;  %v204_v21 = vld [vmem:[#allocation5 + $0x1e0] sm:$0xff]  ;;  %9618 = vst [vmem:[#allocation35_spill] sm:$0xff] %v8040_v51 }
  0x9d   :  { %v248_v59 = vld [vmem:[#allocation5 + $0x340] sm:$0xff] }
  0x9e   :  { %v252_v60 = vld [vmem:[#allocation5 + $0x360] sm:$0xff] }
  0x9f   :  { %1711 = vmatpush1.bf16.msra.mxu0 %v7321_v22  ;;  %v7378_v22 = vld [vmem:[#allocation7 + $0x1c4] ss:$8 sps:$4 sm:$0xff]   ;;  %v8058_v3 = vcombine.low %v248_v59, %v252_v60 }
  0xa0   :  { %1712 = vmatprep.subr.bf16.mxu0 %v7322_v23  ;;  %v8016_v23 = vcombine.low %v192_v11, %v196_v12  ;;  %v145_v11 = vld [vmem:[#allocation5 + $0x8] sm:$0xff] }
  0xa1   :  { %9624 = vst [vmem:[#allocation41_spill] sm:$0xff] %v8058_v3  ;;  %v149_v12 = vld [vmem:[#allocation5 + $0x28] sm:$0xff] }
  0xa2   :  { %9610 = vst [vmem:[#allocation27_spill] sm:$0xff] %v8016_v23 }
  0xa3   :  { %1713 = vmatpush1.bf16.msra.mxu0 %v7324_v24  ;;  %v8018_v24 = vcombine.high %v200_v20, %v204_v21 }
  0xa4   :  { %1714 = vmatprep.subr.bf16.mxu0 %v7325_v25  ;;  %v7376_v25 = vld [vmem:[#allocation7 + $0x1c0] ss:$8 sps:$4 sm:$0xff]  }
  0xa5   :  { %9611 = vst [vmem:[#allocation28_spill] sm:$0xff] %v8018_v24 }
  0xa7   :  { %1715 = vmatpush1.bf16.msra.mxu0 %v7327_v26  ;;  %v7381_v26 = vld [vmem:[#allocation7 + $0x1d4] ss:$8 sps:$4 sm:$0xff]  }
  0xa8   :  { %1716 = vmatprep.subr.bf16.mxu0 %v7328_v27  ;;  %v7379_v27 = vld [vmem:[#allocation7 + $0x1d0] ss:$8 sps:$4 sm:$0xff]  }
  0xab   :  { %1717 = vmatpush1.bf16.msra.mxu0 %v7330_v28  ;;  %v208_v28 = vld [vmem:[#allocation5 + $0x200] sm:$0xff] }
  0xac   :  { %1718 = vmatprep.subr.bf16.mxu0 %v7331_v29  ;;  %v212_v29 = vld [vmem:[#allocation5 + $0x220] sm:$0xff] }
  0xaf   :  { %1719 = vmatpush1.bf16.msra.mxu0 %v7333_v30  ;;  %v7384_v30 = vld [vmem:[#allocation7 + $0x1e4] ss:$8 sps:$4 sm:$0xff]  }
  0xb0   :  { %1720 = vmatprep.subr.bf16.mxu0 %v7334_v31  ;;  %v8022_v31 = vcombine.low %v200_v20, %v204_v21  ;;  %v8076_v20 = vcombine.low %v145_v11, %v149_v12  ;;  %v7388_v21 = vld [vmem:[#allocation7 + $0x200] ss:$8 sps:$4 sm:$0xff]  }
  0xb2   :  { %9612 = vst [vmem:[#allocation29_spill] sm:$0xff] %v8022_v31 }
  0xb3   :  { %1721 = vmatpush1.bf16.msra.mxu0 %v7336_v32  ;;  %v8024_v32 = vcombine.high %v208_v28, %v212_v29 }
  0xb4   :  { %1722 = vmatprep.subr.bf16.mxu0 %v7337_v33  ;;  %v7382_v33 = vld [vmem:[#allocation7 + $0x1e0] ss:$8 sps:$4 sm:$0xff]  }
  0xb5   :  { %9613 = vst [vmem:[#allocation30_spill] sm:$0xff] %v8024_v32 }
  0xb7   :  { %1723 = vmatpush1.bf16.msra.mxu0 %v7339_v34  ;;  %v7387_v34 = vld [vmem:[#allocation7 + $0x1f4] ss:$8 sps:$4 sm:$0xff]  }
  0xb8   :  { %1885 = vmatprep.subr.bf16.mxu0 %v7342_v35  ;;  %v7385_v35 = vld [vmem:[#allocation7 + $0x1f0] ss:$8 sps:$4 sm:$0xff]  }
  0xba   :  { %1725 = vmatmul.mubr.bf16.vlgmr.msra.gmra.mrb[0].mxu0 %v7980_v39 }
  0xbb   :  { %1886 = vmatpush1.bf16.msra.mxu0 %v7340_v38  ;;  %1734 = vmatprep.mubr.bf16.mxu0 %v7982_v41  ;;  %v7390_v38 = vld [vmem:[#allocation7 + $0x204] ss:$8 sps:$4 sm:$0xff]  }
  0xbc   :  { %1887 = vmatprep.subr.bf16.mxu0 %v7345_v40  ;;  %v8028_v40 = vcombine.low %v208_v28, %v212_v29  ;;  %v165_v28 = vld [vmem:[#allocation5 + $0xa8] sm:$0xff] }
  0xbd   :  { %v7396_v29 = vld [vmem:[#allocation7 + $0x224] ss:$8 sps:$4 sm:$0xff]  }
  0xbe   :  { %9614 = vst [vmem:[#allocation31_spill] sm:$0xff] %v8028_v40 }
  0xbf   :  { %1888 = vmatpush1.bf16.msra.mxu0 %v7343_v42  ;;  %v8030_v42 = vcombine.high %v216_v36, %v220_v37 }
  0xc0   :  { %1889 = vmatprep.subr.bf16.mxu0 %v7348_v45  ;;  %v8034_v45 = vcombine.low %v216_v36, %v220_v37  ;;  %v7397_v36 = vld [vmem:[#allocation7 + $0x230] ss:$8 sps:$4 sm:$0xff]   ;;  %v169_v37 = vld [vmem:[#allocation5 + $0xc8] sm:$0xff] }
  0xc1   :  { %9615 = vst [vmem:[#allocation32_spill] sm:$0xff] %v8030_v42 }
  0xc2   :  { %1735 = vmatmul.mubr.bf16.gmra.mrb[4].mxu0 %v7986_v47  ;;  %9616 = vst [vmem:[#allocation33_spill] sm:$0xff] %v8034_v45 }
  0xc3   :  { %1744 = vmatprep.mubr.bf16.mxu0 %v7988_v49  ;;  %1890 = vmatpush1.bf16.msra.mxu0 %v7346_v46  ;;  %v8036_v46 = vcombine.high %v224_v43, %v228_v44  ;;  %v7402_v43 = vld [vmem:[#allocation7 + $0x244] ss:$8 sps:$4 sm:$0xff]  }
  0xc4   :  { %1891 = vmatprep.subr.bf16.mxu0 %v7351_v48  ;;  %v232_v48 = vld [vmem:[#allocation5 + $0x2c0] sm:$0xff] }
  0xc5   :  { %9617 = vst [vmem:[#allocation34_spill] sm:$0xff] %v8036_v46 }
  0xc7   :  { %1892 = vmatpush1.bf16.msra.mxu0 %v7349_v52  ;;  %v8042_v52 = vcombine.high %v232_v48, %v236_v50 }
  0xc8   :  { %1893 = vmatprep.subr.bf16.mxu0 %v7354_v53  ;;  %v240_v53 = vld [vmem:[#allocation5 + $0x300] sm:$0xff] }
  0xc9   :  { %9619 = vst [vmem:[#allocation36_spill] sm:$0xff] %v8042_v52 }
  0xca   :  { %1745 = vmatmul.mubr.bf16.gmra.mrb[8].mxu0 %v7992_v54 }
  0xcb   :  { %1754 = vmatprep.mubr.bf16.mxu0 %v7994_v55  ;;  %1894 = vmatpush1.bf16.msra.mxu0 %v7352_v56  ;;  %v244_v56 = vld [vmem:[#allocation5 + $0x320] sm:$0xff] }
  0xcc   :  { %1895 = vmatprep.subr.bf16.mxu0 %v7357_v57  ;;  %v8046_v57 = vcombine.low %v232_v48, %v236_v50  ;;  %v7400_v50 = vld [vmem:[#allocation7 + $0x240] ss:$8 sps:$4 sm:$0xff]  }
  0xce   :  { %9620 = vst [vmem:[#allocation37_spill] sm:$0xff] %v8046_v57 }
  0xcf   :  { %1896 = vmatpush1.bf16.msra.mxu0 %v7355_v58  ;;  %v8048_v58 = vcombine.high %v240_v53, %v244_v56 }
  0xd0   :  { %1897 = vmatprep.subr.bf16.mxu0 %v7360_v61  ;;  %v8052_v61 = vcombine.low %v240_v53, %v244_v56  ;;  %v7405_v53 = vld [vmem:[#allocation7 + $0x254] ss:$8 sps:$4 sm:$0xff]   ;;  %v7403_v56 = vld [vmem:[#allocation7 + $0x250] ss:$8 sps:$4 sm:$0xff]  }
  0xd1   :  { %9621 = vst [vmem:[#allocation38_spill] sm:$0xff] %v8048_v58 }
  0xd2   :  { %1755 = vmatmul.mubr.bf16.gmra.mrb[12].mxu0 %v7998_v62  ;;  %9622 = vst [vmem:[#allocation39_spill] sm:$0xff] %v8052_v61 }
  0xd3   :  { %1764 = vmatprep.mubr.bf16.mxu0 %v8000_v63  ;;  %1898 = vmatpush1.bf16.msra.mxu0 %v7358_v0  ;;  %v8054_v0 = vcombine.high %v248_v59, %v252_v60  ;;  %v177_v59 = vld [vmem:[#allocation5 + $0x108] sm:$0xff] }
  0xd4   :  { %1899 = vmatprep.subr.bf16.mxu0 %v7363_v1  ;;  %v256_v1 = vld [vmem:[#allocation5 + $0x380] sm:$0xff]  ;;  %v181_v60 = vld [vmem:[#allocation5 + $0x128] sm:$0xff] }
  0xd5   :  { %9623 = vst [vmem:[#allocation40_spill] sm:$0xff] %v8054_v0 }
  0xd7   :  { %1900 = vmatpush1.bf16.msra.mxu0 %v7361_v2  ;;  %v260_v2 = vld [vmem:[#allocation5 + $0x3a0] sm:$0xff] }
  0xd8   :  { %1901 = vmatprep.subr.bf16.mxu0 %v7366_v5  ;;  %v8060_v4 = vcombine.high %v256_v1, %v260_v2  ;;  %v264_v5 = vld [vmem:[#allocation5 + $0x3c0] sm:$0xff] }
  0xda   :  { %1765 = vmatmul.mubr.bf16.gmra.mrb[16].mxu0 %v8004_v6  ;;  %9625 = vst [vmem:[#allocation42_spill] sm:$0xff] %v8060_v4 }
  0xdb   :  { %1774 = vmatprep.mubr.bf16.mxu0 %v8006_v7  ;;  %1902 = vmatpush1.bf16.msra.mxu0 %v7364_v8  ;;  %v268_v8 = vld [vmem:[#allocation5 + $0x3e0] sm:$0xff] }
  0xdc   :  { %1903 = vmatprep.subr.bf16.mxu0 %v7369_v9  ;;  %v8064_v9 = vcombine.low %v256_v1, %v260_v2  ;;  %v7408_v1 = vld [vmem:[#allocation7 + $0x264] ss:$8 sps:$4 sm:$0xff]  }
  0xde   :  { %9626 = vst [vmem:[#allocation43_spill] sm:$0xff] %v8064_v9 }
  0xdf   :  { %1904 = vmatpush1.bf16.msra.mxu0 %v7367_v10  ;;  %v8066_v10 = vcombine.high %v264_v5, %v268_v8 }
  0xe0   :  { %1905 = vmatprep.subr.bf16.mxu0 %v7372_v13  ;;  %v8070_v13 = vcombine.low %v264_v5, %v268_v8  ;;  %v8096_v5 = vcombine.high %v177_v59, %v181_v60  ;;  %v7406_v8 = vld [vmem:[#allocation7 + $0x260] ss:$8 sps:$4 sm:$0xff]  }
  0xe1   :  { %9627 = vst [vmem:[#allocation44_spill] sm:$0xff] %v8066_v10 }
  0xe2   :  { %1775 = vmatmul.mubr.bf16.gmra.mrb[20].mxu0 %v8010_v14  ;;  %9628 = vst [vmem:[#allocation45_spill] sm:$0xff] %v8070_v13  ;;  %9629 = vst [vmem:[#allocation46_spill] sm:$0xff] %v8096_v5 }
  0xe3   :  { %1784 = vmatprep.mubr.bf16.mxu0 %v8012_v16  ;;  %1906 = vmatpush1.bf16.msra.mxu0 %v7370_v17  ;;  %v8072_v17 = vcombine.high %v145_v11, %v149_v12  ;;  %v7411_v11 = vld [vmem:[#allocation7 + $0x274] ss:$8 sps:$4 sm:$0xff]   ;;  %v7409_v12 = vld [vmem:[#allocation7 + $0x270] ss:$8 sps:$4 sm:$0xff]  }
  0xe4   :  { %1907 = vmatprep.subr.bf16.mxu0 %v7375_v18  ;;  %v153_v18 = vld [vmem:[#allocation5 + $0x48] sm:$0xff] }
  0xe7   :  { %1908 = vmatpush1.bf16.msra.mxu0 %v7373_v19  ;;  %v157_v19 = vld [vmem:[#allocation5 + $0x68] sm:$0xff] }
  0xe8   :  { %1909 = vmatprep.subr.bf16.mxu0 %v7378_v22  ;;  %v8078_v22 = vcombine.high %v153_v18, %v157_v19 }
  0xea   :  { %1785 = vmatmul.mubr.bf16.gmra.mrb[24].mxu0 %v8016_v23 }
  0xeb   :  { %1794 = vmatprep.mubr.bf16.mxu0 %v8018_v24  ;;  %1910 = vmatpush1.bf16.msra.mxu0 %v7376_v25  ;;  %v7393_v25 = vld [vmem:[#allocation7 + $0x214] ss:$8 sps:$4 sm:$0xff]  }
  0xec   :  { %1911 = vmatprep.subr.bf16.mxu0 %v7381_v26  ;;  %v7391_v26 = vld [vmem:[#allocation7 + $0x210] ss:$8 sps:$4 sm:$0xff]  }
  0xef   :  { %1912 = vmatpush1.bf16.msra.mxu0 %v7379_v27  ;;  %v161_v27 = vld [vmem:[#allocation5 + $0x88] sm:$0xff] }
  0xf0   :  { %1913 = vmatprep.subr.bf16.mxu0 %v7384_v30  ;;  %v8082_v30 = vcombine.low %v153_v18, %v157_v19  ;;  %v8088_v44 = vcombine.low %v161_v27, %v165_v28  ;;  %v185_v18 = vld [vmem:[#allocation5 + $0x148] sm:$0xff] }
  0xf1   :  { %v189_v19 = vld [vmem:[#allocation5 + $0x168] sm:$0xff] }
  0xf2   :  { %1795 = vmatmul.mubr.bf16.gmra.mrb[28].mxu0 %v8022_v31 }
  0xf3   :  { %1804 = vmatprep.mubr.bf16.mxu0 %v8024_v32  ;;  %1914 = vmatpush1.bf16.msra.mxu0 %v7382_v33  ;;  %v8084_v33 = vcombine.high %v161_v27, %v165_v28  ;;  %v7412_v27 = vld [vmem:[#allocation7 + $0x280] ss:$8 sps:$4 sm:$0xff]   ;;  %v7417_v28 = vld [vmem:[#allocation7 + $0x294] ss:$8 sps:$4 sm:$0xff]  }
  0xf4   :  { %1915 = vmatprep.subr.bf16.mxu0 %v7387_v34  ;;  %v7394_v34 = vld [vmem:[#allocation7 + $0x220] ss:$8 sps:$4 sm:$0xff]   ;;  %v187_v32 = vld [vmem:[#allocation5 + $0x158] sm:$0xff] }
  0xf7   :  { %1916 = vmatpush1.bf16.msra.mxu0 %v7385_v35  ;;  %v7399_v35 = vld [vmem:[#allocation7 + $0x234] ss:$8 sps:$4 sm:$0xff]  }
  0xf8   :  { %2078 = vmatprep.subr.bf16.mxu0 %v7390_v38  ;;  %v173_v38 = vld [vmem:[#allocation5 + $0xe8] sm:$0xff] }
  0xf9   :  { %v8090_v48 = vcombine.high %v169_v37, %v173_v38  ;;  %v8094_v2 = vcombine.low %v169_v37, %v173_v38  ;;  %v8106_v37 = vcombine.low %v185_v18, %v189_v19 }
  0xfa   :  { %1805 = vmatmul.mubr.bf16.gmra.mrb[32].mxu0 %v8028_v40  ;;  %v183_v40 = vld [vmem:[#allocation5 + $0x138] sm:$0xff] }
  0xfb   :  { %1814 = vmatprep.mubr.bf16.mxu0 %v8030_v42  ;;  %9632 = vst [vmem:[#allocation49_spill] sm:$0xff] %v8106_v37 }
 0x102   :  { %1815 = vmatmul.mubr.bf16.gmra.mrb[36].mxu0 %v8034_v45  ;;  %v222_v45 = vld [vmem:[#allocation5 + $0x270] sm:$0xff] }
 0x103   :  { %1824 = vmatprep.mubr.bf16.mxu0 %v8036_v46  ;;  %v7480_v46 = vld [vmem:[#allocation7 + $0x3e4] ss:$8 sps:$4 sm:$0xff]  }
 0x10a   :  { %1825 = vmatmul.mubr.bf16.gmra.mrb[40].mxu0 %v8040_v51  ;;  %v214_v51 = vld [vmem:[#allocation5 + $0x230] sm:$0xff] }
 0x10b   :  { %1834 = vmatprep.mubr.bf16.mxu0 %v8042_v52  ;;  %v7474_v52 = vld [vmem:[#allocation7 + $0x3c4] ss:$8 sps:$4 sm:$0xff]  }
 0x112   :  { %1835 = vmatmul.mubr.bf16.gmra.mrb[44].mxu0 %v8046_v57  ;;  %v206_v57 = vld [vmem:[#allocation5 + $0x1f0] sm:$0xff] }
 0x113   :  { %1844 = vmatprep.mubr.bf16.mxu0 %v8048_v58  ;;  %v170_v58 = vld [vmem:[#allocation5 + $0xd0] sm:$0xff] }
 0x11a   :  { %1845 = vmatmul.mubr.bf16.gmra.mrb[48].mxu0 %v8052_v61 }
 0x11b   :  { %1854 = vmatprep.mubr.bf16.mxu0 %v8054_v0 }
 0x122   :  { %1855 = vmatmul.mubr.bf16.gmra.mrb[52].mxu0 %v8058_v3 }
 0x123   :  { %1864 = vmatprep.mubr.bf16.mxu0 %v8060_v4  ;;  %v269_v4 = vld [vmem:[#allocation5 + $0x3e8] sm:$0xff] }
 0x12a   :  { %1865 = vmatmul.mubr.bf16.gmra.mrb[56].mxu0 %v8064_v9  ;;  %v261_v9 = vld [vmem:[#allocation5 + $0x3a8] sm:$0xff] }
 0x12b   :  { %1874 = vmatprep.mubr.bf16.mxu0 %v8066_v10  ;;  %v257_v10 = vld [vmem:[#allocation5 + $0x388] sm:$0xff] }
 0x132   :  { %1875 = vmatmul.mubr.bf16.gmra.mrb[60].mxu0 %v8070_v13  ;;  %v253_v13 = vld [vmem:[#allocation5 + $0x368] sm:$0xff] }
 0x133   :  { %1917 = vmatprep.mubr.bf16.mxu0 %v8072_v17 }
 0x13a   :  { %1918 = vmatmul.mubr.bf16.vlgmr.msra.gmra.mrb[0].mxu0 %v8076_v20 }
 0x13b   :  { %2079 = vmatpush1.bf16.msra.mxu0 %v7388_v21  ;;  %1927 = vmatprep.mubr.bf16.mxu0 %v8078_v22  ;;  %v7414_v21 = vld [vmem:[#allocation7 + $0x284] ss:$8 sps:$4 sm:$0xff]  }
 0x13c   :  { %2080 = vmatprep.subr.bf16.mxu0 %v7393_v25  ;;  %v8100_v25 = vcombine.low %v177_v59, %v181_v60  ;;  %v205_v59 = vld [vmem:[#allocation5 + $0x1e8] sm:$0xff] }
 0x13d   :  { %v7426_v60 = vld [vmem:[#allocation7 + $0x2c4] ss:$8 sps:$4 sm:$0xff]  }
 0x13e   :  { %9630 = vst [vmem:[#allocation47_spill] sm:$0xff] %v8100_v25 }
 0x13f   :  { %2081 = vmatpush1.bf16.msra.mxu0 %v7391_v26  ;;  %v8102_v26 = vcombine.high %v185_v18, %v189_v19  ;;  %v7427_v18 = vld [vmem:[#allocation7 + $0x2d0] ss:$8 sps:$4 sm:$0xff]   ;;  %v209_v19 = vld [vmem:[#allocation5 + $0x208] sm:$0xff] }
 0x140   :  { %2082 = vmatprep.subr.bf16.mxu0 %v7396_v29  ;;  %v7415_v29 = vld [vmem:[#allocation7 + $0x290] ss:$8 sps:$4 sm:$0xff]  }
 0x141   :  { %9631 = vst [vmem:[#allocation48_spill] sm:$0xff] %v8102_v26 }
 0x142   :  { %1928 = vmatmul.mubr.bf16.gmra.mrb[4].mxu0 %v8082_v30 }
 0x143   :  { %1937 = vmatprep.mubr.bf16.mxu0 %v8084_v33  ;;  %2083 = vmatpush1.bf16.msra.mxu0 %v7394_v34  ;;  %v193_v34 = vld [vmem:[#allocation5 + $0x188] sm:$0xff] }
 0x144   :  { %2084 = vmatprep.subr.bf16.mxu0 %v7399_v35  ;;  %v197_v35 = vld [vmem:[#allocation5 + $0x1a8] sm:$0xff] }
 0x145   :  { %v8108_v38 = vcombine.high %v193_v34, %v197_v35 }
 0x147   :  { %2085 = vmatpush1.bf16.msra.mxu0 %v7397_v36  ;;  %v7420_v36 = vld [vmem:[#allocation7 + $0x2a4] ss:$8 sps:$4 sm:$0xff]   ;;  %9633 = vst [vmem:[#allocation50_spill] sm:$0xff] %v8108_v38 }
 0x148   :  { %2086 = vmatprep.subr.bf16.mxu0 %v7402_v43  ;;  %v7418_v43 = vld [vmem:[#allocation7 + $0x2a0] ss:$8 sps:$4 sm:$0xff]  }
 0x14a   :  { %1938 = vmatmul.mubr.bf16.gmra.mrb[8].mxu0 %v8088_v44 }
 0x14b   :  { %1947 = vmatprep.mubr.bf16.mxu0 %v8090_v48  ;;  %2087 = vmatpush1.bf16.msra.mxu0 %v7400_v50  ;;  %v7423_v50 = vld [vmem:[#allocation7 + $0x2b4] ss:$8 sps:$4 sm:$0xff]  }
 0x14c   :  { %2088 = vmatprep.subr.bf16.mxu0 %v7405_v53  ;;  %v7421_v53 = vld [vmem:[#allocation7 + $0x2b0] ss:$8 sps:$4 sm:$0xff]  }
 0x14f   :  { %2089 = vmatpush1.bf16.msra.mxu0 %v7403_v56  ;;  %v201_v56 = vld [vmem:[#allocation5 + $0x1c8] sm:$0xff] }
 0x150   :  { %2090 = vmatprep.subr.bf16.mxu0 %v7408_v1  ;;  %v8112_v1 = vcombine.low %v193_v34, %v197_v35  ;;  %v7430_v34 = vld [vmem:[#allocation7 + $0x2e0] ss:$8 sps:$4 sm:$0xff]   ;;  %v7435_v35 = vld [vmem:[#allocation7 + $0x2f4] ss:$8 sps:$4 sm:$0xff]  }
 0x152   :  { %1948 = vmatmul.mubr.bf16.gmra.mrb[12].mxu0 %v8094_v2  ;;  %9634 = vst [vmem:[#allocation51_spill] sm:$0xff] %v8112_v1 }
 0x153   :  { %1957 = vmatprep.mubr.bf16.mxu0 %v8096_v5  ;;  %2091 = vmatpush1.bf16.msra.mxu0 %v7406_v8  ;;  %v8114_v8 = vcombine.high %v201_v56, %v205_v59 }
 0x154   :  { %2092 = vmatprep.subr.bf16.mxu0 %v7411_v11  ;;  %v7424_v11 = vld [vmem:[#allocation7 + $0x2c0] ss:$8 sps:$4 sm:$0xff]  }
 0x155   :  { %9635 = vst [vmem:[#allocation52_spill] sm:$0xff] %v8114_v8 }
 0x157   :  { %2093 = vmatpush1.bf16.msra.mxu0 %v7409_v12  ;;  %v7429_v12 = vld [vmem:[#allocation7 + $0x2d4] ss:$8 sps:$4 sm:$0xff]  }
 0x158   :  { %2094 = vmatprep.subr.bf16.mxu0 %v7414_v21  ;;  %v213_v21 = vld [vmem:[#allocation5 + $0x228] sm:$0xff] }
 0x15a   :  { %1958 = vmatmul.mubr.bf16.gmra.mrb[16].mxu0 %v8100_v25 }
 0x15b   :  { %1967 = vmatprep.mubr.bf16.mxu0 %v8102_v26  ;;  %2095 = vmatpush1.bf16.msra.mxu0 %v7412_v27  ;;  %v7432_v27 = vld [vmem:[#allocation7 + $0x2e4] ss:$8 sps:$4 sm:$0xff]  }
 0x15c   :  { %2096 = vmatprep.subr.bf16.mxu0 %v7417_v28  ;;  %v8118_v28 = vcombine.low %v201_v56, %v205_v59  ;;  %v225_v59 = vld [vmem:[#allocation5 + $0x288] sm:$0xff] }
 0x15e   :  { %9636 = vst [vmem:[#allocation53_spill] sm:$0xff] %v8118_v28 }
 0x15f   :  { %2097 = vmatpush1.bf16.msra.mxu0 %v7415_v29  ;;  %v8120_v29 = vcombine.high %v209_v19, %v213_v21 }
 0x160   :  { %2098 = vmatprep.subr.bf16.mxu0 %v7420_v36  ;;  %v7433_v36 = vld [vmem:[#allocation7 + $0x2f0] ss:$8 sps:$4 sm:$0xff]  }
 0x161   :  { %9637 = vst [vmem:[#allocation54_spill] sm:$0xff] %v8120_v29 }
 0x162   :  { %1968 = vmatmul.mubr.bf16.gmra.mrb[20].mxu0 %v8106_v37 }
 0x163   :  { %1977 = vmatprep.mubr.bf16.mxu0 %v8108_v38  ;;  %2099 = vmatpush1.bf16.msra.mxu0 %v7418_v43  ;;  %v217_v43 = vld [vmem:[#allocation5 + $0x248] sm:$0xff] }
 0x164   :  { %2100 = vmatprep.subr.bf16.mxu0 %v7423_v50  ;;  %v221_v50 = vld [vmem:[#allocation5 + $0x268] sm:$0xff] }
 0x165   :  { %v8126_v56 = vcombine.high %v217_v43, %v221_v50 }
 0x167   :  { %2101 = vmatpush1.bf16.msra.mxu0 %v7421_v53  ;;  %v7438_v53 = vld [vmem:[#allocation7 + $0x304] ss:$8 sps:$4 sm:$0xff]   ;;  %9639 = vst [vmem:[#allocation56_spill] sm:$0xff] %v8126_v56 }
 0x168   :  { %2102 = vmatprep.subr.bf16.mxu0 %v7426_v60  ;;  %v8124_v60 = vcombine.low %v209_v19, %v213_v21  ;;  %v233_v19 = vld [vmem:[#allocation5 + $0x2c8] sm:$0xff] }
 0x169   :  { %v237_v21 = vld [vmem:[#allocation5 + $0x2e8] sm:$0xff] }
 0x16a   :  { %1978 = vmatmul.mubr.bf16.gmra.mrb[24].mxu0 %v8112_v1  ;;  %9638 = vst [vmem:[#allocation55_spill] sm:$0xff] %v8124_v60 }
 0x16b   :  { %1987 = vmatprep.mubr.bf16.mxu0 %v8114_v8  ;;  %2103 = vmatpush1.bf16.msra.mxu0 %v7424_v11  ;;  %v229_v11 = vld [vmem:[#allocation5 + $0x2a8] sm:$0xff] }
 0x16c   :  { %2104 = vmatprep.subr.bf16.mxu0 %v7429_v12  ;;  %v8130_v12 = vcombine.low %v217_v43, %v221_v50  ;;  %v8142_v43 = vcombine.low %v233_v19, %v237_v21 }
 0x16e   :  { %9640 = vst [vmem:[#allocation57_spill] sm:$0xff] %v8130_v12  ;;  %9644 = vst [vmem:[#allocation61_spill] sm:$0xff] %v8142_v43 }
 0x16f   :  { %2105 = vmatpush1.bf16.msra.mxu0 %v7427_v18  ;;  %v8132_v18 = vcombine.high %v225_v59, %v229_v11 }
 0x170   :  { %2106 = vmatprep.subr.bf16.mxu0 %v7432_v27  ;;  %v8136_v27 = vcombine.low %v225_v59, %v229_v11 }
 0x171   :  { %9641 = vst [vmem:[#allocation58_spill] sm:$0xff] %v8132_v18 }
 0x172   :  { %1988 = vmatmul.mubr.bf16.gmra.mrb[28].mxu0 %v8118_v28  ;;  %9642 = vst [vmem:[#allocation59_spill] sm:$0xff] %v8136_v27 }
 0x173   :  { %1997 = vmatprep.mubr.bf16.mxu0 %v8120_v29  ;;  %2107 = vmatpush1.bf16.msra.mxu0 %v7430_v34  ;;  %v8138_v34 = vcombine.high %v233_v19, %v237_v21  ;;  %v8156_v21 = vcombine.high %v257_v10, %v261_v9  ;;  %v7468_v29 = vld [vmem:[#allocation7 + $0x3a4] ss:$8 sps:$4 sm:$0xff]  }
 0x174   :  { %2108 = vmatprep.subr.bf16.mxu0 %v7435_v35  ;;  %v241_v35 = vld [vmem:[#allocation5 + $0x308] sm:$0xff] }
 0x175   :  { %9643 = vst [vmem:[#allocation60_spill] sm:$0xff] %v8138_v34  ;;  %9649 = vst [vmem:[#allocation66_spill] sm:$0xff] %v8156_v21 }
 0x177   :  { %2109 = vmatpush1.bf16.msra.mxu0 %v7433_v36  ;;  %v245_v36 = vld [vmem:[#allocation5 + $0x328] sm:$0xff] }
 0x178   :  { %2271 = vmatprep.subr.bf16.mxu0 %v7438_v53  ;;  %v8144_v50 = vcombine.high %v241_v35, %v245_v36  ;;  %v249_v53 = vld [vmem:[#allocation5 + $0x348] sm:$0xff]  ;;  %v8148_v59 = vcombine.low %v241_v35, %v245_v36  ;;  %v8160_v35 = vcombine.low %v257_v10, %v261_v9 }
 0x179   :  { %v8150_v11 = vcombine.high %v249_v53, %v253_v13  ;;  %v8154_v19 = vcombine.low %v249_v53, %v253_v13  ;;  %v7436_v10 = vld [vmem:[#allocation7 + $0x300] ss:$8 sps:$4 sm:$0xff]  }
 0x17a   :  { %1998 = vmatmul.mubr.bf16.gmra.mrb[32].mxu0 %v8124_v60  ;;  %9645 = vst [vmem:[#allocation62_spill] sm:$0xff] %v8144_v50  ;;  %9646 = vst [vmem:[#allocation63_spill] sm:$0xff] %v8148_v59  ;;  %v198_v60 = vld [vmem:[#allocation5 + $0x1b0] sm:$0xff] }
 0x17b   :  { %2007 = vmatprep.mubr.bf16.mxu0 %v8126_v56  ;;  %9647 = vst [vmem:[#allocation64_spill] sm:$0xff] %v8150_v11  ;;  %9648 = vst [vmem:[#allocation65_spill] sm:$0xff] %v8154_v19  ;;  %v7462_v56 = vld [vmem:[#allocation7 + $0x384] ss:$8 sps:$4 sm:$0xff]  }
 0x17c   :  { %9650 = vst [vmem:[#allocation67_spill] sm:$0xff] %v8160_v35 }
 0x182   :  { %2008 = vmatmul.mubr.bf16.gmra.mrb[36].mxu0 %v8130_v12  ;;  %v190_v12 = vld [vmem:[#allocation5 + $0x170] sm:$0xff] }
 0x183   :  { %2017 = vmatprep.mubr.bf16.mxu0 %v8132_v18  ;;  %v7456_v18 = vld [vmem:[#allocation7 + $0x364] ss:$8 sps:$4 sm:$0xff]  }
 0x18a   :  { %2018 = vmatmul.mubr.bf16.gmra.mrb[40].mxu0 %v8136_v27  ;;  %v182_v27 = vld [vmem:[#allocation5 + $0x130] sm:$0xff] }
 0x18b   :  { %2027 = vmatprep.mubr.bf16.mxu0 %v8138_v34 }
 0x192   :  { %2028 = vmatmul.mubr.bf16.gmra.mrb[44].mxu0 %v8142_v43  ;;  %v174_v43 = vld [vmem:[#allocation5 + $0xf0] sm:$0xff] }
 0x193   :  { %2037 = vmatprep.mubr.bf16.mxu0 %v8144_v50  ;;  %v265_v50 = vld [vmem:[#allocation5 + $0x3c8] sm:$0xff] }
 0x194   :  { %v8162_v36 = vcombine.high %v265_v50, %v269_v4  ;;  %v8166_v13 = vcombine.low %v265_v50, %v269_v4  ;;  %v7439_v4 = vld [vmem:[#allocation7 + $0x310] ss:$8 sps:$4 sm:$0xff]  }
 0x195   :  { %v162_v50 = vld [vmem:[#allocation5 + $0x90] sm:$0xff] }
 0x196   :  { %9651 = vst [vmem:[#allocation68_spill] sm:$0xff] %v8162_v36  ;;  %9652 = vst [vmem:[#allocation69_spill] sm:$0xff] %v8166_v13 }
 0x19a   :  { %2038 = vmatmul.mubr.bf16.gmra.mrb[48].mxu0 %v8148_v59  ;;  %v150_v59 = vld [vmem:[#allocation5 + $0x30] sm:$0xff] }
 0x19b   :  { %2047 = vmatprep.mubr.bf16.mxu0 %v8150_v11  ;;  %v146_v11 = vld [vmem:[#allocation5 + $0x10] sm:$0xff] }
 0x19c   :  { %v8168_v53 = vcombine.high %v146_v11, %v150_v59  ;;  %v8172_v9 = vcombine.low %v146_v11, %v150_v59  ;;  %v7442_v59 = vld [vmem:[#allocation7 + $0x320] ss:$8 sps:$4 sm:$0xff]   ;;  %v7447_v11 = vld [vmem:[#allocation7 + $0x334] ss:$8 sps:$4 sm:$0xff]  }
 0x1a2   :  { %2048 = vmatmul.mubr.bf16.gmra.mrb[52].mxu0 %v8154_v19  ;;  %v158_v19 = vld [vmem:[#allocation5 + $0x70] sm:$0xff] }
 0x1a3   :  { %2057 = vmatprep.mubr.bf16.mxu0 %v8156_v21  ;;  %v154_v21 = vld [vmem:[#allocation5 + $0x50] sm:$0xff] }
 0x1a4   :  { %v8174_v3 = vcombine.high %v154_v21, %v158_v19  ;;  %v8178_v0 = vcombine.low %v154_v21, %v158_v19  ;;  %v8186_v19 = vcombine.high %v170_v58, %v174_v43  ;;  %v7448_v21 = vld [vmem:[#allocation7 + $0x340] ss:$8 sps:$4 sm:$0xff]  }
 0x1aa   :  { %2058 = vmatmul.mubr.bf16.gmra.mrb[56].mxu0 %v8160_v35  ;;  %v7441_v35 = vld [vmem:[#allocation7 + $0x314] ss:$8 sps:$4 sm:$0xff]  }
 0x1ab   :  { %2067 = vmatprep.mubr.bf16.mxu0 %v8162_v36  ;;  %v166_v36 = vld [vmem:[#allocation5 + $0xb0] sm:$0xff] }
 0x1ac   :  { %v8180_v61 = vcombine.high %v162_v50, %v166_v36  ;;  %v8184_v34 = vcombine.low %v162_v50, %v166_v36  ;;  %v7454_v50 = vld [vmem:[#allocation7 + $0x360] ss:$8 sps:$4 sm:$0xff]  }
 0x1b2   :  { %2068 = vmatmul.mubr.bf16.gmra.mrb[60].mxu0 %v8166_v13  ;;  %v7444_v13 = vld [vmem:[#allocation7 + $0x324] ss:$8 sps:$4 sm:$0xff]  }
 0x1b3   :  { %2110 = vmatprep.mubr.bf16.mxu0 %v8168_v53 }
 0x1ba   :  { %2111 = vmatmul.mubr.bf16.vlgmr.msra.gmra.mrb[0].mxu0 %v8172_v9 }
 0x1bb   :  { %2272 = vmatpush1.bf16.msra.mxu0 %v7436_v10  ;;  %2120 = vmatprep.mubr.bf16.mxu0 %v8174_v3  ;;  %v7445_v10 = vld [vmem:[#allocation7 + $0x330] ss:$8 sps:$4 sm:$0xff]  }
 0x1bc   :  { %2273 = vmatprep.subr.bf16.mxu0 %v7441_v35  ;;  %v7450_v35 = vld [vmem:[#allocation7 + $0x344] ss:$8 sps:$4 sm:$0xff]  }
 0x1bf   :  { %2274 = vmatpush1.bf16.msra.mxu0 %v7439_v4  ;;  %v7453_v4 = vld [vmem:[#allocation7 + $0x354] ss:$8 sps:$4 sm:$0xff]  }
 0x1c0   :  { %2275 = vmatprep.subr.bf16.mxu0 %v7444_v13  ;;  %v7451_v13 = vld [vmem:[#allocation7 + $0x350] ss:$8 sps:$4 sm:$0xff]  }
 0x1c2   :  { %2121 = vmatmul.mubr.bf16.gmra.mrb[4].mxu0 %v8178_v0 }
 0x1c3   :  { %2130 = vmatprep.mubr.bf16.mxu0 %v8180_v61  ;;  %2276 = vmatpush1.bf16.msra.mxu0 %v7442_v59  ;;  %v178_v59 = vld [vmem:[#allocation5 + $0x110] sm:$0xff] }
 0x1c4   :  { %2277 = vmatprep.subr.bf16.mxu0 %v7447_v11  ;;  %v8190_v11 = vcombine.low %v170_v58, %v174_v43  ;;  %v8192_v36 = vcombine.high %v178_v59, %v182_v27  ;;  %v7460_v43 = vld [vmem:[#allocation7 + $0x380] ss:$8 sps:$4 sm:$0xff]  }
 0x1c6   :  { %9653 = vst [vmem:[#allocation70_spill] sm:$0xff] %v8192_v36 }
 0x1c7   :  { %2278 = vmatpush1.bf16.msra.mxu0 %v7445_v10  ;;  %v7459_v10 = vld [vmem:[#allocation7 + $0x374] ss:$8 sps:$4 sm:$0xff]  }
 0x1c8   :  { %2279 = vmatprep.subr.bf16.mxu0 %v7450_v35  ;;  %v7457_v35 = vld [vmem:[#allocation7 + $0x370] ss:$8 sps:$4 sm:$0xff]  }
 0x1ca   :  { %2131 = vmatmul.mubr.bf16.gmra.mrb[8].mxu0 %v8184_v34 }
 0x1cb   :  { %2140 = vmatprep.mubr.bf16.mxu0 %v8186_v19  ;;  %2280 = vmatpush1.bf16.msra.mxu0 %v7448_v21  ;;  %v186_v21 = vld [vmem:[#allocation5 + $0x150] sm:$0xff] }
 0x1cc   :  { %2281 = vmatprep.subr.bf16.mxu0 %v7453_v4  ;;  %v8196_v4 = vcombine.low %v178_v59, %v182_v27  ;;  %v8198_v58 = vcombine.high %v186_v21, %v190_v12  ;;  %v7466_v59 = vld [vmem:[#allocation7 + $0x3a0] ss:$8 sps:$4 sm:$0xff]  }
 0x1ce   :  { %9654 = vst [vmem:[#allocation71_spill] sm:$0xff] %v8196_v4  ;;  %9655 = vst [vmem:[#allocation72_spill] sm:$0xff] %v8198_v58 }
 0x1cf   :  { %2282 = vmatpush1.bf16.msra.mxu0 %v7451_v13  ;;  %v7465_v13 = vld [vmem:[#allocation7 + $0x394] ss:$8 sps:$4 sm:$0xff]  }
 0x1d0   :  { %2283 = vmatprep.subr.bf16.mxu0 %v7456_v18  ;;  %v7463_v18 = vld [vmem:[#allocation7 + $0x390] ss:$8 sps:$4 sm:$0xff]  }
 0x1d2   :  { %2141 = vmatmul.mubr.bf16.gmra.mrb[12].mxu0 %v8190_v11 }
 0x1d3   :  { %2150 = vmatprep.mubr.bf16.mxu0 %v8192_v36  ;;  %2284 = vmatpush1.bf16.msra.mxu0 %v7454_v50  ;;  %v194_v50 = vld [vmem:[#allocation5 + $0x190] sm:$0xff] }
 0x1d4   :  { %2285 = vmatprep.subr.bf16.mxu0 %v7459_v10  ;;  %v8202_v10 = vcombine.low %v186_v21, %v190_v12  ;;  %v8204_v27 = vcombine.high %v194_v50, %v198_v60  ;;  %v7472_v21 = vld [vmem:[#allocation7 + $0x3c0] ss:$8 sps:$4 sm:$0xff]  }
 0x1d6   :  { %9656 = vst [vmem:[#allocation73_spill] sm:$0xff] %v8202_v10  ;;  %9657 = vst [vmem:[#allocation74_spill] sm:$0xff] %v8204_v27 }
 0x1d7   :  { %2286 = vmatpush1.bf16.msra.mxu0 %v7457_v35  ;;  %v7471_v35 = vld [vmem:[#allocation7 + $0x3b4] ss:$8 sps:$4 sm:$0xff]  }
 0x1d8   :  { %2287 = vmatprep.subr.bf16.mxu0 %v7462_v56  ;;  %v7469_v56 = vld [vmem:[#allocation7 + $0x3b0] ss:$8 sps:$4 sm:$0xff]  }
 0x1da   :  { %2151 = vmatmul.mubr.bf16.gmra.mrb[16].mxu0 %v8196_v4 }
 0x1db   :  { %2160 = vmatprep.mubr.bf16.mxu0 %v8198_v58  ;;  %2288 = vmatpush1.bf16.msra.mxu0 %v7460_v43  ;;  %v202_v43 = vld [vmem:[#allocation5 + $0x1d0] sm:$0xff] }
 0x1dc   :  { %2289 = vmatprep.subr.bf16.mxu0 %v7465_v13  ;;  %v8208_v13 = vcombine.low %v194_v50, %v198_v60  ;;  %v8210_v12 = vcombine.high %v202_v43, %v206_v57  ;;  %v7478_v50 = vld [vmem:[#allocation7 + $0x3e0] ss:$8 sps:$4 sm:$0xff]  }
 0x1de   :  { %9658 = vst [vmem:[#allocation75_spill] sm:$0xff] %v8208_v13  ;;  %9659 = vst [vmem:[#allocation76_spill] sm:$0xff] %v8210_v12 }
 0x1df   :  { %2290 = vmatpush1.bf16.msra.mxu0 %v7463_v18  ;;  %v7477_v18 = vld [vmem:[#allocation7 + $0x3d4] ss:$8 sps:$4 sm:$0xff]  }
 0x1e0   :  { %2291 = vmatprep.subr.bf16.mxu0 %v7468_v29  ;;  %v7475_v29 = vld [vmem:[#allocation7 + $0x3d0] ss:$8 sps:$4 sm:$0xff]  }
 0x1e2   :  { %2161 = vmatmul.mubr.bf16.gmra.mrb[20].mxu0 %v8202_v10 }
 0x1e3   :  { %2170 = vmatprep.mubr.bf16.mxu0 %v8204_v27  ;;  %2292 = vmatpush1.bf16.msra.mxu0 %v7466_v59  ;;  %v210_v59 = vld [vmem:[#allocation5 + $0x210] sm:$0xff]  ;;  %v207_v27 = vld [vmem:[#allocation5 + $0x1f8] sm:$0xff] }
 0x1e4   :  { %2293 = vmatprep.subr.bf16.mxu0 %v7471_v35  ;;  %v8214_v35 = vcombine.low %v202_v43, %v206_v57  ;;  %v8216_v60 = vcombine.high %v210_v59, %v214_v51  ;;  %v8220_v42 = vcombine.low %v210_v59, %v214_v51  ;;  %v230_v57 = vld [vmem:[#allocation5 + $0x2b0] sm:$0xff] }
 0x1e5   :  { %v238_v51 = vld [vmem:[#allocation5 + $0x2f0] sm:$0xff] }
 0x1e6   :  { %9660 = vst [vmem:[#allocation77_spill] sm:$0xff] %v8214_v35  ;;  %9661 = vst [vmem:[#allocation78_spill] sm:$0xff] %v8216_v60 }
 0x1e7   :  { %2294 = vmatpush1.bf16.msra.mxu0 %v7469_v56  ;;  %v7483_v56 = vld [vmem:[#allocation7 + $0x3f4] ss:$8 sps:$4 sm:$0xff]   ;;  %9662 = vst [vmem:[#allocation79_spill] sm:$0xff] %v8220_v42 }
 0x1e8   :  { %2295 = vmatprep.subr.bf16.mxu0 %v7474_v52  ;;  %v7481_v52 = vld [vmem:[#allocation7 + $0x3f0] ss:$8 sps:$4 sm:$0xff]  }
 0x1ea   :  { %2171 = vmatmul.mubr.bf16.gmra.mrb[24].mxu0 %v8208_v13  ;;  %v199_v13 = vld [vmem:[#allocation5 + $0x1b8] sm:$0xff] }
 0x1eb   :  { %2180 = vmatprep.mubr.bf16.mxu0 %v8210_v12  ;;  %2296 = vmatpush1.bf16.msra.mxu0 %v7472_v21  ;;  %v218_v21 = vld [vmem:[#allocation5 + $0x250] sm:$0xff]  ;;  %v195_v12 = vld [vmem:[#allocation5 + $0x198] sm:$0xff] }
 0x1ec   :  { %2297 = vmatprep.subr.bf16.mxu0 %v7477_v18  ;;  %v8222_v18 = vcombine.high %v218_v21, %v222_v45  ;;  %v8226_v43 = vcombine.low %v218_v21, %v222_v45 }
 0x1ee   :  { %9663 = vst [vmem:[#allocation80_spill] sm:$0xff] %v8222_v18  ;;  %9664 = vst [vmem:[#allocation81_spill] sm:$0xff] %v8226_v43 }
 0x1ef   :  { %2298 = vmatpush1.bf16.msra.mxu0 %v7475_v29 }
 0x1f0   :  { %2299 = vmatprep.subr.bf16.mxu0 %v7480_v46  ;;  %v226_v46 = vld [vmem:[#allocation5 + $0x290] sm:$0xff] }
 0x1f1   :  { %v8228_v29 = vcombine.high %v226_v46, %v230_v57  ;;  %v8232_v59 = vcombine.low %v226_v46, %v230_v57 }
 0x1f2   :  { %2181 = vmatmul.mubr.bf16.gmra.mrb[28].mxu0 %v8214_v35  ;;  %v191_v35 = vld [vmem:[#allocation5 + $0x178] sm:$0xff] }
 0x1f3   :  { %2190 = vmatprep.mubr.bf16.mxu0 %v8216_v60  ;;  %2300 = vmatpush1.bf16.msra.mxu0 %v7478_v50  ;;  %9665 = vst [vmem:[#allocation82_spill] sm:$0xff] %v8228_v29  ;;  %v234_v50 = vld [vmem:[#allocation5 + $0x2d0] sm:$0xff]  ;;  %9666 = vst [vmem:[#allocation83_spill] sm:$0xff] %v8232_v59  ;;  %v179_v60 = vld [vmem:[#allocation5 + $0x118] sm:$0xff] }
 0x1f4   :  { %2301 = vmatprep.subr.bf16.mxu0 %v7483_v56  ;;  %v8234_v56 = vcombine.high %v234_v50, %v238_v51  ;;  %v8238_v45 = vcombine.low %v234_v50, %v238_v51 }
 0x1f6   :  { %9667 = vst [vmem:[#allocation84_spill] sm:$0xff] %v8234_v56  ;;  %9668 = vst [vmem:[#allocation85_spill] sm:$0xff] %v8238_v45 }
 0x1f7   :  { %2302 = vmatpush1.bf16.msra.mxu0 %v7481_v52  ;;  %v242_v52 = vld [vmem:[#allocation5 + $0x310] sm:$0xff] }
 0x1fa   :  { %2191 = vmatmul.mubr.bf16.gmra.mrb[32].mxu0 %v8220_v42  ;;  %v175_v42 = vld [vmem:[#allocation5 + $0xf8] sm:$0xff] }
 0x1fb   :  { %2200 = vmatprep.mubr.bf16.mxu0 %v8222_v18  ;;  %v246_v18 = vld [vmem:[#allocation5 + $0x330] sm:$0xff] }
 0x1fc   :  { %v8240_v21 = vcombine.high %v242_v52, %v246_v18  ;;  %v8244_v46 = vcombine.low %v242_v52, %v246_v18 }
 0x1fe   :  { %9669 = vst [vmem:[#allocation86_spill] sm:$0xff] %v8240_v21  ;;  %9670 = vst [vmem:[#allocation87_spill] sm:$0xff] %v8244_v46 }
 0x202   :  { %2201 = vmatmul.mubr.bf16.gmra.mrb[36].mxu0 %v8226_v43  ;;  %v254_v43 = vld [vmem:[#allocation5 + $0x370] sm:$0xff] }
 0x203   :  { %2210 = vmatprep.mubr.bf16.mxu0 %v8228_v29  ;;  %v250_v29 = vld [vmem:[#allocation5 + $0x350] sm:$0xff] }
 0x204   :  { %v8246_v57 = vcombine.high %v250_v29, %v254_v43  ;;  %v8250_v50 = vcombine.low %v250_v29, %v254_v43 }
 0x206   :  { %9671 = vst [vmem:[#allocation88_spill] sm:$0xff] %v8246_v57  ;;  %9672 = vst [vmem:[#allocation89_spill] sm:$0xff] %v8250_v50 }
 0x20a   :  { %2211 = vmatmul.mubr.bf16.gmra.mrb[40].mxu0 %v8232_v59  ;;  %v262_v59 = vld [vmem:[#allocation5 + $0x3b0] sm:$0xff] }
 0x20b   :  { %2220 = vmatprep.mubr.bf16.mxu0 %v8234_v56  ;;  %v258_v56 = vld [vmem:[#allocation5 + $0x390] sm:$0xff] }
 0x20c   :  { %v8252_v51 = vcombine.high %v258_v56, %v262_v59  ;;  %v8256_v18 = vcombine.low %v258_v56, %v262_v59 }
 0x20e   :  { %9673 = vst [vmem:[#allocation90_spill] sm:$0xff] %v8252_v51  ;;  %9674 = vst [vmem:[#allocation91_spill] sm:$0xff] %v8256_v18 }
 0x212   :  { %2221 = vmatmul.mubr.bf16.gmra.mrb[44].mxu0 %v8238_v45  ;;  %v270_v45 = vld [vmem:[#allocation5 + $0x3f0] sm:$0xff] }
 0x213   :  { %2230 = vmatprep.mubr.bf16.mxu0 %v8240_v21  ;;  %v266_v21 = vld [vmem:[#allocation5 + $0x3d0] sm:$0xff] }
 0x214   :  { %v8258_v52 = vcombine.high %v266_v21, %v270_v45  ;;  %v8262_v43 = vcombine.low %v266_v21, %v270_v45 }
 0x216   :  { %9675 = vst [vmem:[#allocation92_spill] sm:$0xff] %v8258_v52  ;;  %9676 = vst [vmem:[#allocation93_spill] sm:$0xff] %v8262_v43 }
 0x21a   :  { %2231 = vmatmul.mubr.bf16.gmra.mrb[48].mxu0 %v8244_v46  ;;  %v151_v46 = vld [vmem:[#allocation5 + $0x38] sm:$0xff] }
 0x21b   :  { %2240 = vmatprep.mubr.bf16.mxu0 %v8246_v57  ;;  %v147_v57 = vld [vmem:[#allocation5 + $0x18] sm:$0xff] }
 0x21c   :  { %v8264_v29 = vcombine.high %v147_v57, %v151_v46  ;;  %v8268_v59 = vcombine.low %v147_v57, %v151_v46 }
 0x222   :  { %2241 = vmatmul.mubr.bf16.gmra.mrb[52].mxu0 %v8250_v50  ;;  %v159_v50 = vld [vmem:[#allocation5 + $0x78] sm:$0xff] }
 0x223   :  { %2250 = vmatprep.mubr.bf16.mxu0 %v8252_v51  ;;  %v155_v51 = vld [vmem:[#allocation5 + $0x58] sm:$0xff] }
 0x224   :  { %v8270_v56 = vcombine.high %v155_v51, %v159_v50  ;;  %v8274_v45 = vcombine.low %v155_v51, %v159_v50  ;;  %v8288_v51 = vcombine.high %v179_v60, %v183_v40 }
 0x226   :  { %9677 = vst [vmem:[#allocation94_spill] sm:$0xff] %v8270_v56  ;;  %9678 = vst [vmem:[#allocation95_spill] sm:$0xff] %v8274_v45 }
 0x227   :  { %9683 = vst [vmem:[#allocation100_spill] sm:$0xff] %v8288_v51 }
 0x22a   :  { %2251 = vmatmul.mubr.bf16.gmra.mrb[56].mxu0 %v8256_v18  ;;  %v167_v18 = vld [vmem:[#allocation5 + $0xb8] sm:$0xff] }
 0x22b   :  { %2260 = vmatprep.mubr.bf16.mxu0 %v8258_v52  ;;  %v163_v52 = vld [vmem:[#allocation5 + $0x98] sm:$0xff] }
 0x22c   :  { %v8276_v21 = vcombine.high %v163_v52, %v167_v18  ;;  %v8280_v46 = vcombine.low %v163_v52, %v167_v18  ;;  %v8292_v18 = vcombine.low %v179_v60, %v183_v40  ;;  %v8294_v52 = vcombine.high %v187_v32, %v191_v35 }
 0x22d   :  { %v8304_v40 = vcombine.low %v195_v12, %v199_v13 }
 0x22e   :  { %9679 = vst [vmem:[#allocation96_spill] sm:$0xff] %v8276_v21  ;;  %9680 = vst [vmem:[#allocation97_spill] sm:$0xff] %v8280_v46 }
 0x22f   :  { %9684 = vst [vmem:[#allocation101_spill] sm:$0xff] %v8292_v18  ;;  %9685 = vst [vmem:[#allocation102_spill] sm:$0xff] %v8294_v52 }
 0x230   :  { %9688 = vst [vmem:[#allocation105_spill] sm:$0xff] %v8304_v40 }
 0x232   :  { %2261 = vmatmul.mubr.bf16.gmra.mrb[60].mxu0 %v8262_v43  ;;  %v171_v43 = vld [vmem:[#allocation5 + $0xd8] sm:$0xff] }
 0x233   :  { %2303 = vmatprep.mubr.bf16.mxu0 %v8264_v29  ;;  %v8282_v57 = vcombine.high %v171_v43, %v175_v42  ;;  %v8286_v50 = vcombine.low %v171_v43, %v175_v42  ;;  %v8298_v42 = vcombine.low %v187_v32, %v191_v35  ;;  %v8300_v43 = vcombine.high %v195_v12, %v199_v13 }
 0x235   :  { %9681 = vst [vmem:[#allocation98_spill] sm:$0xff] %v8282_v57  ;;  %9682 = vst [vmem:[#allocation99_spill] sm:$0xff] %v8286_v50 }
 0x236   :  { %9686 = vst [vmem:[#allocation103_spill] sm:$0xff] %v8298_v42  ;;  %9687 = vst [vmem:[#allocation104_spill] sm:$0xff] %v8300_v43 }
 0x23a   :  { %2304 = vmatmul.mubr.bf16.vlgmr.msra.gmra.mrb[0].mxu0 %v8268_v59 }
 0x23b   :  { %2313 = vmatprep.mubr.bf16.mxu0 %v8270_v56 }
 0x242   :  { %2314 = vmatmul.mubr.bf16.gmra.mrb[4].mxu0 %v8274_v45 }
 0x243   :  { %2323 = vmatprep.mubr.bf16.mxu0 %v8276_v21 }
 0x24a   :  { %2324 = vmatmul.mubr.bf16.gmra.mrb[8].mxu0 %v8280_v46 }
 0x24b   :  { %2333 = vmatprep.mubr.bf16.mxu0 %v8282_v57 }
 0x252   :  { %2334 = vmatmul.mubr.bf16.gmra.mrb[12].mxu0 %v8286_v50 }
 0x253   :  { %2343 = vmatprep.mubr.bf16.mxu0 %v8288_v51  ;;  %v203_v51 = vld [vmem:[#allocation5 + $0x1d8] sm:$0xff] }
 0x254   :  { %v8306_v60 = vcombine.high %v203_v51, %v207_v27  ;;  %v8310_v32 = vcombine.low %v203_v51, %v207_v27 }
 0x256   :  { %9689 = vst [vmem:[#allocation106_spill] sm:$0xff] %v8306_v60  ;;  %9690 = vst [vmem:[#allocation107_spill] sm:$0xff] %v8310_v32 }
 0x25a   :  { %2344 = vmatmul.mubr.bf16.gmra.mrb[16].mxu0 %v8292_v18  ;;  %v215_v18 = vld [vmem:[#allocation5 + $0x238] sm:$0xff] }
 0x25b   :  { %2353 = vmatprep.mubr.bf16.mxu0 %v8294_v52  ;;  %v211_v52 = vld [vmem:[#allocation5 + $0x218] sm:$0xff] }
 0x25c   :  { %v8312_v35 = vcombine.high %v211_v52, %v215_v18  ;;  %v8316_v13 = vcombine.low %v211_v52, %v215_v18 }
 0x25e   :  { %9691 = vst [vmem:[#allocation108_spill] sm:$0xff] %v8312_v35  ;;  %9692 = vst [vmem:[#allocation109_spill] sm:$0xff] %v8316_v13 }
 0x262   :  { %2354 = vmatmul.mubr.bf16.gmra.mrb[20].mxu0 %v8298_v42  ;;  %v223_v42 = vld [vmem:[#allocation5 + $0x278] sm:$0xff] }
 0x263   :  { %2363 = vmatprep.mubr.bf16.mxu0 %v8300_v43  ;;  %v219_v43 = vld [vmem:[#allocation5 + $0x258] sm:$0xff] }
 0x264   :  { %v8318_v12 = vcombine.high %v219_v43, %v223_v42  ;;  %v8322_v27 = vcombine.low %v219_v43, %v223_v42 }
 0x266   :  { %9693 = vst [vmem:[#allocation110_spill] sm:$0xff] %v8318_v12  ;;  %9694 = vst [vmem:[#allocation111_spill] sm:$0xff] %v8322_v27 }
 0x26a   :  { %2364 = vmatmul.mubr.bf16.gmra.mrb[24].mxu0 %v8304_v40  ;;  %v231_v40 = vld [vmem:[#allocation5 + $0x2b8] sm:$0xff] }
 0x26b   :  { %2373 = vmatprep.mubr.bf16.mxu0 %v8306_v60  ;;  %v227_v60 = vld [vmem:[#allocation5 + $0x298] sm:$0xff] }
 0x26c   :  { %v8324_v51 = vcombine.high %v227_v60, %v231_v40  ;;  %v8328_v18 = vcombine.low %v227_v60, %v231_v40 }
 0x26e   :  { %9695 = vst [vmem:[#allocation112_spill] sm:$0xff] %v8324_v51  ;;  %9696 = vst [vmem:[#allocation113_spill] sm:$0xff] %v8328_v18 }
 0x272   :  { %2374 = vmatmul.mubr.bf16.gmra.mrb[28].mxu0 %v8310_v32  ;;  %v239_v32 = vld [vmem:[#allocation5 + $0x2f8] sm:$0xff] }
 0x273   :  { %2383 = vmatprep.mubr.bf16.mxu0 %v8312_v35  ;;  %v235_v35 = vld [vmem:[#allocation5 + $0x2d8] sm:$0xff] }
 0x274   :  { %v8330_v52 = vcombine.high %v235_v35, %v239_v32  ;;  %v8334_v42 = vcombine.low %v235_v35, %v239_v32 }
 0x276   :  { %9697 = vst [vmem:[#allocation114_spill] sm:$0xff] %v8330_v52  ;;  %9698 = vst [vmem:[#allocation115_spill] sm:$0xff] %v8334_v42 }
 0x27a   :  { %2384 = vmatmul.mubr.bf16.gmra.mrb[32].mxu0 %v8316_v13  ;;  %v247_v13 = vld [vmem:[#allocation5 + $0x338] sm:$0xff] }
 0x27b   :  { %2393 = vmatprep.mubr.bf16.mxu0 %v8318_v12  ;;  %v243_v12 = vld [vmem:[#allocation5 + $0x318] sm:$0xff] }
 0x27c   :  { %v8336_v43 = vcombine.high %v243_v12, %v247_v13  ;;  %v8340_v40 = vcombine.low %v243_v12, %v247_v13 }
 0x27e   :  { %9699 = vst [vmem:[#allocation116_spill] sm:$0xff] %v8336_v43  ;;  %9700 = vst [vmem:[#allocation117_spill] sm:$0xff] %v8340_v40 }
 0x282   :  { %2394 = vmatmul.mubr.bf16.gmra.mrb[36].mxu0 %v8322_v27  ;;  %v255_v27 = vld [vmem:[#allocation5 + $0x378] sm:$0xff] }
 0x283   :  { %2403 = vmatprep.mubr.bf16.mxu0 %v8324_v51  ;;  %v251_v51 = vld [vmem:[#allocation5 + $0x358] sm:$0xff] }
 0x284   :  { %v8342_v60 = vcombine.high %v251_v51, %v255_v27  ;;  %v8346_v32 = vcombine.low %v251_v51, %v255_v27  ;;  %v402_v27 = vlaneseq }
 0x286   :  { %9701 = vst [vmem:[#allocation118_spill] sm:$0xff] %v8342_v60  ;;  %9702 = vst [vmem:[#allocation119_spill] sm:$0xff] %v8346_v32  ;;  %v8361_v51 = vshrl.u32 %v402_v27, 7 }
 0x288   :  { %9707 = vst [vmem:[#allocation124_spill] sm:$0xff] %v8361_v51 }
 0x28a   :  { %2404 = vmatmul.mubr.bf16.gmra.mrb[40].mxu0 %v8328_v18  ;;  %v263_v18 = vld [vmem:[#allocation5 + $0x3b8] sm:$0xff] }
 0x28b   :  { %2413 = vmatprep.mubr.bf16.mxu0 %v8330_v52  ;;  %v259_v52 = vld [vmem:[#allocation5 + $0x398] sm:$0xff] }
 0x28c   :  { %v8348_v35 = vcombine.high %v259_v52, %v263_v18  ;;  %v8352_v13 = vcombine.low %v259_v52, %v263_v18 }
 0x28e   :  { %9703 = vst [vmem:[#allocation120_spill] sm:$0xff] %v8348_v35  ;;  %9704 = vst [vmem:[#allocation121_spill] sm:$0xff] %v8352_v13 }
 0x292   :  { %2414 = vmatmul.mubr.bf16.gmra.mrb[44].mxu0 %v8334_v42  ;;  %v271_v42 = vld [vmem:[#allocation5 + $0x3f8] sm:$0xff] }
 0x293   :  { %2423 = vmatprep.mubr.bf16.mxu0 %v8336_v43  ;;  %v267_v43 = vld [vmem:[#allocation5 + $0x3d8] sm:$0xff] }
 0x294   :  { %v8354_v12 = vcombine.high %v267_v43, %v271_v42 }
 0x296   :  { %9705 = vst [vmem:[#allocation122_spill] sm:$0xff] %v8354_v12 }
 0x29a   :  { %2424 = vmatmul.mubr.bf16.gmra.mrb[48].mxu0 %v8340_v40  ;;  %v9579_v40 = vsub.s32 1, %v8361_v51 }
 0x29b   :  { %2433 = vmatprep.mubr.bf16.mxu0 %v8342_v60  ;;  %v8358_v60 = vcombine.low %v267_v43, %v271_v42 }
 0x29d   :  { %9706 = vst [vmem:[#allocation123_spill] sm:$0xff] %v8358_v60 }
 0x2a2   :  { %2434 = vmatmul.mubr.bf16.gmra.mrb[52].mxu0 %v8346_v32  ;;  %v9576_v32 = vsub.s32 0, %v8361_v51 }
 0x2a3   :  { %2443 = vmatprep.mubr.bf16.mxu0 %v8348_v35  ;;  %v400_v35 = vld [vmem:[#allocation9] sm:$0x3] }
 0x2a4   :  { %v8367_v18 = vrot.slane %v400_v35, %v9576_v32 }
 0x2aa   :  { %2444 = vmatmul.mubr.bf16.gmra.mrb[56].mxu0 %v8352_v13 }
 0x2ab   :  { %2453 = vmatprep.mubr.bf16.mxu0 %v8354_v12  ;;  %v8371_v12 = vrot.slane %v400_v35, %v9579_v40 }
 0x2b2   :  { %2454 = vmatmul.mubr.bf16.gmra.mrb[60].mxu0 %v8358_v60 }
 0x30d   :  { %v2305_v52 = vpop.f32.mrb[0].mxu0 }
 0x30e   :  { %v2307_v42 = vpop.f32.mrb[1].mxu0  ;;  %v6959_v43 = vadd.f32 %v2305_v52, %v8367_v18 }
 0x30f   :  { %v2309_v60 = vpop.f32.mrb[2].mxu0  ;;  %v6960_v13 = vadd.f32 %v2307_v42, %v8371_v12 }
 0x310   :  { %v2311_v27 = vpop.f32.mrb[3].mxu0  ;;  %6768 = vmatprep.mubr.f32.mxu1 %v6959_v43 }
 0x311   :  { %v6962_v10 = vadd.f32 %v2311_v27, %v8371_v12 }
 0x313   :  { %v6883_v58 = vpack.c.bf16 %v6962_v10, %v6960_v13 }
 0x315   :  { %v2315_v4 = vpop.f32.mrb[4].mxu0  ;;  %6884 = vmatprep.subr.bf16.mxu1 %v6883_v58 }
 0x316   :  { %v2317_v32 = vpop.f32.mrb[5].mxu0  ;;  %6886 = vmatpush3.bf16.xpose.msra.mxu1 %v6883_v58  ;;  %v6963_v25 = vadd.f32 %v2315_v4, %v8367_v18 }
 0x317   :  { %v2319_v36 = vpop.f32.mrb[6].mxu0  ;;  %v6964_v35 = vadd.f32 %v2317_v32, %v8371_v12 }
 0x318   :  { %v2321_v28 = vpop.f32.mrb[7].mxu0 }
 0x319   :  { %v6966_v40 = vadd.f32 %v2321_v28, %v8371_v12 }
 0x31b   :  { %v6887_v51 = vpack.c.bf16 %v6966_v40, %v6964_v35 }
 0x31d   :  { %v2325_v52 = vpop.f32.mrb[8].mxu0  ;;  %6888 = vmatprep.subr.bf16.mxu1 %v6887_v51 }
 0x31e   :  { %v2327_v8 = vpop.f32.mrb[9].mxu0  ;;  %6890 = vmatpush3.bf16.xpose.msra.mxu1 %v6887_v51 }
 0x31f   :  { %v2329_v43 = vpop.f32.mrb[10].mxu0  ;;  %v6968_v27 = vadd.f32 %v2327_v8, %v8371_v12 }
 0x320   :  { %v2331_v42 = vpop.f32.mrb[11].mxu0  ;;  %v6969_v4 = vadd.f32 %v2329_v43, %v8367_v18 }
 0x321   :  { %v6970_v10 = vadd.f32 %v2331_v42, %v8371_v12 }
 0x323   :  { %v6891_v13 = vpack.c.bf16 %v6970_v10, %v6968_v27  ;;  %v6961_v10 = vadd.f32 %v2309_v60, %v8367_v18 }
 0x325   :  { %v2335_v1 = vpop.f32.mrb[12].mxu0  ;;  %6892 = vmatprep.subr.bf16.mxu1 %v6891_v13 }
 0x326   :  { %v2337_v58 = vpop.f32.mrb[13].mxu0  ;;  %6894 = vmatpush3.bf16.xpose.msra.mxu1 %v6891_v13 }
 0x327   :  { %v2339_v38 = vpop.f32.mrb[14].mxu0  ;;  %v6972_v28 = vadd.f32 %v2337_v58, %v8371_v12 }
 0x328   :  { %v2341_v32 = vpop.f32.mrb[15].mxu0 }
 0x329   :  { %v6974_v40 = vadd.f32 %v2341_v32, %v8371_v12  ;;  %v6965_v32 = vadd.f32 %v2319_v36, %v8367_v18  ;;  %v6973_v36 = vadd.f32 %v2339_v38, %v8367_v18 }
 0x32b   :  { %v6895_v35 = vpack.c.bf16 %v6974_v40, %v6972_v28  ;;  %v6967_v40 = vadd.f32 %v2325_v52, %v8367_v18 }
 0x32d   :  { %v2345_v37 = vpop.f32.mrb[16].mxu0  ;;  %6896 = vmatprep.subr.bf16.mxu1 %v6895_v35 }
 0x32e   :  { %v2347_v51 = vpop.f32.mrb[17].mxu0  ;;  %6898 = vmatpush3.bf16.xpose.msra.mxu1 %v6895_v35 }
 0x32f   :  { %v2349_v26 = vpop.f32.mrb[18].mxu0  ;;  %v6976_v42 = vadd.f32 %v2347_v51, %v8371_v12 }
 0x330   :  { %v2351_v8 = vpop.f32.mrb[19].mxu0 }
 0x331   :  { %v6978_v27 = vadd.f32 %v2351_v8, %v8371_v12 }
 0x333   :  { %v6899_v13 = vpack.c.bf16 %v6978_v27, %v6976_v42  ;;  %v6971_v42 = vadd.f32 %v2335_v1, %v8367_v18 }
 0x335   :  { %v2355_v5 = vpop.f32.mrb[20].mxu0  ;;  %6769 = vmatmul.mubr.f32.vlgmr.msra.gmra.mrb[0].mxu1 %v6961_v10  ;;  %6900 = vmatprep.subr.bf16.mxu1 %v6899_v13  ;;  %v6975_v10 = vadd.f32 %v2345_v37, %v8367_v18 }
 0x336   :  { %v2357_v58 = vpop.f32.mrb[21].mxu0  ;;  %6771 = vmatprep.mubr.f32.mxu1 %v6963_v25  ;;  %6902 = vmatpush3.bf16.xpose.msra.mxu1 %v6899_v13 }
 0x337   :  { %v2359_v28 = vpop.f32.mrb[22].mxu0  ;;  %v6980_v51 = vadd.f32 %v2357_v58, %v8371_v12 }
 0x338   :  { %v2361_v35 = vpop.f32.mrb[23].mxu0 }
 0x339   :  { %v6982_v8 = vadd.f32 %v2361_v35, %v8371_v12  ;;  %6772 = vmatmul.mubr.f32.gmra.mrb[2].mxu1 %v6965_v32 }
 0x33a   :  { %6774 = vmatprep.mubr.f32.mxu1 %v6967_v40 }
 0x33b   :  { %v6903_v60 = vpack.c.bf16 %v6982_v8, %v6980_v51 }
 0x33d   :  { %v2365_v27 = vpop.f32.mrb[24].mxu0  ;;  %6775 = vmatmul.mubr.f32.gmra.mrb[4].mxu1 %v6969_v4  ;;  %6904 = vmatprep.subr.bf16.mxu1 %v6903_v60 }
 0x33e   :  { %v2367_v25 = vpop.f32.mrb[25].mxu0  ;;  %6777 = vmatprep.mubr.f32.mxu1 %v6971_v42  ;;  %6906 = vmatpush3.bf16.xpose.msra.mxu1 %v6903_v60 }
 0x33f   :  { %v2369_v52 = vpop.f32.mrb[26].mxu0  ;;  %v6984_v58 = vadd.f32 %v2367_v25, %v8371_v12 }
 0x340   :  { %v2371_v13 = vpop.f32.mrb[27].mxu0 }
 0x341   :  { %v6986_v32 = vadd.f32 %v2371_v13, %v8371_v12  ;;  %6778 = vmatmul.mubr.f32.gmra.mrb[6].mxu1 %v6973_v36  ;;  %v6977_v13 = vadd.f32 %v2349_v26, %v8367_v18 }
 0x342   :  { %6796 = vmatprep.mubr.f32.mxu1 %v6975_v10 }
 0x343   :  { %v6907_v43 = vpack.c.bf16 %v6986_v32, %v6984_v58  ;;  %v6979_v32 = vadd.f32 %v2355_v5, %v8367_v18  ;;  %v6985_v5 = vadd.f32 %v2369_v52, %v8367_v18 }
 0x345   :  { %v2375_v1 = vpop.f32.mrb[28].mxu0  ;;  %6908 = vmatprep.subr.bf16.mxu1 %v6907_v43 }
 0x346   :  { %v2377_v40 = vpop.f32.mrb[29].mxu0  ;;  %6910 = vmatpush3.bf16.xpose.msra.mxu1 %v6907_v43 }
 0x347   :  { %v2379_v35 = vpop.f32.mrb[30].mxu0  ;;  %v6988_v8 = vadd.f32 %v2377_v40, %v8371_v12 }
 0x348   :  { %v2381_v51 = vpop.f32.mrb[31].mxu0 }
 0x349   :  { %v6990_v38 = vadd.f32 %v2381_v51, %v8371_v12  ;;  %v6981_v51 = vadd.f32 %v2359_v28, %v8367_v18  ;;  %v6989_v28 = vadd.f32 %v2379_v35, %v8367_v18 }
 0x34b   :  { %v6911_v4 = vpack.c.bf16 %v6990_v38, %v6988_v8  ;;  %v6983_v38 = vadd.f32 %v2365_v27, %v8367_v18 }
 0x34d   :  { %v2385_v37 = vpop.f32.mrb[32].mxu0  ;;  %6912 = vmatprep.subr.bf16.mxu1 %v6911_v4 }
 0x34e   :  { %v2387_v60 = vpop.f32.mrb[33].mxu0  ;;  %6914 = vmatpush3.bf16.xpose.msra.mxu1 %v6911_v4 }
 0x34f   :  { %v2389_v42 = vpop.f32.mrb[34].mxu0  ;;  %v6992_v36 = vadd.f32 %v2387_v60, %v8371_v12 }
 0x350   :  { %v2391_v25 = vpop.f32.mrb[35].mxu0 }
 0x351   :  { %v6994_v10 = vadd.f32 %v2391_v25, %v8371_v12 }
 0x353   :  { %v6915_v58 = vpack.c.bf16 %v6994_v10, %v6992_v36  ;;  %v6987_v36 = vadd.f32 %v2375_v1, %v8367_v18 }
 0x355   :  { %v2395_v43 = vpop.f32.mrb[36].mxu0  ;;  %6797 = vmatmul.mubr.f32.vlgmr.msra.gmra.mrb[8].mxu1 %v6977_v13  ;;  %6916 = vmatprep.subr.bf16.mxu1 %v6915_v58 }
 0x356   :  { %v2397_v40 = vpop.f32.mrb[37].mxu0  ;;  %6799 = vmatprep.mubr.f32.mxu1 %v6979_v32  ;;  %6918 = vmatpush3.bf16.xpose.msra.mxu1 %v6915_v58  ;;  %v6991_v58 = vadd.f32 %v2385_v37, %v8367_v18 }
 0x357   :  { %v2399_v8 = vpop.f32.mrb[38].mxu0  ;;  %v6996_v60 = vadd.f32 %v2397_v40, %v8371_v12 }
 0x358   :  { %v2401_v4 = vpop.f32.mrb[39].mxu0 }
 0x359   :  { %v6998_v25 = vadd.f32 %v2401_v4, %v8371_v12  ;;  %6800 = vmatmul.mubr.f32.gmra.mrb[10].mxu1 %v6981_v51 }
 0x35a   :  { %6802 = vmatprep.mubr.f32.mxu1 %v6983_v38 }
 0x35b   :  { %v6919_v26 = vpack.c.bf16 %v6998_v25, %v6996_v60 }
 0x35d   :  { %v2405_v10 = vpop.f32.mrb[40].mxu0  ;;  %6803 = vmatmul.mubr.f32.gmra.mrb[12].mxu1 %v6985_v5  ;;  %6920 = vmatprep.subr.bf16.mxu1 %v6919_v26 }
 0x35e   :  { %v2407_v13 = vpop.f32.mrb[41].mxu0  ;;  %6805 = vmatprep.mubr.f32.mxu1 %v6987_v36  ;;  %6922 = vmatpush3.bf16.xpose.msra.mxu1 %v6919_v26 }
 0x35f   :  { %v2409_v27 = vpop.f32.mrb[42].mxu0  ;;  %v7000_v40 = vadd.f32 %v2407_v13, %v8371_v12 }
 0x360   :  { %v2411_v32 = vpop.f32.mrb[43].mxu0 }
 0x361   :  { %v7002_v51 = vadd.f32 %v2411_v32, %v8371_v12  ;;  %6806 = vmatmul.mubr.f32.gmra.mrb[14].mxu1 %v6989_v28  ;;  %v6993_v32 = vadd.f32 %v2389_v42, %v8367_v18  ;;  %v7001_v42 = vadd.f32 %v2409_v27, %v8367_v18 }
 0x362   :  { %6824 = vmatprep.mubr.f32.mxu1 %v6991_v58 }
 0x363   :  { %v6923_v52 = vpack.c.bf16 %v7002_v51, %v7000_v40  ;;  %v6995_v51 = vadd.f32 %v2395_v43, %v8367_v18 }
 0x365   :  { %v2415_v1 = vpop.f32.mrb[44].mxu0  ;;  %6924 = vmatprep.subr.bf16.mxu1 %v6923_v52 }
 0x366   :  { %v2417_v38 = vpop.f32.mrb[45].mxu0  ;;  %6926 = vmatpush3.bf16.xpose.msra.mxu1 %v6923_v52 }
 0x367   :  { %v2419_v4 = vpop.f32.mrb[46].mxu0  ;;  %v7004_v25 = vadd.f32 %v2417_v38, %v8371_v12 }
 0x368   :  { %v2421_v60 = vpop.f32.mrb[47].mxu0 }
 0x369   :  { %v7006_v35 = vadd.f32 %v2421_v60, %v8371_v12  ;;  %v6997_v60 = vadd.f32 %v2399_v8, %v8367_v18  ;;  %v7005_v8 = vadd.f32 %v2419_v4, %v8367_v18 }
 0x36b   :  { %v6927_v5 = vpack.c.bf16 %v7006_v35, %v7004_v25  ;;  %v6999_v35 = vadd.f32 %v2405_v10, %v8367_v18 }
 0x36d   :  { %v2425_v37 = vpop.f32.mrb[48].mxu0  ;;  %6928 = vmatprep.subr.bf16.mxu1 %v6927_v5 }
 0x36e   :  { %v2427_v26 = vpop.f32.mrb[49].mxu0  ;;  %6930 = vmatpush3.bf16.xpose.msra.mxu1 %v6927_v5 }
 0x36f   :  { %v2429_v36 = vpop.f32.mrb[50].mxu0  ;;  %v7008_v28 = vadd.f32 %v2427_v26, %v8371_v12 }
 0x370   :  { %v2431_v13 = vpop.f32.mrb[51].mxu0 }
 0x371   :  { %v7010_v58 = vadd.f32 %v2431_v13, %v8371_v12 }
 0x373   :  { %v6931_v40 = vpack.c.bf16 %v7010_v58, %v7008_v28  ;;  %v7003_v28 = vadd.f32 %v2415_v1, %v8367_v18 }
 0x375   :  { %v2435_v52 = vpop.f32.mrb[52].mxu0  ;;  %6825 = vmatmul.mubr.f32.vlgmr.msra.gmra.mrb[16].mxu1 %v6993_v32  ;;  %6932 = vmatprep.subr.bf16.mxu1 %v6931_v40 }
 0x376   :  { %v2437_v38 = vpop.f32.mrb[53].mxu0  ;;  %6827 = vmatprep.mubr.f32.mxu1 %v6995_v51  ;;  %6934 = vmatpush3.bf16.xpose.msra.mxu1 %v6931_v40  ;;  %v7007_v40 = vadd.f32 %v2425_v37, %v8367_v18  ;;  %v7009_v37 = vadd.f32 %v2429_v36, %v8367_v18 }
 0x377   :  { %v2439_v25 = vpop.f32.mrb[54].mxu0  ;;  %v7012_v26 = vadd.f32 %v2437_v38, %v8371_v12 }
 0x378   :  { %v2441_v5 = vpop.f32.mrb[55].mxu0 }
 0x379   :  { %v7014_v13 = vadd.f32 %v2441_v5, %v8371_v12  ;;  %6828 = vmatmul.mubr.f32.gmra.mrb[18].mxu1 %v6997_v60 }
 0x37a   :  { %6830 = vmatprep.mubr.f32.mxu1 %v6999_v35 }
 0x37b   :  { %v6935_v43 = vpack.c.bf16 %v7014_v13, %v7012_v26 }
 0x37d   :  { %v2445_v58 = vpop.f32.mrb[56].mxu0  ;;  %6831 = vmatmul.mubr.f32.gmra.mrb[20].mxu1 %v7001_v42  ;;  %6936 = vmatprep.subr.bf16.mxu1 %v6935_v43 }
 0x37e   :  { %v2447_v32 = vpop.f32.mrb[57].mxu0  ;;  %6833 = vmatprep.mubr.f32.mxu1 %v7003_v28  ;;  %6938 = vmatpush3.bf16.xpose.msra.mxu1 %v6935_v43  ;;  %v7011_v43 = vadd.f32 %v2435_v52, %v8367_v18  ;;  %v7013_v28 = vadd.f32 %v2439_v25, %v8367_v18 }
 0x37f   :  { %v2449_v10 = vpop.f32.mrb[58].mxu0  ;;  %v7016_v38 = vadd.f32 %v2447_v32, %v8371_v12  ;;  %v7015_v32 = vadd.f32 %v2445_v58, %v8367_v18 }
 0x380   :  { %v2451_v51 = vpop.f32.mrb[59].mxu0 }
 0x381   :  { %v7018_v60 = vadd.f32 %v2451_v51, %v8371_v12  ;;  %6834 = vmatmul.mubr.f32.gmra.mrb[22].mxu1 %v7005_v8 }
 0x382   :  { %6852 = vmatprep.mubr.f32.mxu1 %v7007_v40 }
 0x383   :  { %v6939_v27 = vpack.c.bf16 %v7018_v60, %v7016_v38 }
 0x385   :  { %v2455_v1 = vpop.f32.mrb[60].mxu0  ;;  %6940 = vmatprep.subr.bf16.mxu1 %v6939_v27 }
 0x386   :  { %v2457_v35 = vpop.f32.mrb[61].mxu0  ;;  %6942 = vmatpush3.bf16.xpose.msra.mxu1 %v6939_v27 }
 0x387   :  { %v2459_v5 = vpop.f32.mrb[62].mxu0  ;;  %v7020_v13 = vadd.f32 %v2457_v35, %v8371_v12 }
 0x388   :  { %v2461_v26 = vpop.f32.mrb[63].mxu0 }
 0x389   :  { %v7022_v4 = vadd.f32 %v2461_v26, %v8371_v12  ;;  %v7019_v12 = vadd.f32 %v2455_v1, %v8367_v18 }
 0x38b   :  { %v6943_v42 = vpack.c.bf16 %v7022_v4, %v7020_v13 }
 0x38d   :  { %6944 = vmatprep.subr.bf16.mxu1 %v6943_v42 }
 0x38e   :  { %6946 = vmatpush3.bf16.xpose.msra.mxu1 %v6943_v42 }
 0x38f   :  { %3338 = vmatprep.subr.bf16.mxu1 %v7977_v15  ;;  %v7017_v15 = vadd.f32 %v2449_v10, %v8367_v18 }
 0x395   :  { %6853 = vmatmul.mubr.f32.vlgmr.msra.gmra.mrb[24].mxu1 %v7009_v37 }
 0x396   :  { %6855 = vmatprep.mubr.f32.mxu1 %v7011_v43  ;;  %3339 = vmatpush1.bf16.msra.mxu1 %v7980_v39  ;;  %v7021_v39 = vadd.f32 %v2459_v5, %v8367_v18 }
 0x397   :  { %3340 = vmatprep.subr.bf16.mxu1 %v7982_v41 }
 0x399   :  { %6856 = vmatmul.mubr.f32.gmra.mrb[26].mxu1 %v7013_v28 }
 0x39a   :  { %6858 = vmatprep.mubr.f32.mxu1 %v7015_v32  ;;  %3341 = vmatpush1.bf16.msra.mxu1 %v7986_v47 }
 0x39b   :  { %3342 = vmatprep.subr.bf16.mxu1 %v7988_v49 }
 0x39d   :  { %6859 = vmatmul.mubr.f32.gmra.mrb[28].mxu1 %v7017_v15 }
 0x39e   :  { %6861 = vmatprep.mubr.f32.mxu1 %v7019_v12  ;;  %3343 = vmatpush1.bf16.msra.mxu1 %v7992_v54 }
 0x39f   :  { %3344 = vmatprep.subr.bf16.mxu1 %v7994_v55 }
 0x3a1   :  { %6862 = vmatmul.mubr.f32.gmra.mrb[30].mxu1 %v7021_v39 }
 0x3a2   :  { %3345 = vmatpush1.bf16.msra.mxu1 %v7998_v62 }
 0x3a3   :  { %3379 = vmatprep.subr.bf16.mxu1 %v8072_v17 }
 0x408   :  { %v8446_v41 = vpop.f32.mrb[0].mxu1 }
 0x409   :  { %v8448_v47 = vpop.f32.mrb[1].mxu1  ;;  %v2888_v55 = vsel %vm2884_vm0, %v8446_v41, -inf }
 0x40a   :  { %v2885_v49 = vsel %vm2884_vm0, %v8448_v47, -inf }
 0x40b   :  { %2886 = vmax.xlane.f32.xlu0 %v2885_v49 }
 0x40c   :  { %v8452_v36 = vpop.f32.mrb[2].mxu1 }
 0x40d   :  { %v8454_v54 = vpop.f32.mrb[3].mxu1  ;;  %v2894_v52 = vsel %vm2884_vm0, %v8452_v36, -inf }
 0x40e   :  { %v2891_v62 = vsel %vm2884_vm0, %v8454_v54, -inf }
 0x40f   :  { %2889 = vmax.xlane.f32.xlu0 %v2888_v55  ;;  %2892 = vmax.xlane.f32.xlu1 %v2891_v62 }
 0x410   :  { %v8460_v17 = vpop.f32.mrb[4].mxu1 }
 0x411   :  { %v8462_v18 = vpop.f32.mrb[5].mxu1  ;;  %v2900_v10 = vsel %vm2884_vm0, %v8460_v17, -inf }
 0x412   :  { %v2897_v25 = vsel %vm2884_vm0, %v8462_v18, -inf }
 0x413   :  { %2895 = vmax.xlane.f32.xlu1 %v2894_v52  ;;  %2898 = vmax.xlane.f32.xlu0 %v2897_v25 }
 0x414   :  { %v8468_v58 = vpop.f32.mrb[6].mxu1 }
 0x415   :  { %v8470_v8 = vpop.f32.mrb[7].mxu1  ;;  %v2906_v51 = vsel %vm2884_vm0, %v8468_v58, -inf }
 0x416   :  { %v2903_v40 = vsel %vm2884_vm0, %v8470_v8, -inf }
 0x417   :  { %2901 = vmax.xlane.f32.xlu1 %v2900_v10  ;;  %2904 = vmax.xlane.f32.xlu0 %v2903_v40 }
 0x41b   :  { %2907 = vmax.xlane.f32.xlu1 %v2906_v51 }
 0x428   :  { %v8478_v38 = vpop.f32.mrb[8].mxu1 }
 0x429   :  { %v8480_v60 = vpop.f32.mrb[9].mxu1  ;;  %v2912_v27 = vsel %vm2884_vm0, %v8478_v38, -inf }
 0x42a   :  { %2913 = vmax.xlane.f32.xlu1 %v2912_v27  ;;  %v2909_v1 = vsel %vm2884_vm0, %v8480_v60, -inf }
 0x42b   :  { %2910 = vmax.xlane.f32.xlu0 %v2909_v1 }
 0x42c   :  { %v8486_v35 = vpop.f32.mrb[10].mxu1 }
 0x42d   :  { %v8488_v5 = vpop.f32.mrb[11].mxu1  ;;  %v2918_v26 = vsel %vm2884_vm0, %v8486_v35, -inf }
 0x42e   :  { %2919 = vmax.xlane.f32.xlu1 %v2918_v26  ;;  %v2915_v13 = vsel %vm2884_vm0, %v8488_v5, -inf }
 0x42f   :  { %2916 = vmax.xlane.f32.xlu0 %v2915_v13 }
 0x430   :  { %v8494_v4 = vpop.f32.mrb[12].mxu1 }
 0x431   :  { %v8496_v42 = vpop.f32.mrb[13].mxu1  ;;  %v2924_v37 = vsel %vm2884_vm0, %v8494_v4, -inf }
 0x432   :  { %2925 = vmax.xlane.f32.xlu1 %v2924_v37  ;;  %v2921_v43 = vsel %vm2884_vm0, %v8496_v42, -inf }
 0x433   :  { %2922 = vmax.xlane.f32.xlu0 %v2921_v43 }
 0x434   :  { %v8502_v28 = vpop.f32.mrb[14].mxu1 }
 0x435   :  { %v8504_v32 = vpop.f32.mrb[15].mxu1  ;;  %v2930_v15 = vsel %vm2884_vm0, %v8502_v28, -inf }
 0x436   :  { %2931 = vmax.xlane.f32.xlu1 %v2930_v15  ;;  %v2927_v12 = vsel %vm2884_vm0, %v8504_v32, -inf }
 0x437   :  { %2928 = vmax.xlane.f32.xlu0 %v2927_v12 }
 0x448   :  { %v8510_v39 = vpop.f32.mrb[16].mxu1 }
 0x449   :  { %v8512_v49 = vpop.f32.mrb[17].mxu1 }
 0x44c   :  { %v8514_v55 = vpop.f32.mrb[18].mxu1 }
 0x44d   :  { %v8516_v62 = vpop.f32.mrb[19].mxu1 }
 0x450   :  { %v8518_v52 = vpop.f32.mrb[20].mxu1 }
 0x451   :  { %v8520_v25 = vpop.f32.mrb[21].mxu1 }
 0x454   :  { %v8522_v10 = vpop.f32.mrb[22].mxu1 }
 0x455   :  { %v8524_v40 = vpop.f32.mrb[23].mxu1 }
 0x468   :  { %v8526_v51 = vpop.f32.mrb[24].mxu1 }
 0x469   :  { %v8528_v27 = vpop.f32.mrb[25].mxu1 }
 0x46c   :  { %v8530_v1 = vpop.f32.mrb[26].mxu1 }
 0x46d   :  { %v8532_v26 = vpop.f32.mrb[27].mxu1 }
 0x470   :  { %v8534_v13 = vpop.f32.mrb[28].mxu1 }
 0x471   :  { %v8536_v37 = vpop.f32.mrb[29].mxu1 }
 0x474   :  { %v8538_v43 = vpop.f32.mrb[30].mxu1 }
 0x475   :  { %v8540_v15 = vpop.f32.mrb[31].mxu1 }
 0x498   :  { %v2887_v12 = vpop.xlane.xlu0 %2886 }
 0x499   :  { %v2981_v31 = vsub.f32 %v8448_v47, %v2887_v12 }
 0x49b   :  { %v3013_v24 = vmul.f32 1.442695, %v2981_v31 }
 0x49c   :  { %v2890_v23 = vpop.xlane.xlu0 %2889  ;;  %v2893_v16 = vpop.xlane.xlu1 %2892 }
 0x49d   :  { %7484 = vpow2.f32 %v3013_v24  ;;  %v2982_v14 = vsub.f32 %v8446_v41, %v2890_v23  ;;  %v2983_v7 = vsub.f32 %v8454_v54, %v2893_v16 }
 0x49f   :  { %v3015_v6 = vmul.f32 1.442695, %v2982_v14  ;;  %v3017_v63 = vmul.f32 1.442695, %v2983_v7 }
 0x4a0   :  { %v2896_v50 = vpop.xlane.xlu1 %2895  ;;  %v2899_v57 = vpop.xlane.xlu0 %2898 }
 0x4a1   :  { %7486 = vpow2.f32 %v3015_v6  ;;  %v2984_v46 = vsub.f32 %v8452_v36, %v2896_v50  ;;  %v2985_v21 = vsub.f32 %v8462_v18, %v2899_v57 }
 0x4a2   :  { %7488 = vpow2.f32 %v3017_v63 }
 0x4a3   :  { %v3019_v45 = vmul.f32 1.442695, %v2984_v46  ;;  %v3021_v47 = vmul.f32 1.442695, %v2985_v21 }
 0x4a4   :  { %v2902_v31 = vpop.xlane.xlu1 %2901  ;;  %v2905_v12 = vpop.xlane.xlu0 %2904 }
 0x4a5   :  { %7490 = vpow2.f32 %v3019_v45  ;;  %v2986_v24 = vsub.f32 %v8460_v17, %v2902_v31  ;;  %v2987_v23 = vsub.f32 %v8470_v8, %v2905_v12 }
 0x4a6   :  { %7492 = vpow2.f32 %v3021_v47 }
 0x4a7   :  { %v8549_v14 = vpop.eup %7484  ;;  %v3023_v7 = vmul.f32 1.442695, %v2986_v24  ;;  %v3025_v16 = vmul.f32 1.442695, %v2987_v23 }
 0x4a8   :  { %v2908_v6 = vpop.xlane.xlu1 %2907  ;;  %v3077_v50 = vsel %vm2884_vm0, %v8549_v14, 0.0 }
 0x4a9   :  { %7494 = vpow2.f32 %v3023_v7  ;;  %v2988_v63 = vsub.f32 %v8468_v58, %v2908_v6  ;;  %3078 = vadd.xlane.f32.xlu0 %v3077_v50  ;;  %v2933_v50 = vsel %vm2884_vm0, %v8512_v49, -inf }
 0x4aa   :  { %7496 = vpow2.f32 %v3025_v16 }
 0x4ab   :  { %v8554_v21 = vpop.eup %7486  ;;  %v3027_v45 = vmul.f32 1.442695, %v2988_v63 }
 0x4ac   :  { %v8556_v46 = vpop.eup %7488  ;;  %v3080_v57 = vsel %vm2884_vm0, %v8554_v21, 0.0 }
 0x4ad   :  { %7498 = vpow2.f32 %v3027_v45  ;;  %3081 = vadd.xlane.f32.xlu1 %v3080_v57  ;;  %v3083_v41 = vsel %vm2884_vm0, %v8556_v46, 0.0 }
 0x4ae   :  { %3084 = vadd.xlane.f32.xlu0 %v3083_v41 }
 0x4af   :  { %v8562_v36 = vpop.eup %7490 }
 0x4b0   :  { %v8564_v54 = vpop.eup %7492  ;;  %v3086_v17 = vsel %vm2884_vm0, %v8562_v36, 0.0 }
 0x4b1   :  { %3087 = vadd.xlane.f32.xlu1 %v3086_v17  ;;  %v3089_v18 = vsel %vm2884_vm0, %v8564_v54, 0.0 }
 0x4b2   :  { %3090 = vadd.xlane.f32.xlu0 %v3089_v18 }
 0x4b3   :  { %v8570_v58 = vpop.eup %7494 }
 0x4b4   :  { %v8572_v8 = vpop.eup %7496  ;;  %v3092_v47 = vsel %vm2884_vm0, %v8570_v58, 0.0 }
 0x4b5   :  { %3093 = vadd.xlane.f32.xlu1 %v3092_v47  ;;  %v3095_v31 = vsel %vm2884_vm0, %v8572_v8, 0.0 }
 0x4b6   :  { %3096 = vadd.xlane.f32.xlu0 %v3095_v31 }
 0x4b7   :  { %v8578_v12 = vpop.eup %7498  ;;  %v2914_v24 = vpop.xlane.xlu1 %2913 }
 0x4b8   :  { %v2990_v23 = vsub.f32 %v8478_v38, %v2914_v24  ;;  %v2911_v7 = vpop.xlane.xlu0 %2910  ;;  %v3098_v16 = vsel %vm2884_vm0, %v8578_v12, 0.0  ;;  %v2936_v38 = vsel %vm2884_vm0, %v8510_v39, -inf }
 0x4b9   :  { %v2989_v6 = vsub.f32 %v8480_v60, %v2911_v7  ;;  %3099 = vadd.xlane.f32.xlu1 %v3098_v16  ;;  %v2939_v60 = vsel %vm2884_vm0, %v8516_v62, -inf }
 0x4ba   :  { %2934 = vmax.xlane.f32.xlu0 %v2933_v50  ;;  %v3031_v63 = vmul.f32 1.442695, %v2990_v23 }
 0x4bb   :  { %v3029_v45 = vmul.f32 1.442695, %v2989_v6  ;;  %v2920_v57 = vpop.xlane.xlu1 %2919 }
 0x4bc   :  { %v2992_v41 = vsub.f32 %v8486_v35, %v2920_v57  ;;  %v2917_v17 = vpop.xlane.xlu0 %2916  ;;  %v2942_v35 = vsel %vm2884_vm0, %v8514_v55, -inf }
 0x4bd   :  { %7500 = vpow2.f32 %v3029_v45  ;;  %v2991_v18 = vsub.f32 %v8488_v5, %v2917_v17  ;;  %2937 = vmax.xlane.f32.xlu1 %v2936_v38  ;;  %v2945_v5 = vsel %vm2884_vm0, %v8520_v25, -inf }
 0x4be   :  { %2940 = vmax.xlane.f32.xlu0 %v2939_v60  ;;  %7502 = vpow2.f32 %v3031_v63  ;;  %v3035_v47 = vmul.f32 1.442695, %v2992_v41 }
 0x4bf   :  { %v3033_v31 = vmul.f32 1.442695, %v2991_v18  ;;  %v2926_v24 = vpop.xlane.xlu1 %2925 }
 0x4c0   :  { %v2994_v23 = vsub.f32 %v8494_v4, %v2926_v24  ;;  %v2923_v7 = vpop.xlane.xlu0 %2922  ;;  %v2948_v4 = vsel %vm2884_vm0, %v8518_v52, -inf }
 0x4c1   :  { %7504 = vpow2.f32 %v3033_v31  ;;  %v2993_v16 = vsub.f32 %v8496_v42, %v2923_v7  ;;  %2943 = vmax.xlane.f32.xlu1 %v2942_v35  ;;  %v2951_v42 = vsel %vm2884_vm0, %v8524_v40, -inf }
 0x4c2   :  { %2946 = vmax.xlane.f32.xlu0 %v2945_v5  ;;  %7506 = vpow2.f32 %v3035_v47  ;;  %v3039_v6 = vmul.f32 1.442695, %v2994_v23 }
 0x4c3   :  { %v3037_v50 = vmul.f32 1.442695, %v2993_v16  ;;  %v2932_v63 = vpop.xlane.xlu1 %2931 }
 0x4c4   :  { %v2996_v45 = vsub.f32 %v8502_v28, %v2932_v63  ;;  %v2929_v57 = vpop.xlane.xlu0 %2928  ;;  %v2954_v28 = vsel %vm2884_vm0, %v8522_v10, -inf }
 0x4c5   :  { %7508 = vpow2.f32 %v3037_v50  ;;  %v2995_v41 = vsub.f32 %v8504_v32, %v2929_v57  ;;  %2949 = vmax.xlane.f32.xlu1 %v2948_v4  ;;  %v2957_v4 = vsel %vm2884_vm0, %v8528_v27, -inf }
 0x4c6   :  { %2952 = vmax.xlane.f32.xlu0 %v2951_v42  ;;  %7510 = vpow2.f32 %v3039_v6  ;;  %v3043_v38 = vmul.f32 1.442695, %v2996_v45  ;;  %v2963_v42 = vsel %vm2884_vm0, %v8532_v26, -inf }
 0x4c7   :  { %v8604_v17 = vpop.eup %7500  ;;  %v3041_v18 = vmul.f32 1.442695, %v2995_v41  ;;  %v2960_v41 = vsel %vm2884_vm0, %v8526_v51, -inf }
 0x4c8   :  { %v3101_v60 = vsel %vm2884_vm0, %v8604_v17, 0.0  ;;  %v8610_v47 = vpop.eup %7502 }
 0x4c9   :  { %7512 = vpow2.f32 %v3041_v18  ;;  %2955 = vmax.xlane.f32.xlu1 %v2954_v28  ;;  %v3104_v31 = vsel %vm2884_vm0, %v8610_v47, 0.0  ;;  %v2969_v18 = vsel %vm2884_vm0, %v8536_v37, -inf  ;;  %v2972_v28 = vsel %vm2884_vm0, %v8534_v13, -inf }
 0x4ca   :  { %3102 = vadd.xlane.f32.xlu0 %v3101_v60  ;;  %7514 = vpow2.f32 %v3043_v38  ;;  %v2966_v38 = vsel %vm2884_vm0, %v8530_v1, -inf  ;;  %v2975_v60 = vsel %vm2884_vm0, %v8540_v15, -inf }
 0x4cb   :  { %v8612_v32 = vpop.eup %7504 }
 0x4cc   :  { %v3107_v24 = vsel %vm2884_vm0, %v8612_v32, 0.0  ;;  %v8618_v23 = vpop.eup %7506 }
 0x4cd   :  { %3105 = vadd.xlane.f32.xlu1 %v3104_v31  ;;  %v3110_v35 = vsel %vm2884_vm0, %v8618_v23, 0.0  ;;  %v2978_v31 = vsel %vm2884_vm0, %v8538_v43, -inf }
 0x4ce   :  { %3108 = vadd.xlane.f32.xlu0 %v3107_v24  ;;  %v9602_v24 = vmov 0  }
 0x4cf   :  { %v8620_v7 = vpop.eup %7508  ;;  %3370 = vmatprep.mubr.bf16.mxu1 %v9602_v24 }
 0x4d0   :  { %v3113_v16 = vsel %vm2884_vm0, %v8620_v7, 0.0  ;;  %v8626_v5 = vpop.eup %7510 }
 0x4d1   :  { %3111 = vadd.xlane.f32.xlu1 %v3110_v35  ;;  %v3116_v50 = vsel %vm2884_vm0, %v8626_v5, 0.0 }
 0x4d2   :  { %3114 = vadd.xlane.f32.xlu0 %v3113_v16 }
 0x4d3   :  { %v8628_v6 = vpop.eup %7512 }
 0x4d4   :  { %v3119_v63 = vsel %vm2884_vm0, %v8628_v6, 0.0  ;;  %v8634_v45 = vpop.eup %7514 }
 0x4d5   :  { %3117 = vadd.xlane.f32.xlu1 %v3116_v50  ;;  %v3122_v57 = vsel %vm2884_vm0, %v8634_v45, 0.0 }
 0x4d6   :  { %3120 = vadd.xlane.f32.xlu0 %v3119_v63 }
 0x4d9   :  { %3123 = vadd.xlane.f32.xlu1 %v3122_v57 }
 0x4da   :  { %2958 = vmax.xlane.f32.xlu0 %v2957_v4 }
 0x4dd   :  { %2961 = vmax.xlane.f32.xlu1 %v2960_v41 }
 0x4de   :  { %2964 = vmax.xlane.f32.xlu0 %v2963_v42 }
 0x4e1   :  { %2967 = vmax.xlane.f32.xlu1 %v2966_v38 }
 0x4e2   :  { %2970 = vmax.xlane.f32.xlu0 %v2969_v18 }
 0x4e5   :  { %2973 = vmax.xlane.f32.xlu1 %v2972_v28 }
 0x4e6   :  { %2976 = vmax.xlane.f32.xlu0 %v2975_v60 }
 0x4e9   :  { %2979 = vmax.xlane.f32.xlu1 %v2978_v31 }
 0x536   :  { %v3079_v35 = vpop.xlane.xlu0 %3078 }
 0x537   :  { %7516 = vrcp.f32 %v3079_v35 }
 0x53a   :  { %v3082_v16 = vpop.xlane.xlu1 %3081 }
 0x53b   :  { %7518 = vrcp.f32 %v3082_v16  ;;  %v3085_v50 = vpop.xlane.xlu0 %3084 }
 0x53c   :  { %7520 = vrcp.f32 %v3085_v50 }
 0x53e   :  { %v3088_v63 = vpop.xlane.xlu1 %3087 }
 0x53f   :  { %7522 = vrcp.f32 %v3088_v63  ;;  %v3091_v57 = vpop.xlane.xlu0 %3090 }
 0x540   :  { %7524 = vrcp.f32 %v3091_v57 }
 0x541   :  { %v7517_v4 = vpop.eup %7516 }
 0x542   :  { %v3094_v41 = vpop.xlane.xlu1 %3093  ;;  %v3205_v38 = vmul.f32 %v7517_v4, %v8549_v14 }
 0x543   :  { %7526 = vrcp.f32 %v3094_v41  ;;  %v3097_v42 = vpop.xlane.xlu0 %3096 }
 0x544   :  { %7528 = vrcp.f32 %v3097_v42  ;;  %v3237_v50 = vsel %vm2884_vm0, %v3205_v38, 0.0 }
 0x545   :  { %v7519_v18 = vpop.eup %7518 }
 0x546   :  { %v7521_v28 = vpop.eup %7520  ;;  %v3206_v60 = vmul.f32 %v7519_v18, %v8554_v21  ;;  %v3100_v31 = vpop.xlane.xlu1 %3099 }
 0x547   :  { %v3207_v35 = vmul.f32 %v7521_v28, %v8556_v46  ;;  %7530 = vrcp.f32 %v3100_v31  ;;  %v2935_v16 = vpop.xlane.xlu0 %2934 }
 0x548   :  { %v3238_v63 = vsel %vm2884_vm0, %v3206_v60, 0.0  ;;  %v2997_v57 = vsub.f32 %v8512_v49, %v2935_v16 }
 0x549   :  { %v7523_v41 = vpop.eup %7522  ;;  %v3239_v24 = vadd.f32 %v3238_v63, %v3237_v50  ;;  %v3240_v14 = vsel %vm2884_vm0, %v3207_v35, 0.0 }
 0x54a   :  { %v7525_v56 = vpop.eup %7524  ;;  %v3208_v4 = vmul.f32 %v7523_v41, %v8562_v36  ;;  %v3045_v42 = vmul.f32 1.442695, %v2997_v57  ;;  %v2938_v21 = vpop.xlane.xlu1 %2937 }
 0x54b   :  { %v3241_v18 = vadd.f32 %v3240_v14, %v3239_v24  ;;  %v3209_v46 = vmul.f32 %v7525_v56, %v8564_v54  ;;  %v2998_v28 = vsub.f32 %v8510_v39, %v2938_v21  ;;  %v2941_v31 = vpop.xlane.xlu0 %2940 }
 0x54c   :  { %v3242_v38 = vsel %vm2884_vm0, %v3208_v4, 0.0  ;;  %7532 = vpow2.f32 %v3045_v42  ;;  %v2999_v49 = vsub.f32 %v8516_v62, %v2941_v31 }
 0x54d   :  { %v7527_v60 = vpop.eup %7526  ;;  %v3243_v16 = vadd.f32 %v3242_v38, %v3241_v18  ;;  %v3047_v50 = vmul.f32 1.442695, %v2998_v28  ;;  %v3244_v35 = vsel %vm2884_vm0, %v3209_v46, 0.0 }
 0x54e   :  { %v7529_v63 = vpop.eup %7528  ;;  %v3210_v36 = vmul.f32 %v7527_v60, %v8570_v58  ;;  %v3049_v57 = vmul.f32 1.442695, %v2999_v49  ;;  %v2944_v24 = vpop.xlane.xlu1 %2943 }
 0x54f   :  { %v3245_v41 = vadd.f32 %v3244_v35, %v3243_v16  ;;  %v3211_v56 = vmul.f32 %v7529_v63, %v8572_v8  ;;  %7534 = vpow2.f32 %v3047_v50  ;;  %v3000_v39 = vsub.f32 %v8514_v55, %v2944_v24  ;;  %v2947_v54 = vpop.xlane.xlu0 %2946 }
 0x550   :  { %v3246_v14 = vsel %vm2884_vm0, %v3210_v36, 0.0  ;;  %7536 = vpow2.f32 %v3049_v57  ;;  %v3001_v62 = vsub.f32 %v8520_v25, %v2947_v54 }
 0x551   :  { %v7531_v4 = vpop.eup %7530  ;;  %v3247_v42 = vadd.f32 %v3246_v14, %v3245_v41  ;;  %v3051_v21 = vmul.f32 1.442695, %v3000_v39  ;;  %v3248_v18 = vsel %vm2884_vm0, %v3211_v56, 0.0 }
 0x552   :  { %v3212_v58 = vmul.f32 %v7531_v4, %v8578_v12  ;;  %v3053_v46 = vmul.f32 1.442695, %v3001_v62  ;;  %v2950_v28 = vpop.xlane.xlu1 %2949 }
 0x553   :  { %v3249_v31 = vadd.f32 %v3248_v18, %v3247_v42  ;;  %7538 = vpow2.f32 %v3051_v21  ;;  %v3002_v8 = vsub.f32 %v8518_v52, %v2950_v28  ;;  %v2953_v55 = vpop.xlane.xlu0 %2952 }
 0x554   :  { %v3250_v38 = vsel %vm2884_vm0, %v3212_v58, 0.0  ;;  %7540 = vpow2.f32 %v3053_v46  ;;  %v3003_v49 = vsub.f32 %v8524_v40, %v2953_v55 }
 0x555   :  { %v3251_v25 = vadd.f32 %v3250_v38, %v3249_v31  ;;  %v3055_v60 = vmul.f32 1.442695, %v3002_v8 }
 0x556   :  { %v8678_v16 = vpop.eup %7532  ;;  %v3057_v50 = vmul.f32 1.442695, %v3003_v49  ;;  %v2956_v63 = vpop.xlane.xlu1 %2955 }
 0x557   :  { %v3252_v35 = vrot.slane %v3251_v25, 4  ;;  %7542 = vpow2.f32 %v3055_v60  ;;  %v3004_v12 = vsub.f32 %v8522_v10, %v2956_v63  ;;  %v3103_v36 = vpop.xlane.xlu0 %3102  ;;  %v3125_v52 = vsel %vm2884_vm0, %v8678_v16, 0.0 }
 0x558   :  { %7544 = vpow2.f32 %v3057_v50  ;;  %3126 = vadd.xlane.f32.xlu0 %v3125_v52 }
 0x559   :  { %v8683_v57 = vpop.eup %7534  ;;  %v3253_v24 = vadd.f32 %v3252_v35, %v3251_v25  ;;  %v3059_v40 = vmul.f32 1.442695, %v3004_v12  ;;  %7546 = vrcp.f32 %v3103_v36 }
 0x55a   :  { %v8685_v41 = vpop.eup %7536  ;;  %v3106_v56 = vpop.xlane.xlu1 %3105  ;;  %v3128_v39 = vsel %vm2884_vm0, %v8683_v57, 0.0 }
 0x55b   :  { %v3254_v54 = vrot.slane %v3253_v24, 2  ;;  %7548 = vpow2.f32 %v3059_v40  ;;  %v3109_v10 = vpop.xlane.xlu0 %3108  ;;  %3129 = vadd.xlane.f32.xlu1 %v3128_v39  ;;  %v3131_v14 = vsel %vm2884_vm0, %v8685_v41, 0.0 }
 0x55c   :  { %7550 = vrcp.f32 %v3106_v56  ;;  %3132 = vadd.xlane.f32.xlu0 %v3131_v14 }
 0x55d   :  { %v8691_v62 = vpop.eup %7538  ;;  %v3255_v4 = vadd.f32 %v3254_v54, %v3253_v24  ;;  %7552 = vrcp.f32 %v3109_v10 }
 0x55e   :  { %v8693_v42 = vpop.eup %7540  ;;  %v3112_v21 = vpop.xlane.xlu1 %3111  ;;  %v3134_v18 = vsel %vm2884_vm0, %v8691_v62, 0.0 }
 0x55f   :  { %v3256_v58 = vrot.slane %v3255_v4, 1  ;;  %7554 = vrcp.f32 %v3112_v21  ;;  %v3115_v46 = vpop.xlane.xlu0 %3114  ;;  %3135 = vadd.xlane.f32.xlu1 %v3134_v18  ;;  %v3137_v28 = vsel %vm2884_vm0, %v8693_v42, 0.0  ;;  %v9708_v21 = vmov 0  }
 0x560   :  { %3138 = vadd.xlane.f32.xlu0 %v3137_v28  ;;  %7556 = vrcp.f32 %v3115_v46 }
 0x561   :  { %v8699_v31 = vpop.eup %7542  ;;  %v3257_v8 = vadd.f32 %v3256_v58, %v3255_v4 }
 0x562   :  { %v8701_v55 = vpop.eup %7544  ;;  %v3118_v38 = vpop.xlane.xlu1 %3117  ;;  %v3140_v49 = vsel %vm2884_vm0, %v8699_v31, 0.0 }
 0x563   :  { %v7547_v25 = vpop.eup %7546  ;;  %v3121_v60 = vpop.xlane.xlu0 %3120  ;;  %3141 = vadd.xlane.f32.xlu1 %v3140_v49  ;;  %v3143_v50 = vsel %vm2884_vm0, %v8701_v55, 0.0  ;;  %v3322_v63 = vmul.f32 0.015625, %v3257_v8  ;;  %7558 = vrcp.f32 %v3118_v38 }
 0x564   :  { %3144 = vadd.xlane.f32.xlu0 %v3143_v50  ;;  %v3213_v52 = vmul.f32 %v7547_v25, %v8604_v17 }
 0x565   :  { %v8707_v35 = vpop.eup %7548  ;;  %v3327_v12 = vsel %vm3326_vm1, %v3322_v63, 0.015625 }
 0x566   :  { %v7551_v36 = vpop.eup %7550  ;;  %v3124_v24 = vpop.xlane.xlu1 %3123  ;;  %v3146_v40 = vsel %vm2884_vm0, %v8707_v35, 0.0  ;;  %v8713_v56 = vpack.c.bf16 %v3327_v12, %v3327_v12  ;;  %v3258_v18 = vsel %vm2884_vm0, %v3213_v52, 0.0 }
 0x567   :  { %v7553_v39 = vpop.eup %7552  ;;  %v3214_v54 = vmul.f32 %v7551_v36, %v8610_v47  ;;  %v2959_v10 = vpop.xlane.xlu0 %2958  ;;  %3147 = vadd.xlane.f32.xlu1 %v3146_v40 }
 0x568   :  { %v3005_v14 = vsub.f32 %v8528_v27, %v2959_v10  ;;  %6519 = vmatmul.mubr.msk.bf16.vlgmr.msra.gmra.mrb[32].mxu1 %vm2884_vm0, %v8713_v56  ;;  %v3215_v58 = vmul.f32 %v7553_v39, %v8612_v32 }
 0x569   :  { %v7555_v4 = vpop.eup %7554  ;;  %v3259_v17 = vsel %vm2884_vm0, %v3214_v54, 0.0  ;;  %3380 = vmatpush1.bf16.msra.mxu1 %v8076_v20  ;;  %3411 = vmatprep.mubr.bf16.mxu1 %v9708_v21 }
 0x56a   :  { %v3061_v47 = vmul.f32 1.442695, %v3005_v14  ;;  %v2962_v46 = vpop.xlane.xlu1 %2961  ;;  %3381 = vmatprep.subr.bf16.mxu1 %v8078_v22  ;;  %v3260_v28 = vadd.f32 %v3259_v17, %v3258_v18  ;;  %v3216_v38 = vmul.f32 %v7555_v4, %v8618_v23  ;;  %v3261_v25 = vsel %vm2884_vm0, %v3215_v58, 0.0  ;;  %v7557_v22 = vpop.eup %7556 }
 0x56b   :  { %v3006_v27 = vsub.f32 %v8526_v51, %v2962_v46  ;;  %v2965_v8 = vpop.xlane.xlu0 %2964  ;;  %v3217_v36 = vmul.f32 %v7557_v22, %v8620_v7 }
 0x56c   :  { %7560 = vpow2.f32 %v3061_v47  ;;  %v3007_v49 = vsub.f32 %v8532_v26, %v2965_v8  ;;  %v3262_v63 = vadd.f32 %v3261_v25, %v3260_v28  ;;  %v3263_v12 = vsel %vm2884_vm0, %v3216_v38, 0.0 }
 0x56d   :  { %7562 = vrcp.f32 %v3121_v60  ;;  %v3063_v20 = vmul.f32 1.442695, %v3006_v27  ;;  %3382 = vmatpush1.bf16.msra.mxu1 %v8082_v30  ;;  %v7559_v60 = vpop.eup %7558  ;;  %v3265_v7 = vsel %vm2884_vm0, %v3217_v36, 0.0  ;;  %v9717_v36 = vld [vmem:[#allocation24_spill] sm:$0xff] }
 0x56e   :  { %7564 = vrcp.f32 %v3124_v24  ;;  %v3065_v32 = vmul.f32 1.442695, %v3007_v49  ;;  %v2968_v50 = vpop.xlane.xlu1 %2967  ;;  %3383 = vmatprep.subr.bf16.mxu1 %v8084_v33  ;;  %v3264_v33 = vadd.f32 %v3263_v12, %v3262_v63  ;;  %v3218_v39 = vmul.f32 %v7559_v60, %v8626_v5  ;;  %v9710_v63 = vld [vmem:[#allocation95_spill] sm:$0xff]  ;;  %v9715_v60 = vld [vmem:[#allocation22_spill] sm:$0xff] }
 0x56f   :  { %7566 = vpow2.f32 %v3063_v20  ;;  %v3008_v51 = vsub.f32 %v8530_v1, %v2968_v50  ;;  %v2971_v23 = vpop.xlane.xlu0 %2970 }
 0x570   :  { %7568 = vpow2.f32 %v3065_v32  ;;  %v3009_v26 = vsub.f32 %v8536_v37, %v2971_v23  ;;  %v3266_v4 = vadd.f32 %v3265_v7, %v3264_v33  ;;  %v3267_v17 = vsel %vm2884_vm0, %v3218_v39, 0.0  ;;  %v9713_v23 = vld [vmem:[#allocation98_spill] sm:$0xff]  ;;  %v9721_v39 = vld [vmem:[#allocation28_spill] sm:$0xff] }
 0x571   :  { %v3067_v30 = vmul.f32 1.442695, %v3008_v51  ;;  %3384 = vmatpush1.bf16.msra.mxu1 %v8088_v44  ;;  %v9712_v51 = vld [vmem:[#allocation97_spill] sm:$0xff]  ;;  %v9719_v33 = vld [vmem:[#allocation26_spill] sm:$0xff] }
 0x572   :  { %v3069_v52 = vmul.f32 1.442695, %v3009_v26  ;;  %v2974_v24 = vpop.xlane.xlu1 %2973  ;;  %3385 = vmatprep.subr.bf16.mxu1 %v8090_v48  ;;  %v3268_v47 = vadd.f32 %v3267_v17, %v3266_v4  ;;  %v9714_v26 = vld [vmem:[#allocation99_spill] sm:$0xff]  ;;  %v9723_v7 = vld [vmem:[#allocation46_spill] sm:$0xff] }
 0x573   :  { %7570 = vpow2.f32 %v3067_v30  ;;  %v3010_v1 = vsub.f32 %v8534_v13, %v2974_v24  ;;  %v2977_v40 = vpop.xlane.xlu0 %2976  ;;  %v9716_v30 = vld [vmem:[#allocation23_spill] sm:$0xff]  ;;  %v9718_v24 = vld [vmem:[#allocation25_spill] sm:$0xff]  ;;  %v9727_v4 = vld [vmem:[#allocation50_spill] sm:$0xff] }
 0x574   :  { %7572 = vpow2.f32 %v3069_v52  ;;  %v3011_v37 = vsub.f32 %v8540_v15, %v2977_v40  ;;  %v9720_v40 = vld [vmem:[#allocation27_spill] sm:$0xff]  ;;  %v9731_v17 = vld [vmem:[#allocation70_spill] sm:$0xff] }
 0x575   :  { %v3071_v54 = vmul.f32 1.442695, %v3010_v1  ;;  %3386 = vmatpush1.bf16.msra.mxu1 %v8094_v2 }
 0x576   :  { %v8741_v44 = vpop.eup %7560  ;;  %v3073_v10 = vmul.f32 1.442695, %v3011_v37  ;;  %v2980_v14 = vpop.xlane.xlu1 %2979  ;;  %3420 = vmatprep.subr.bf16.mxu1 %v8168_v53 }
 0x577   :  { %v7563_v48 = vpop.eup %7562  ;;  %7574 = vpow2.f32 %v3071_v54  ;;  %v3012_v13 = vsub.f32 %v8538_v43, %v2980_v14  ;;  %v3149_v5 = vsel %vm2884_vm0, %v8741_v44, 0.0  ;;  %v9722_v54 = vld [vmem:[#allocation29_spill] sm:$0xff]  ;;  %v9725_v14 = vld [vmem:[#allocation48_spill] sm:$0xff] }
 0x578   :  { %v7565_v15 = vpop.eup %7564  ;;  %7576 = vpow2.f32 %v3073_v10  ;;  %6520 = vmatmul.mubr.msk.bf16.vlgmr.msra.gmra.mrb[36].mxu1 %vm2884_vm0, %v8713_v56  ;;  %3150 = vadd.xlane.f32.xlu0 %v3149_v5  ;;  %v3219_v43 = vmul.f32 %v7563_v48, %v8628_v6  ;;  %v9724_v10 = vld [vmem:[#allocation47_spill] sm:$0xff]  ;;  %v9726_v48 = vld [vmem:[#allocation49_spill] sm:$0xff]  ;;  %v9729_v5 = vld [vmem:[#allocation52_spill] sm:$0xff] }
 0x579   :  { %v8751_v2 = vpop.eup %7566  ;;  %v3075_v18 = vmul.f32 1.442695, %v3012_v13  ;;  %3421 = vmatpush1.bf16.msra.mxu1 %v8172_v9  ;;  %3452 = vmatprep.mubr.bf16.mxu1 %v9708_v21  ;;  %v3220_v28 = vmul.f32 %v7565_v15, %v8634_v45  ;;  %v9728_v13 = vld [vmem:[#allocation51_spill] sm:$0xff]  ;;  %v9730_v15 = vld [vmem:[#allocation53_spill] sm:$0xff] }
 0x57a   :  { %v8755_v53 = vpop.eup %7568  ;;  %3422 = vmatprep.subr.bf16.mxu1 %v8174_v3  ;;  %v3152_v58 = vsel %vm2884_vm0, %v8751_v2, 0.0  ;;  %v3269_v3 = vsel %vm2884_vm0, %v3219_v43, 0.0  ;;  %v9733_v43 = vld [vmem:[#allocation72_spill] sm:$0xff] }
 0x57b   :  { %7578 = vpow2.f32 %v3075_v18  ;;  %3153 = vadd.xlane.f32.xlu1 %v3152_v58  ;;  %v3155_v46 = vsel %vm2884_vm0, %v8755_v53, 0.0  ;;  %v3270_v8 = vadd.f32 %v3269_v3, %v3268_v47  ;;  %v3271_v45 = vsel %vm2884_vm0, %v3220_v28, 0.0  ;;  %v9732_v18 = vld [vmem:[#allocation71_spill] sm:$0xff]  ;;  %v9734_v58 = vld [vmem:[#allocation73_spill] sm:$0xff]  ;;  %v9735_v47 = vld [vmem:[#allocation74_spill] sm:$0xff] }
 0x57c   :  { %3156 = vadd.xlane.f32.xlu0 %v3155_v46  ;;  %v9736_v46 = vld [vmem:[#allocation75_spill] sm:$0xff]  ;;  %v9737_v28 = vld [vmem:[#allocation76_spill] sm:$0xff]  ;;  %v9738_v3 = vld [vmem:[#allocation77_spill] sm:$0xff] }
 0x57d   :  { %v8764_v9 = vpop.eup %7570  ;;  %3423 = vmatpush1.bf16.msra.mxu1 %v8178_v0  ;;  %v3272_v20 = vadd.f32 %v3271_v45, %v3270_v8  ;;  %v9740_v8 = vld [vmem:[#allocation101_spill] sm:$0xff]  ;;  %v9742_v45 = vld [vmem:[#allocation103_spill] sm:$0xff] }
 0x57e   :  { %v8767_v27 = vpop.eup %7572  ;;  %3424 = vmatprep.subr.bf16.mxu1 %v8180_v61  ;;  %v3158_v6 = vsel %vm2884_vm0, %v8764_v9, 0.0 }
 0x57f   :  { %3159 = vadd.xlane.f32.xlu1 %v3158_v6  ;;  %v3161_v38 = vsel %vm2884_vm0, %v8767_v27, 0.0  ;;  %v3273_v50 = vrot.slane %v3272_v20, 4  ;;  %v9739_v6 = vld [vmem:[#allocation100_spill] sm:$0xff] }
 0x580   :  { %3162 = vadd.xlane.f32.xlu0 %v3161_v38  ;;  %v9741_v38 = vld [vmem:[#allocation102_spill] sm:$0xff] }
 0x581   :  { %v8776_v49 = vpop.eup %7574  ;;  %3425 = vmatpush1.bf16.msra.mxu1 %v8184_v34  ;;  %v3274_v22 = vadd.f32 %v3273_v50, %v3272_v20  ;;  %v9744_v20 = vld [vmem:[#allocation105_spill] sm:$0xff]  ;;  %v9747_v50 = vld [vmem:[#allocation30_spill] sm:$0xff] }
 0x582   :  { %v8779_v0 = vpop.eup %7576  ;;  %3426 = vmatprep.subr.bf16.mxu1 %v8186_v19  ;;  %v3164_v61 = vsel %vm2884_vm0, %v8776_v49, 0.0  ;;  %v9709_v19 = vld [vmem:[#allocation94_spill] sm:$0xff] }
 0x583   :  { %3165 = vadd.xlane.f32.xlu1 %v3164_v61  ;;  %v3167_v25 = vsel %vm2884_vm0, %v8779_v0, 0.0  ;;  %v9743_v61 = vld [vmem:[#allocation104_spill] sm:$0xff] }
 0x584   :  { %3168 = vadd.xlane.f32.xlu0 %v3167_v25  ;;  %v9745_v25 = vld [vmem:[#allocation106_spill] sm:$0xff] }
 0x585   :  { %v8786_v32 = vpop.eup %7578  ;;  %3427 = vmatpush1.bf16.msra.mxu1 %v8190_v11  ;;  %v9711_v11 = vld [vmem:[#allocation96_spill] sm:$0xff] }
 0x586   :  { %3461 = vmatprep.subr.bf16.mxu1 %v8264_v29  ;;  %v3170_v34 = vsel %vm2884_vm0, %v8786_v32, 0.0  ;;  %v3275_v29 = vrot.slane %v3274_v22, 2 }
 0x587   :  { %3171 = vadd.xlane.f32.xlu1 %v3170_v34  ;;  %v9746_v34 = vld [vmem:[#allocation107_spill] sm:$0xff] }
 0x588   :  { %6521 = vmatmul.mubr.msk.bf16.vlgmr.msra.gmra.mrb[40].mxu1 %vm2884_vm0, %v8713_v56  ;;  %v3276_v12 = vadd.f32 %v3275_v29, %v3274_v22  ;;  %v9749_v22 = vld [vmem:[#allocation32_spill] sm:$0xff]  ;;  %v9752_v29 = vld [vmem:[#allocation35_spill] sm:$0xff] }
 0x589   :  { %3462 = vmatpush1.bf16.msra.mxu1 %v8268_v59  ;;  %3493 = vmatprep.mubr.bf16.mxu1 %v9708_v21 }
 0x58a   :  { %3463 = vmatprep.subr.bf16.mxu1 %v9709_v19  ;;  %v3277_v59 = vrot.slane %v3276_v12, 1  ;;  %v9748_v19 = vld [vmem:[#allocation31_spill] sm:$0xff] }
 0x58c   :  { %v3278_v52 = vadd.f32 %v3277_v59, %v3276_v12  ;;  %v9754_v12 = vld [vmem:[#allocation37_spill] sm:$0xff] }
 0x58d   :  { %3464 = vmatpush1.bf16.msra.mxu1 %v9710_v63  ;;  %v9750_v63 = vld [vmem:[#allocation33_spill] sm:$0xff] }
 0x58e   :  { %3465 = vmatprep.subr.bf16.mxu1 %v9711_v11  ;;  %v3323_v1 = vmul.f32 0.015625, %v3278_v52  ;;  %v9751_v11 = vld [vmem:[#allocation34_spill] sm:$0xff] }
 0x590   :  { %v3328_v37 = vsel %vm3326_vm1, %v3323_v1, 0.015625 }
 0x591   :  { %3466 = vmatpush1.bf16.msra.mxu1 %v9712_v51  ;;  %v9753_v51 = vld [vmem:[#allocation36_spill] sm:$0xff] }
 0x592   :  { %3467 = vmatprep.subr.bf16.mxu1 %v9713_v23 }
 0x595   :  { %3468 = vmatpush1.bf16.msra.mxu1 %v9714_v26  ;;  %v9755_v26 = vld [vmem:[#allocation54_spill] sm:$0xff] }
 0x596   :  { %3505 = vmatprep.subr.bf16.mxu1 %v9715_v60 }
 0x598   :  { %6522 = vmatmul.mubr.msk.bf16.vlgmr.msra.gmra.mrb[44].mxu1 %vm2884_vm0, %v8713_v56  ;;  %v3332_v56 = vpack.c.bf16 %v3328_v37, %v3328_v37 }
 0x599   :  { %3506 = vmatpush1.bf16.msra.mxu1 %v9716_v30  ;;  %3537 = vmatprep.mubr.bf16.mxu1 %v9708_v21 }
 0x59a   :  { %3507 = vmatprep.subr.bf16.mxu1 %v9717_v36 }
 0x59d   :  { %3508 = vmatpush1.bf16.msra.mxu1 %v9718_v24 }
 0x59e   :  { %3509 = vmatprep.subr.bf16.mxu1 %v9719_v33 }
 0x5a1   :  { %3510 = vmatpush1.bf16.msra.mxu1 %v9720_v40 }
 0x5a2   :  { %3511 = vmatprep.subr.bf16.mxu1 %v9721_v39 }
 0x5a5   :  { %3512 = vmatpush1.bf16.msra.mxu1 %v9722_v54 }
 0x5a6   :  { %3546 = vmatprep.subr.bf16.mxu1 %v9723_v7 }
 0x5a8   :  { %6523 = vmatmul.mubr.msk.bf16.vlgmr.msra.gmra.mrb[48].mxu1 %vm2884_vm0, %v3332_v56 }
 0x5a9   :  { %3547 = vmatpush1.bf16.msra.mxu1 %v9724_v10  ;;  %3578 = vmatprep.mubr.bf16.mxu1 %v9708_v21 }
 0x5aa   :  { %3548 = vmatprep.subr.bf16.mxu1 %v9725_v14 }
 0x5ad   :  { %3549 = vmatpush1.bf16.msra.mxu1 %v9726_v48 }
 0x5ae   :  { %3550 = vmatprep.subr.bf16.mxu1 %v9727_v4 }
 0x5b1   :  { %3551 = vmatpush1.bf16.msra.mxu1 %v9728_v13 }
 0x5b2   :  { %3552 = vmatprep.subr.bf16.mxu1 %v9729_v5 }
 0x5b5   :  { %3553 = vmatpush1.bf16.msra.mxu1 %v9730_v15 }
 0x5b6   :  { %3587 = vmatprep.subr.bf16.mxu1 %v9731_v17 }
 0x5b8   :  { %6524 = vmatmul.mubr.msk.bf16.vlgmr.msra.gmra.mrb[52].mxu1 %vm2884_vm0, %v3332_v56 }
 0x5b9   :  { %3588 = vmatpush1.bf16.msra.mxu1 %v9732_v18  ;;  %3619 = vmatprep.mubr.bf16.mxu1 %v9708_v21 }
 0x5ba   :  { %3589 = vmatprep.subr.bf16.mxu1 %v9733_v43 }
 0x5bd   :  { %3590 = vmatpush1.bf16.msra.mxu1 %v9734_v58 }
 0x5be   :  { %3591 = vmatprep.subr.bf16.mxu1 %v9735_v47 }
 0x5c1   :  { %3592 = vmatpush1.bf16.msra.mxu1 %v9736_v46 }
 0x5c2   :  { %3593 = vmatprep.subr.bf16.mxu1 %v9737_v28 }
 0x5c5   :  { %3594 = vmatpush1.bf16.msra.mxu1 %v9738_v3 }
 0x5c6   :  { %3628 = vmatprep.subr.bf16.mxu1 %v9739_v6 }
 0x5c8   :  { %6525 = vmatmul.mubr.msk.bf16.vlgmr.msra.gmra.mrb[56].mxu1 %vm2884_vm0, %v3332_v56 }
 0x5c9   :  { %3629 = vmatpush1.bf16.msra.mxu1 %v9740_v8  ;;  %3660 = vmatprep.mubr.bf16.mxu1 %v9708_v21 }
 0x5ca   :  { %3630 = vmatprep.subr.bf16.mxu1 %v9741_v38 }
 0x5cd   :  { %3631 = vmatpush1.bf16.msra.mxu1 %v9742_v45 }
 0x5ce   :  { %3632 = vmatprep.subr.bf16.mxu1 %v9743_v61 }
 0x5d1   :  { %3633 = vmatpush1.bf16.msra.mxu1 %v9744_v20 }
 0x5d2   :  { %3634 = vmatprep.subr.bf16.mxu1 %v9745_v25 }
 0x5d5   :  { %3635 = vmatpush1.bf16.msra.mxu1 %v9746_v34 }
 0x5d6   :  { %3672 = vmatprep.subr.bf16.mxu1 %v9747_v50 }
 0x5d8   :  { %6526 = vmatmul.mubr.msk.bf16.vlgmr.msra.gmra.mrb[60].mxu1 %vm2884_vm0, %v3332_v56 }
 0x5d9   :  { %3673 = vmatpush1.bf16.msra.mxu1 %v9748_v19  ;;  %3704 = vmatprep.mubr.bf16.mxu1 %v9708_v21 }
 0x5da   :  { %3674 = vmatprep.subr.bf16.mxu1 %v9749_v22 }
 0x5dd   :  { %3675 = vmatpush1.bf16.msra.mxu1 %v9750_v63 }
 0x5de   :  { %3676 = vmatprep.subr.bf16.mxu1 %v9751_v11 }
 0x5e1   :  { %3677 = vmatpush1.bf16.msra.mxu1 %v9752_v29 }
 0x5e2   :  { %3678 = vmatprep.subr.bf16.mxu1 %v9753_v51 }
 0x5e5   :  { %v3127_v23 = vpop.xlane.xlu0 %3126  ;;  %3679 = vmatpush1.bf16.msra.mxu1 %v9754_v12 }
 0x5e6   :  { %7580 = vrcp.f32 %v3127_v23  ;;  %3713 = vmatprep.subr.bf16.mxu1 %v9755_v26 }
 0x5e8   :  { %v3130_v60 = vpop.xlane.xlu1 %3129 }
 0x5e9   :  { %7582 = vrcp.f32 %v3130_v60  ;;  %v3133_v59 = vpop.xlane.xlu0 %3132 }
 0x5ea   :  { %7584 = vrcp.f32 %v3133_v59 }
 0x5ec   :  { %v3136_v30 = vpop.xlane.xlu1 %3135 }
 0x5ed   :  { %7586 = vrcp.f32 %v3136_v30  ;;  %v3139_v36 = vpop.xlane.xlu0 %3138 }
 0x5ee   :  { %7588 = vrcp.f32 %v3139_v36 }
 0x5f0   :  { %v7581_v52 = vpop.eup %7580  ;;  %v3142_v24 = vpop.xlane.xlu1 %3141 }
 0x5f1   :  { %7590 = vrcp.f32 %v3142_v24  ;;  %v3145_v33 = vpop.xlane.xlu0 %3144  ;;  %v3221_v1 = vmul.f32 %v7581_v52, %v8678_v16  ;;  %v9756_v24 = vld [vmem:[#allocation55_spill] sm:$0xff] }
 0x5f2   :  { %7592 = vrcp.f32 %v3145_v33 }
 0x5f3   :  { %v7583_v40 = vpop.eup %7582  ;;  %v3279_v7 = vsel %vm2884_vm0, %v3221_v1, 0.0 }
 0x5f4   :  { %v7585_v39 = vpop.eup %7584  ;;  %v3222_v37 = vmul.f32 %v7583_v40, %v8683_v57  ;;  %v3148_v54 = vpop.xlane.xlu1 %3147 }
 0x5f5   :  { %v3223_v56 = vmul.f32 %v7585_v39, %v8685_v41  ;;  %7594 = vrcp.f32 %v3148_v54  ;;  %v9758_v54 = vld [vmem:[#allocation57_spill] sm:$0xff] }
 0x5f6   :  { %v3280_v10 = vsel %vm2884_vm0, %v3222_v37, 0.0 }
 0x5f7   :  { %v7587_v14 = vpop.eup %7586  ;;  %v3281_v48 = vadd.f32 %v3280_v10, %v3279_v7  ;;  %v3282_v13 = vsel %vm2884_vm0, %v3223_v56, 0.0  ;;  %v9759_v7 = vld [vmem:[#allocation58_spill] sm:$0xff] }
 0x5f8   :  { %v7589_v4 = vpop.eup %7588  ;;  %v3224_v16 = vmul.f32 %v7587_v14, %v8691_v62 }
 0x5f9   :  { %v3283_v5 = vadd.f32 %v3282_v13, %v3281_v48  ;;  %v3225_v15 = vmul.f32 %v7589_v4, %v8693_v42  ;;  %v9760_v4 = vld [vmem:[#allocation59_spill] sm:$0xff] }
 0x5fa   :  { %v3284_v57 = vsel %vm2884_vm0, %v3224_v16, 0.0  ;;  %v9761_v16 = vld [vmem:[#allocation60_spill] sm:$0xff] }
 0x5fb   :  { %v7591_v17 = vpop.eup %7590  ;;  %v3285_v18 = vadd.f32 %v3284_v57, %v3283_v5  ;;  %v3286_v43 = vsel %vm2884_vm0, %v3225_v15, 0.0  ;;  %v9762_v15 = vld [vmem:[#allocation61_spill] sm:$0xff] }
 0x5fc   :  { %v7593_v41 = vpop.eup %7592  ;;  %v3226_v58 = vmul.f32 %v7591_v17, %v8699_v31  ;;  %v9763_v17 = vld [vmem:[#allocation78_spill] sm:$0xff] }
 0x5fd   :  { %v3287_v47 = vadd.f32 %v3286_v43, %v3285_v18  ;;  %v3227_v46 = vmul.f32 %v7593_v41, %v8701_v55 }
 0x5fe   :  { %v3288_v28 = vsel %vm2884_vm0, %v3226_v58, 0.0 }
 0x5ff   :  { %v7595_v3 = vpop.eup %7594  ;;  %v3289_v6 = vadd.f32 %v3288_v28, %v3287_v47  ;;  %v3290_v62 = vsel %vm2884_vm0, %v3227_v46, 0.0  ;;  %v9765_v47 = vld [vmem:[#allocation80_spill] sm:$0xff] }
 0x600   :  { %v3228_v42 = vmul.f32 %v7595_v3, %v8707_v35  ;;  %v9766_v3 = vld [vmem:[#allocation81_spill] sm:$0xff] }
 0x601   :  { %v3291_v8 = vadd.f32 %v3290_v62, %v3289_v6  ;;  %v9767_v62 = vld [vmem:[#allocation82_spill] sm:$0xff] }
 0x602   :  { %v3292_v38 = vsel %vm2884_vm0, %v3228_v42, 0.0 }
 0x603   :  { %v3293_v45 = vadd.f32 %v3292_v38, %v3291_v8  ;;  %v9768_v38 = vld [vmem:[#allocation83_spill] sm:$0xff] }
 0x605   :  { %v3294_v61 = vrot.slane %v3293_v45, 4  ;;  %v3151_v20 = vpop.xlane.xlu0 %3150 }
 0x606   :  { %7596 = vrcp.f32 %v3151_v20  ;;  %v9771_v20 = vld [vmem:[#allocation108_spill] sm:$0xff] }
 0x607   :  { %v3295_v25 = vadd.f32 %v3294_v61, %v3293_v45  ;;  %v9769_v45 = vld [vmem:[#allocation84_spill] sm:$0xff] }
 0x608   :  { %v3154_v31 = vpop.xlane.xlu1 %3153 }
 0x609   :  { %v3296_v34 = vrot.slane %v3295_v25, 2  ;;  %7598 = vrcp.f32 %v3154_v31  ;;  %v3157_v55 = vpop.xlane.xlu0 %3156  ;;  %v9773_v31 = vld [vmem:[#allocation110_spill] sm:$0xff] }
 0x60a   :  { %7600 = vrcp.f32 %v3157_v55  ;;  %v9774_v55 = vld [vmem:[#allocation111_spill] sm:$0xff] }
 0x60b   :  { %v3297_v50 = vadd.f32 %v3296_v34, %v3295_v25 }
 0x60c   :  { %v3160_v19 = vpop.xlane.xlu1 %3159 }
 0x60d   :  { %7602 = vrcp.f32 %v3160_v19  ;;  %v3298_v22 = vrot.slane %v3297_v50, 1  ;;  %v3163_v11 = vpop.xlane.xlu0 %3162 }
 0x60e   :  { %7604 = vrcp.f32 %v3163_v11 }
 0x60f   :  { %v3299_v63 = vadd.f32 %v3298_v22, %v3297_v50  ;;  %v9775_v22 = vld [vmem:[#allocation112_spill] sm:$0xff] }
 0x610   :  { %v7597_v35 = vpop.eup %7596  ;;  %v3166_v51 = vpop.xlane.xlu1 %3165 }
 0x611   :  { %v3324_v29 = vmul.f32 0.015625, %v3299_v63  ;;  %v3229_v26 = vmul.f32 %v7597_v35, %v8741_v44  ;;  %7606 = vrcp.f32 %v3166_v51  ;;  %v3169_v1 = vpop.xlane.xlu0 %3168  ;;  %v9777_v51 = vld [vmem:[#allocation114_spill] sm:$0xff] }
 0x612   :  { %7608 = vrcp.f32 %v3169_v1  ;;  %v9783_v1 = vld [vmem:[#allocation42_spill] sm:$0xff] }
 0x613   :  { %v7599_v23 = vpop.eup %7598  ;;  %v3329_v12 = vsel %vm3326_vm1, %v3324_v29, 0.015625  ;;  %v3300_v33 = vsel %vm2884_vm0, %v3229_v26, 0.0  ;;  %v9776_v29 = vld [vmem:[#allocation113_spill] sm:$0xff]  ;;  %v9779_v26 = vld [vmem:[#allocation38_spill] sm:$0xff] }
 0x614   :  { %v3230_v60 = vmul.f32 %v7599_v23, %v8751_v2  ;;  %v8874_v59 = vpack.c.bf16 %v3329_v12, %v3329_v12  ;;  %v7601_v30 = vpop.eup %7600  ;;  %v9757_v2 = vld [vmem:[#allocation56_spill] sm:$0xff]  ;;  %v3172_v37 = vpop.xlane.xlu1 %3171  ;;  %v9778_v12 = vld [vmem:[#allocation115_spill] sm:$0xff] }
 0x615   :  { %v3231_v44 = vmul.f32 %v7601_v30, %v8755_v53  ;;  %7610 = vrcp.f32 %v3172_v37  ;;  %v9780_v30 = vld [vmem:[#allocation39_spill] sm:$0xff] }
 0x616   :  { %v3301_v36 = vsel %vm2884_vm0, %v3230_v60, 0.0  ;;  %6527 = vmatmul.mubr.msk.bf16.vlgmr.msra.gmra.mrb[64].mxu1 %vm2884_vm0, %v8874_v59  ;;  %v9784_v37 = vld [vmem:[#allocation43_spill] sm:$0xff] }
 0x617   :  { %v7603_v52 = vpop.eup %7602  ;;  %3714 = vmatpush1.bf16.msra.mxu1 %v9756_v24  ;;  %3745 = vmatprep.mubr.bf16.mxu1 %v9708_v21  ;;  %v3302_v40 = vadd.f32 %v3301_v36, %v3300_v33  ;;  %v3303_v56 = vsel %vm2884_vm0, %v3231_v44, 0.0  ;;  %v9781_v36 = vld [vmem:[#allocation40_spill] sm:$0xff]  ;;  %v9782_v33 = vld [vmem:[#allocation41_spill] sm:$0xff] }
 0x618   :  { %3715 = vmatprep.subr.bf16.mxu1 %v9757_v2  ;;  %v3232_v39 = vmul.f32 %v7603_v52, %v8764_v9  ;;  %v7605_v10 = vpop.eup %7604 }
 0x619   :  { %v3304_v14 = vadd.f32 %v3303_v56, %v3302_v40  ;;  %v3233_v13 = vmul.f32 %v7605_v10, %v8767_v27  ;;  %v9764_v27 = vld [vmem:[#allocation79_spill] sm:$0xff]  ;;  %v9786_v56 = vld [vmem:[#allocation45_spill] sm:$0xff]  ;;  %v9787_v10 = vld [vmem:[#allocation62_spill] sm:$0xff] }
 0x61a   :  { %v3305_v48 = vsel %vm2884_vm0, %v3232_v39, 0.0 }
 0x61b   :  { %3716 = vmatpush1.bf16.msra.mxu1 %v9758_v54  ;;  %v7607_v53 = vpop.eup %7606  ;;  %v3306_v9 = vadd.f32 %v3305_v48, %v3304_v14  ;;  %v3307_v57 = vsel %vm2884_vm0, %v3233_v13, 0.0  ;;  %v9788_v14 = vld [vmem:[#allocation63_spill] sm:$0xff]  ;;  %v9789_v48 = vld [vmem:[#allocation64_spill] sm:$0xff] }
 0x61c   :  { %3717 = vmatprep.subr.bf16.mxu1 %v9759_v7  ;;  %v3234_v5 = vmul.f32 %v7607_v53, %v8776_v49  ;;  %v7609_v18 = vpop.eup %7608 }
 0x61d   :  { %v3308_v41 = vadd.f32 %v3307_v57, %v3306_v9  ;;  %v3235_v49 = vmul.f32 %v7609_v18, %v8779_v0  ;;  %v9770_v0 = vld [vmem:[#allocation85_spill] sm:$0xff]  ;;  %v9793_v57 = vld [vmem:[#allocation68_spill] sm:$0xff]  ;;  %v9795_v18 = vld [vmem:[#allocation86_spill] sm:$0xff] }
 0x61e   :  { %v3309_v43 = vsel %vm2884_vm0, %v3234_v5, 0.0 }
 0x61f   :  { %3718 = vmatpush1.bf16.msra.mxu1 %v9760_v4  ;;  %v7611_v58 = vpop.eup %7610  ;;  %v3310_v46 = vadd.f32 %v3309_v43, %v3308_v41  ;;  %v3311_v6 = vsel %vm2884_vm0, %v3235_v49, 0.0  ;;  %v9790_v4 = vld [vmem:[#allocation65_spill] sm:$0xff]  ;;  %v9796_v41 = vld [vmem:[#allocation87_spill] sm:$0xff]  ;;  %v9797_v43 = vld [vmem:[#allocation88_spill] sm:$0xff] }
 0x620   :  { %3719 = vmatprep.subr.bf16.mxu1 %v9761_v16  ;;  %v3236_v28 = vmul.f32 %v7611_v58, %v8786_v32  ;;  %v9772_v32 = vld [vmem:[#allocation109_spill] sm:$0xff]  ;;  %v9791_v16 = vld [vmem:[#allocation66_spill] sm:$0xff] }
 0x621   :  { %v3312_v42 = vadd.f32 %v3311_v6, %v3310_v46  ;;  %v9801_v6 = vld [vmem:[#allocation92_spill] sm:$0xff] }
 0x622   :  { %v3313_v8 = vsel %vm2884_vm0, %v3236_v28, 0.0 }
 0x623   :  { %3720 = vmatpush1.bf16.msra.mxu1 %v9762_v15  ;;  %v3314_v61 = vadd.f32 %v3313_v8, %v3312_v42  ;;  %v9792_v15 = vld [vmem:[#allocation67_spill] sm:$0xff]  ;;  %v9803_v42 = vld [vmem:[#allocation116_spill] sm:$0xff]  ;;  %v9804_v8 = vld [vmem:[#allocation117_spill] sm:$0xff] }
 0x624   :  { %3754 = vmatprep.subr.bf16.mxu1 %v9763_v17  ;;  %v9794_v17 = vld [vmem:[#allocation69_spill] sm:$0xff] }
 0x625   :  { %v3315_v25 = vrot.slane %v3314_v61, 4 }
 0x626   :  { %6528 = vmatmul.mubr.msk.bf16.vlgmr.msra.gmra.mrb[68].mxu1 %vm2884_vm0, %v8874_v59 }
 0x627   :  { %3755 = vmatpush1.bf16.msra.mxu1 %v9764_v27  ;;  %3786 = vmatprep.mubr.bf16.mxu1 %v9708_v21  ;;  %v3316_v34 = vadd.f32 %v3315_v25, %v3314_v61  ;;  %v9798_v27 = vld [vmem:[#allocation89_spill] sm:$0xff]  ;;  %v9806_v61 = vld [vmem:[#allocation119_spill] sm:$0xff] }
 0x628   :  { %3756 = vmatprep.subr.bf16.mxu1 %v9765_v47  ;;  %v9799_v47 = vld [vmem:[#allocation90_spill] sm:$0xff] }
 0x629   :  { %v3317_v63 = vrot.slane %v3316_v34, 2 }
 0x62b   :  { %3757 = vmatpush1.bf16.msra.mxu1 %v9766_v3  ;;  %v3318_v23 = vadd.f32 %v3317_v63, %v3316_v34  ;;  %v9800_v3 = vld [vmem:[#allocation91_spill] sm:$0xff]  ;;  %v9809_v34 = vld [vmem:[#allocation122_spill] sm:$0xff] }
 0x62c   :  { %3758 = vmatprep.subr.bf16.mxu1 %v9767_v62  ;;  %v9802_v62 = vld [vmem:[#allocation93_spill] sm:$0xff] }
 0x62d   :  { %v3319_v60 = vrot.slane %v3318_v23, 1 }
 0x62f   :  { %3759 = vmatpush1.bf16.msra.mxu1 %v9768_v38  ;;  %v3320_v52 = vadd.f32 %v3319_v60, %v3318_v23  ;;  %v9805_v38 = vld [vmem:[#allocation118_spill] sm:$0xff] }
 0x630   :  { %3760 = vmatprep.subr.bf16.mxu1 %v9769_v45 }
 0x631   :  { %v3325_v40 = vmul.f32 0.015625, %v3320_v52 }
 0x633   :  { %3761 = vmatpush1.bf16.msra.mxu1 %v9770_v0  ;;  %v3330_v54 = vsel %vm3326_vm1, %v3325_v40, 0.015625 }
 0x634   :  { %3795 = vmatprep.subr.bf16.mxu1 %v9771_v20  ;;  %v3334_v7 = vpack.c.bf16 %v3330_v54, %v3330_v54  ;;  %v9807_v20 = vld [vmem:[#allocation120_spill] sm:$0xff] }
 0x636   :  { %6529 = vmatmul.mubr.msk.bf16.vlgmr.msra.gmra.mrb[72].mxu1 %vm2884_vm0, %v8874_v59 }
 0x637   :  { %3796 = vmatpush1.bf16.msra.mxu1 %v9772_v32  ;;  %3827 = vmatprep.mubr.bf16.mxu1 %v9708_v21 }
 0x638   :  { %3797 = vmatprep.subr.bf16.mxu1 %v9773_v31  ;;  %v9808_v31 = vld [vmem:[#allocation121_spill] sm:$0xff] }
 0x63b   :  { %3798 = vmatpush1.bf16.msra.mxu1 %v9774_v55  ;;  %v8918_v50 = vpop.f32.mrb[32].mxu1  ;;  %v9810_v55 = vld [vmem:[#allocation123_spill] sm:$0xff] }
 0x63c   :  { %v8920_v19 = vpop.f32.mrb[33].mxu1  ;;  %3799 = vmatprep.subr.bf16.mxu1 %v9775_v22 }
 0x63d   :  { %v3376_v11 = vpop.f32.mrb[34].mxu1 }
 0x63e   :  { %v3377_v35 = vpop.f32.mrb[35].mxu1 }
 0x63f   :  { %3800 = vmatpush1.bf16.msra.mxu1 %v9776_v29 }
 0x640   :  { %3801 = vmatprep.subr.bf16.mxu1 %v9777_v51 }
 0x643   :  { %3802 = vmatpush1.bf16.msra.mxu1 %v9778_v12 }
 0x644   :  { %3839 = vmatprep.subr.bf16.mxu1 %v9779_v26 }
 0x646   :  { %6530 = vmatmul.mubr.msk.bf16.vlgmr.msra.gmra.mrb[76].mxu1 %vm2884_vm0, %v8874_v59  ;;  %v9785_v59 = vld [vmem:[#allocation44_spill] sm:$0xff] }
 0x647   :  { %3840 = vmatpush1.bf16.msra.mxu1 %v9780_v30  ;;  %3871 = vmatprep.mubr.bf16.mxu1 %v9708_v21 }
 0x648   :  { %3841 = vmatprep.subr.bf16.mxu1 %v9781_v36 }
 0x64b   :  { %v8932_v24 = vpop.f32.mrb[36].mxu1  ;;  %3842 = vmatpush1.bf16.msra.mxu1 %v9782_v33 }
 0x64c   :  { %v8935_v44 = vpop.f32.mrb[37].mxu1  ;;  %3843 = vmatprep.subr.bf16.mxu1 %v9783_v1 }
 0x64d   :  { %v3417_v2 = vpop.f32.mrb[38].mxu1 }
 0x64e   :  { %v3418_v39 = vpop.f32.mrb[39].mxu1 }
 0x64f   :  { %3844 = vmatpush1.bf16.msra.mxu1 %v9784_v37 }
 0x650   :  { %3845 = vmatprep.subr.bf16.mxu1 %v9785_v59 }
 0x653   :  { %3846 = vmatpush1.bf16.msra.mxu1 %v9786_v56 }
 0x654   :  { %3880 = vmatprep.subr.bf16.mxu1 %v9787_v10 }
 0x656   :  { %6531 = vmatmul.mubr.msk.bf16.vlgmr.msra.gmra.mrb[80].mxu1 %vm2884_vm0, %v3334_v7 }
 0x657   :  { %3881 = vmatpush1.bf16.msra.mxu1 %v9788_v14  ;;  %3912 = vmatprep.mubr.bf16.mxu1 %v9708_v21 }
 0x658   :  { %3882 = vmatprep.subr.bf16.mxu1 %v9789_v48 }
 0x65b   :  { %v8947_v53 = vpop.f32.mrb[40].mxu1  ;;  %3883 = vmatpush1.bf16.msra.mxu1 %v9790_v4 }
 0x65c   :  { %v8950_v13 = vpop.f32.mrb[41].mxu1  ;;  %3884 = vmatprep.subr.bf16.mxu1 %v9791_v16 }
 0x65d   :  { %v3458_v9 = vpop.f32.mrb[42].mxu1 }
 0x65e   :  { %v3459_v5 = vpop.f32.mrb[43].mxu1 }
 0x65f   :  { %3885 = vmatpush1.bf16.msra.mxu1 %v9792_v15 }
 0x660   :  { %3886 = vmatprep.subr.bf16.mxu1 %v9793_v57 }
 0x663   :  { %3887 = vmatpush1.bf16.msra.mxu1 %v9794_v17 }
 0x664   :  { %3921 = vmatprep.subr.bf16.mxu1 %v9795_v18 }
 0x666   :  { %6532 = vmatmul.mubr.msk.bf16.vlgmr.msra.gmra.mrb[84].mxu1 %vm2884_vm0, %v3334_v7 }
 0x667   :  { %3922 = vmatpush1.bf16.msra.mxu1 %v9796_v41  ;;  %3953 = vmatprep.mubr.bf16.mxu1 %v9708_v21 }
 0x668   :  { %3923 = vmatprep.subr.bf16.mxu1 %v9797_v43 }
 0x66b   :  { %v8961_v58 = vpop.f32.mrb[44].mxu1  ;;  %3924 = vmatpush1.bf16.msra.mxu1 %v9798_v27 }
 0x66c   :  { %v8964_v49 = vpop.f32.mrb[45].mxu1  ;;  %3925 = vmatprep.subr.bf16.mxu1 %v9799_v47 }
 0x66d   :  { %v3499_v46 = vpop.f32.mrb[46].mxu1 }
 0x66e   :  { %v3500_v28 = vpop.f32.mrb[47].mxu1 }
 0x66f   :  { %3926 = vmatpush1.bf16.msra.mxu1 %v9800_v3 }
 0x670   :  { %3927 = vmatprep.subr.bf16.mxu1 %v9801_v6 }
 0x673   :  { %3928 = vmatpush1.bf16.msra.mxu1 %v9802_v62 }
 0x674   :  { %3962 = vmatprep.subr.bf16.mxu1 %v9803_v42 }
 0x676   :  { %6533 = vmatmul.mubr.msk.bf16.vlgmr.msra.gmra.mrb[88].mxu1 %vm2884_vm0, %v3334_v7 }
 0x677   :  { %3963 = vmatpush1.bf16.msra.mxu1 %v9804_v8  ;;  %3994 = vmatprep.mubr.bf16.mxu1 %v9708_v21 }
 0x678   :  { %3964 = vmatprep.subr.bf16.mxu1 %v9805_v38 }
 0x67b   :  { %v8975_v45 = vpop.f32.mrb[48].mxu1  ;;  %3965 = vmatpush1.bf16.msra.mxu1 %v9806_v61 }
 0x67c   :  { %v8978_v0 = vpop.f32.mrb[49].mxu1  ;;  %3966 = vmatprep.subr.bf16.mxu1 %v9807_v20 }
 0x67d   :  { %v3543_v25 = vpop.f32.mrb[50].mxu1 }
 0x67e   :  { %v3544_v32 = vpop.f32.mrb[51].mxu1 }
 0x67f   :  { %3967 = vmatpush1.bf16.msra.mxu1 %v9808_v31 }
 0x680   :  { %3968 = vmatprep.subr.bf16.mxu1 %v9809_v34 }
 0x683   :  { %3969 = vmatpush1.bf16.msra.mxu1 %v9810_v55 }
 0x686   :  { %6534 = vmatmul.mubr.msk.bf16.vlgmr.msra.gmra.mrb[92].mxu1 %vm2884_vm0, %v3334_v7 }
 0x68b   :  { %v8985_v21 = vpop.f32.mrb[52].mxu1 }
 0x68c   :  { %v8987_v22 = vpop.f32.mrb[53].mxu1 }
 0x68d   :  { %v3584_v63 = vpop.f32.mrb[54].mxu1 }
 0x68e   :  { %v3585_v11 = vpop.f32.mrb[55].mxu1 }
 0x69b   :  { %v8989_v35 = vpop.f32.mrb[56].mxu1 }
 0x69c   :  { %v8991_v29 = vpop.f32.mrb[57].mxu1 }
 0x69d   :  { %v3625_v51 = vpop.f32.mrb[58].mxu1 }
 0x69e   :  { %v3626_v23 = vpop.f32.mrb[59].mxu1 }
 0x6ab   :  { %v8993_v12 = vpop.f32.mrb[60].mxu1 }
 0x6ac   :  { %v8995_v26 = vpop.f32.mrb[61].mxu1 }
 0x6ad   :  { %v3666_v60 = vpop.f32.mrb[62].mxu1 }
 0x6ae   :  { %v3667_v30 = vpop.f32.mrb[63].mxu1 }
 0x6e9   :  { %v8997_v36 = vpop.f32.mrb[64].mxu1 }
 0x6ea   :  { %v8999_v52 = vpop.f32.mrb[65].mxu1 }
 0x6eb   :  { %v3710_v33 = vpop.f32.mrb[66].mxu1 }
 0x6ec   :  { %v3711_v1 = vpop.f32.mrb[67].mxu1 }
 0x6f9   :  { %v9001_v2 = vpop.f32.mrb[68].mxu1 }
 0x6fa   :  { %v9003_v40 = vpop.f32.mrb[69].mxu1 }
 0x6fb   :  { %v3751_v39 = vpop.f32.mrb[70].mxu1 }
 0x6fc   :  { %v3752_v37 = vpop.f32.mrb[71].mxu1 }
 0x709   :  { %v9005_v59 = vpop.f32.mrb[72].mxu1 }
 0x70a   :  { %v9007_v54 = vpop.f32.mrb[73].mxu1 }
 0x70b   :  { %v3792_v56 = vpop.f32.mrb[74].mxu1 }
 0x70c   :  { %v3793_v7 = vpop.f32.mrb[75].mxu1 }
 0x719   :  { %v9009_v10 = vpop.f32.mrb[76].mxu1 }
 0x71a   :  { %v9011_v14 = vpop.f32.mrb[77].mxu1 }
 0x71b   :  { %v3833_v48 = vpop.f32.mrb[78].mxu1 }
 0x71c   :  { %v3834_v4 = vpop.f32.mrb[79].mxu1 }
 0x729   :  { %v9013_v16 = vpop.f32.mrb[80].mxu1 }
 0x72a   :  { %v9015_v9 = vpop.f32.mrb[81].mxu1 }
 0x72b   :  { %v3877_v5 = vpop.f32.mrb[82].mxu1 }
 0x72c   :  { %v3878_v15 = vpop.f32.mrb[83].mxu1 }
 0x739   :  { %v9017_v57 = vpop.f32.mrb[84].mxu1 }
 0x73a   :  { %v9019_v17 = vpop.f32.mrb[85].mxu1 }
 0x73b   :  { %v3918_v18 = vpop.f32.mrb[86].mxu1 }
 0x73c   :  { %v3919_v41 = vpop.f32.mrb[87].mxu1 }
 0x749   :  { %v9021_v43 = vpop.f32.mrb[88].mxu1 }
 0x74a   :  { %v9023_v27 = vpop.f32.mrb[89].mxu1 }
 0x74b   :  { %v3959_v47 = vpop.f32.mrb[90].mxu1 }
 0x74c   :  { %v3960_v46 = vpop.f32.mrb[91].mxu1 }
 0x759   :  { %v9025_v28 = vpop.f32.mrb[92].mxu1 }
 0x75a   :  { %v9027_v3 = vpop.f32.mrb[93].mxu1 }
 0x75b   :  { %v4000_v6 = vpop.f32.mrb[94].mxu1 }
 0x75c   :  { %v4001_v62 = vpop.f32.mrb[95].mxu1 }
 0x75d   :  { %7816 = dma.done.wait [#allocation3], 65536 }
 0x75e   :  { %7817 = vsyncadd [#allocation3], 4294901760  ;;  %v4008_v42 = vpack.c.bf16 %v8920_v19, %v8920_v19  ;;  %v4016_v8 = vpack.c.bf16 %v8978_v0, %v8978_v0  ;;  %v4024_v38 = vpack.c.bf16 %v8999_v52, %v8999_v52  ;;  %v4032_v61 = vpack.c.bf16 %v9015_v9, %v9015_v9  ;;  %v4040_v51 = vld [vmem:[#allocation2 + $0x8] sm:$0xff]  ;;  %v4042_v23 = vld [vmem:[#allocation2 + $0x18] sm:$0xff] }
 0x75f   :  { %vm4658_vm2 = vcmask 1041409   ;;  %vm4661_vm3 = vcmask 1042434   ;;  %vm4664_vm4 = vcmask 1043459   ;;  %v4039_v60 = vld [vmem:[#allocation2] sm:$0xff]  ;;  %4724 = vmatprep.subr.bf16.mxu1 %v4040_v51  ;;  %4888 = vmatprep.subr.bf16.mxu0 %v4042_v23  ;;  %v4041_v33 = vld [vmem:[#allocation2 + $0x10] sm:$0xff]  ;;  %v4048_v1 = vld [vmem:[#allocation2 + $0x48] sm:$0xff] }
 0x760   :  { %v4626_v20 = vunpack.c.l.b16 %v4008_v42  ;;  %v4634_v25 = vunpack.c.l.b16 %v4016_v8  ;;  %v4642_v32 = vunpack.c.l.b16 %v4024_v38  ;;  %v4650_v31 = vunpack.c.l.b16 %v4032_v61  ;;  %v4050_v39 = vld [vmem:[#allocation2 + $0x58] sm:$0xff]  ;;  %4725 = vmatpush1.bf16.msra.mxu1 %v4039_v60  ;;  %4889 = vmatpush1.bf16.msra.mxu0 %v4041_v33  ;;  %v4047_v7 = vld [vmem:[#allocation2 + $0x40] sm:$0xff]  ;;  %v4049_v48 = vld [vmem:[#allocation2 + $0x50] sm:$0xff] }
 0x761   :  { %4726 = vmatprep.subr.bf16.mxu1 %v4048_v1  ;;  %4890 = vmatprep.subr.bf16.mxu0 %v4050_v39  ;;  %v4056_v4 = vld [vmem:[#allocation2 + $0x88] sm:$0xff]  ;;  %v4058_v5 = vld [vmem:[#allocation2 + $0x98] sm:$0xff]  ;;  %v4055_v15 = vld [vmem:[#allocation2 + $0x80] sm:$0xff]  ;;  %vm7837_vm5 = vmmov 0   ;;  %vm6245_vm6 = vcmask 11264  }
 0x762   :  { %v4666_v34 = vrot.slane %v4634_v25, 7  ;;  %v4668_v55 = vrot.slane %v4642_v32, 6  ;;  %v4670_v63 = vrot.slane %v4650_v31, 5  ;;  %v4057_v18 = vld [vmem:[#allocation2 + $0x90] sm:$0xff]  ;;  %v4064_v41 = vld [vmem:[#allocation2 + $0xc8] sm:$0xff]  ;;  %v4066_v47 = vld [vmem:[#allocation2 + $0xd8] sm:$0xff] }
 0x763   :  { %v4063_v46 = vld [vmem:[#allocation2 + $0xc0] sm:$0xff]  ;;  %v4065_v6 = vld [vmem:[#allocation2 + $0xd0] sm:$0xff]  ;;  %v4072_v62 = vld [vmem:[#allocation2 + $0x108] sm:$0xff] }
 0x764   :  { %v4667_v11 = vsel %vm4658_vm2, %v4666_v34, %v4626_v20  ;;  %4727 = vmatpush1.bf16.msra.mxu1 %v4047_v7  ;;  %4891 = vmatpush1.bf16.msra.mxu0 %v4049_v48  ;;  %v4074_v42 = vld [vmem:[#allocation2 + $0x118] sm:$0xff]  ;;  %v4071_v8 = vld [vmem:[#allocation2 + $0x100] sm:$0xff]  ;;  %v4073_v38 = vld [vmem:[#allocation2 + $0x110] sm:$0xff] }
 0x765   :  { %v4669_v30 = vsel %vm4661_vm3, %v4668_v55, %v4667_v11  ;;  %4728 = vmatprep.subr.bf16.mxu1 %v4056_v4  ;;  %4892 = vmatprep.subr.bf16.mxu0 %v4058_v5  ;;  %v4080_v61 = vld [vmem:[#allocation2 + $0x148] sm:$0xff]  ;;  %v4082_v20 = vld [vmem:[#allocation2 + $0x158] sm:$0xff]  ;;  %v4079_v25 = vld [vmem:[#allocation2 + $0x140] sm:$0xff] }
 0x766   :  { %v4671_v37 = vsel %vm4664_vm4, %v4670_v63, %v4669_v30  ;;  %v4081_v32 = vld [vmem:[#allocation2 + $0x150] sm:$0xff]  ;;  %v4088_v31 = vld [vmem:[#allocation2 + $0x188] sm:$0xff]  ;;  %v4090_v34 = vld [vmem:[#allocation2 + $0x198] sm:$0xff] }
 0x767   :  { %v9040_v56 = vpack.c.b16 %v4671_v37, %v4671_v37  ;;  %v4087_v55 = vld [vmem:[#allocation2 + $0x180] sm:$0xff]  ;;  %v4089_v63 = vld [vmem:[#allocation2 + $0x190] sm:$0xff]  ;;  %v4096_v11 = vld [vmem:[#allocation2 + $0x1c8] sm:$0xff] }
 0x768   :  { %4729 = vmatpush1.bf16.msra.mxu1 %v4055_v15  ;;  %4893 = vmatpush1.bf16.msra.mxu0 %v4057_v18  ;;  %v4098_v51 = vld [vmem:[#allocation2 + $0x1d8] sm:$0xff]  ;;  %v4095_v23 = vld [vmem:[#allocation2 + $0x1c0] sm:$0xff]  ;;  %v4097_v60 = vld [vmem:[#allocation2 + $0x1d0] sm:$0xff] }
 0x769   :  { %4756 = vmatprep.mubr.bf16.mxu1 %v9040_v56  ;;  %4920 = vmatprep.mubr.bf16.mxu0 %v9040_v56  ;;  %v4104_v30 = vld [vmem:[#allocation2 + $0x208] sm:$0xff]  ;;  %v4106_v33 = vld [vmem:[#allocation2 + $0x218] sm:$0xff]  ;;  %v4103_v1 = vld [vmem:[#allocation2 + $0x200] sm:$0xff] }
 0x76a   :  { %4730 = vmatprep.subr.bf16.mxu1 %v4064_v41  ;;  %4894 = vmatprep.subr.bf16.mxu0 %v4066_v47  ;;  %v4105_v39 = vld [vmem:[#allocation2 + $0x210] sm:$0xff]  ;;  %v4112_v37 = vld [vmem:[#allocation2 + $0x248] sm:$0xff]  ;;  %v4114_v7 = vld [vmem:[#allocation2 + $0x258] sm:$0xff] }
 0x76b   :  { %v4111_v48 = vld [vmem:[#allocation2 + $0x240] sm:$0xff]  ;;  %v4113_v4 = vld [vmem:[#allocation2 + $0x250] sm:$0xff]  ;;  %v4120_v5 = vld [vmem:[#allocation2 + $0x288] sm:$0xff] }
 0x76c   :  { %4731 = vmatpush1.bf16.msra.mxu1 %v4063_v46  ;;  %4895 = vmatpush1.bf16.msra.mxu0 %v4065_v6  ;;  %v4122_v15 = vld [vmem:[#allocation2 + $0x298] sm:$0xff]  ;;  %v4119_v18 = vld [vmem:[#allocation2 + $0x280] sm:$0xff]  ;;  %v4121_v41 = vld [vmem:[#allocation2 + $0x290] sm:$0xff]  ;;  %v4015_v6 = vpack.c.bf16 %v8975_v45, %v8975_v45 }
 0x76d   :  { %4732 = vmatprep.subr.bf16.mxu1 %v4072_v62  ;;  %4896 = vmatprep.subr.bf16.mxu0 %v4074_v42  ;;  %v4128_v47 = vld [vmem:[#allocation2 + $0x2c8] sm:$0xff]  ;;  %v4130_v46 = vld [vmem:[#allocation2 + $0x2d8] sm:$0xff]  ;;  %v4127_v62 = vld [vmem:[#allocation2 + $0x2c0] sm:$0xff] }
 0x76e   :  { %v4129_v42 = vld [vmem:[#allocation2 + $0x2d0] sm:$0xff] }
 0x770   :  { %4733 = vmatpush1.bf16.msra.mxu1 %v4071_v8  ;;  %4897 = vmatpush1.bf16.msra.mxu0 %v4073_v38  ;;  %v4023_v8 = vpack.c.bf16 %v8997_v36, %v8997_v36  ;;  %v4018_v38 = vpack.c.bf16 %v8987_v22, %v8987_v22 }
 0x771   :  { %4734 = vmatprep.subr.bf16.mxu1 %v4080_v61  ;;  %4898 = vmatprep.subr.bf16.mxu0 %v4082_v20  ;;  %v4136_v61 = vld [vmem:[#allocation2 + $0x308] sm:$0xff]  ;;  %v4138_v20 = vld [vmem:[#allocation2 + $0x318] sm:$0xff] }
 0x774   :  { %4735 = vmatpush1.bf16.msra.mxu1 %v4079_v25  ;;  %4899 = vmatpush1.bf16.msra.mxu0 %v4081_v32  ;;  %v4007_v25 = vpack.c.bf16 %v8918_v50, %v8918_v50  ;;  %v4633_v32 = vunpack.c.l.b16 %v4015_v6 }
 0x775   :  { %4736 = vmatprep.subr.bf16.mxu1 %v4088_v31  ;;  %4900 = vmatprep.subr.bf16.mxu0 %v4090_v34  ;;  %v4031_v31 = vpack.c.bf16 %v9013_v16, %v9013_v16  ;;  %v4026_v34 = vpack.c.bf16 %v9003_v40, %v9003_v40 }
 0x778   :  { %4737 = vmatpush1.bf16.msra.mxu1 %v4087_v55  ;;  %4901 = vmatpush1.bf16.msra.mxu0 %v4089_v63  ;;  %v4135_v55 = vld [vmem:[#allocation2 + $0x300] sm:$0xff]  ;;  %v4137_v63 = vld [vmem:[#allocation2 + $0x310] sm:$0xff] }
 0x779   :  { %4738 = vmatprep.subr.bf16.mxu1 %v4096_v11  ;;  %4902 = vmatprep.subr.bf16.mxu0 %v4098_v51  ;;  %v4641_v11 = vunpack.c.l.b16 %v4023_v8  ;;  %v4010_v51 = vpack.c.bf16 %v8935_v44, %v8935_v44  ;;  %v4151_v8 = vld [vmem:[#allocation2 + $0x380] sm:$0xff] }
 0x77c   :  { %4739 = vmatpush1.bf16.msra.mxu1 %v4095_v23  ;;  %4903 = vmatpush1.bf16.msra.mxu0 %v4097_v60  ;;  %v4636_v23 = vunpack.c.l.b16 %v4018_v38  ;;  %v4144_v60 = vld [vmem:[#allocation2 + $0x348] sm:$0xff]  ;;  %v4153_v38 = vld [vmem:[#allocation2 + $0x390] sm:$0xff] }
 0x77d   :  { %4740 = vmatprep.subr.bf16.mxu1 %v4104_v30  ;;  %4904 = vmatprep.subr.bf16.mxu0 %v4106_v33  ;;  %v4146_v30 = vld [vmem:[#allocation2 + $0x358] sm:$0xff]  ;;  %v4625_v33 = vunpack.c.l.b16 %v4007_v25  ;;  %v4160_v25 = vld [vmem:[#allocation2 + $0x3c8] sm:$0xff] }
 0x780   :  { %4741 = vmatpush1.bf16.msra.mxu1 %v4103_v1  ;;  %4905 = vmatpush1.bf16.msra.mxu0 %v4105_v39  ;;  %v4657_v1 = vrot.slane %v4633_v32, 7  ;;  %v4034_v39 = vpack.c.bf16 %v9019_v17, %v9019_v17  ;;  %v4162_v32 = vld [vmem:[#allocation2 + $0x3d8] sm:$0xff] }
 0x781   :  { %4742 = vmatprep.subr.bf16.mxu1 %v4112_v37  ;;  %4906 = vmatprep.subr.bf16.mxu0 %v4114_v7  ;;  %v4649_v37 = vunpack.c.l.b16 %v4031_v31  ;;  %v4644_v7 = vunpack.c.l.b16 %v4026_v34 }
 0x782   :  { %v4652_v6 = vunpack.c.l.b16 %v4034_v39  ;;  %v4176_v39 = vld [vmem:[#allocation2 + $0x448] sm:$0xff] }
 0x784   :  { %4743 = vmatpush1.bf16.msra.mxu1 %v4111_v48  ;;  %4907 = vmatpush1.bf16.msra.mxu0 %v4113_v4  ;;  %v4143_v48 = vld [vmem:[#allocation2 + $0x340] sm:$0xff]  ;;  %v4145_v4 = vld [vmem:[#allocation2 + $0x350] sm:$0xff]  ;;  %v4682_v31 = vrot.slane %v4652_v6, 5 }
 0x785   :  { %4744 = vmatprep.subr.bf16.mxu1 %v4120_v5  ;;  %4908 = vmatprep.subr.bf16.mxu0 %v4122_v15  ;;  %v4660_v5 = vrot.slane %v4641_v11, 6  ;;  %v4628_v15 = vunpack.c.l.b16 %v4010_v51  ;;  %v4161_v11 = vld [vmem:[#allocation2 + $0x3d0] sm:$0xff]  ;;  %v4168_v51 = vld [vmem:[#allocation2 + $0x408] sm:$0xff]  ;;  %v4191_v6 = vld [vmem:[#allocation2 + $0x4c0] sm:$0xff] }
 0x788   :  { %4745 = vmatpush1.bf16.msra.mxu1 %v4119_v18  ;;  %4909 = vmatpush1.bf16.msra.mxu0 %v4121_v41  ;;  %v4678_v18 = vrot.slane %v4636_v23, 7  ;;  %v4152_v41 = vld [vmem:[#allocation2 + $0x388] sm:$0xff]  ;;  %v4170_v23 = vld [vmem:[#allocation2 + $0x418] sm:$0xff] }
 0x789   :  { %4746 = vmatprep.subr.bf16.mxu1 %v4128_v47  ;;  %4910 = vmatprep.subr.bf16.mxu0 %v4130_v46  ;;  %v4154_v47 = vld [vmem:[#allocation2 + $0x398] sm:$0xff]  ;;  %v4659_v46 = vsel %vm4658_vm2, %v4657_v1, %v4625_v33  ;;  %v4167_v33 = vld [vmem:[#allocation2 + $0x400] sm:$0xff]  ;;  %v4169_v1 = vld [vmem:[#allocation2 + $0x410] sm:$0xff] }
 0x78c   :  { %4747 = vmatpush1.bf16.msra.mxu1 %v4127_v62  ;;  %4911 = vmatpush1.bf16.msra.mxu0 %v4129_v42  ;;  %v4663_v62 = vrot.slane %v4649_v37, 5  ;;  %v4680_v42 = vrot.slane %v4644_v7, 6  ;;  %v4178_v37 = vld [vmem:[#allocation2 + $0x458] sm:$0xff] }
 0x78d   :  { %4748 = vmatprep.subr.bf16.mxu1 %v4136_v61  ;;  %4912 = vmatprep.subr.bf16.mxu0 %v4138_v20  ;;  %v4662_v61 = vsel %vm4661_vm3, %v4660_v5, %v4659_v46  ;;  %v4679_v20 = vsel %vm4658_vm2, %v4678_v18, %v4628_v15  ;;  %v4184_v5 = vld [vmem:[#allocation2 + $0x488] sm:$0xff]  ;;  %v4186_v15 = vld [vmem:[#allocation2 + $0x498] sm:$0xff]  ;;  %v4183_v18 = vld [vmem:[#allocation2 + $0x480] sm:$0xff] }
 0x78e   :  { %v4665_v34 = vsel %vm4664_vm4, %v4663_v62, %v4662_v61  ;;  %v4194_v46 = vld [vmem:[#allocation2 + $0x4d8] sm:$0xff]  ;;  %v4193_v62 = vld [vmem:[#allocation2 + $0x4d0] sm:$0xff] }
 0x78f   :  { %v4201_v61 = vld [vmem:[#allocation2 + $0x510] sm:$0xff] }
 0x790   :  { %4749 = vmatpush1.bf16.msra.mxu1 %v4135_v55  ;;  %4913 = vmatpush1.bf16.msra.mxu0 %v4137_v63  ;;  %v4681_v55 = vsel %vm4661_vm3, %v4680_v42, %v4679_v20  ;;  %v4159_v63 = vld [vmem:[#allocation2 + $0x3c0] sm:$0xff]  ;;  %v4200_v42 = vld [vmem:[#allocation2 + $0x508] sm:$0xff] }
 0x791   :  { %4750 = vmatprep.subr.bf16.mxu1 %v4144_v60  ;;  %4914 = vmatprep.subr.bf16.mxu0 %v4146_v30  ;;  %v9065_v60 = vpack.c.b16 %v4665_v34, %v4665_v34  ;;  %v4683_v30 = vsel %vm4664_vm4, %v4682_v31, %v4681_v55  ;;  %v4208_v20 = vld [vmem:[#allocation2 + $0x548] sm:$0xff]  ;;  %v4209_v31 = vld [vmem:[#allocation2 + $0x550] sm:$0xff]  ;;  %v4218_v55 = vld [vmem:[#allocation2 + $0x598] sm:$0xff] }
 0x792   :  { %v9068_v7 = vpack.c.b16 %v4683_v30, %v4683_v30  ;;  %v4216_v34 = vld [vmem:[#allocation2 + $0x588] sm:$0xff]  ;;  %v4223_v30 = vld [vmem:[#allocation2 + $0x5c0] sm:$0xff] }
 0x794   :  { %4751 = vmatpush1.bf16.msra.mxu1 %v4143_v48  ;;  %4915 = vmatpush1.bf16.msra.mxu0 %v4145_v4  ;;  %v4175_v48 = vld [vmem:[#allocation2 + $0x440] sm:$0xff]  ;;  %v4177_v4 = vld [vmem:[#allocation2 + $0x450] sm:$0xff] }
 0x795   :  { %4752 = vmatprep.subr.bf16.mxu1 %v4152_v41  ;;  %4916 = vmatprep.subr.bf16.mxu0 %v4154_v47  ;;  %v4185_v41 = vld [vmem:[#allocation2 + $0x490] sm:$0xff]  ;;  %v4192_v47 = vld [vmem:[#allocation2 + $0x4c8] sm:$0xff] }
 0x798   :  { %4753 = vmatpush1.bf16.msra.mxu1 %v4151_v8  ;;  %4917 = vmatpush1.bf16.msra.mxu0 %v4153_v38  ;;  %v4202_v8 = vld [vmem:[#allocation2 + $0x518] sm:$0xff]  ;;  %v4199_v38 = vld [vmem:[#allocation2 + $0x500] sm:$0xff] }
 0x799   :  { %4754 = vmatprep.subr.bf16.mxu1 %v4160_v25  ;;  %4918 = vmatprep.subr.bf16.mxu0 %v4162_v32  ;;  %v4210_v25 = vld [vmem:[#allocation2 + $0x558] sm:$0xff]  ;;  %v4207_v32 = vld [vmem:[#allocation2 + $0x540] sm:$0xff] }
 0x79c   :  { %4755 = vmatpush1.bf16.msra.mxu1 %v4159_v63  ;;  %4919 = vmatpush1.bf16.msra.mxu0 %v4161_v11  ;;  %v4215_v63 = vld [vmem:[#allocation2 + $0x580] sm:$0xff]  ;;  %v4217_v11 = vld [vmem:[#allocation2 + $0x590] sm:$0xff] }
 0x79d   :  { %4765 = vmatprep.subr.bf16.mxu1 %v4168_v51  ;;  %4929 = vmatprep.subr.bf16.mxu0 %v4170_v23  ;;  %v4224_v51 = vld [vmem:[#allocation2 + $0x5c8] sm:$0xff]  ;;  %v4226_v23 = vld [vmem:[#allocation2 + $0x5d8] sm:$0xff] }
 0x79f   :  { %4757 = vmatmul.mubr.bf16.vlgmr.msra.gmra.mrb[96].mxu1 %v9065_v60  ;;  %4921 = vmatmul.mubr.bf16.vlgmr.msra.gmra.mrb[64].mxu0 %v9065_v60 }
 0x7a0   :  { %4766 = vmatpush1.bf16.msra.mxu1 %v4167_v33  ;;  %4930 = vmatpush1.bf16.msra.mxu0 %v4169_v1  ;;  %v4225_v33 = vld [vmem:[#allocation2 + $0x5d0] sm:$0xff]  ;;  %v4232_v1 = vld [vmem:[#allocation2 + $0x608] sm:$0xff] }
 0x7a1   :  { %4767 = vmatprep.subr.bf16.mxu1 %v4176_v39  ;;  %4931 = vmatprep.subr.bf16.mxu0 %v4178_v37  ;;  %v4234_v39 = vld [vmem:[#allocation2 + $0x618] sm:$0xff]  ;;  %v4231_v37 = vld [vmem:[#allocation2 + $0x600] sm:$0xff] }
 0x7a2   :  { %4797 = vmatprep.mubr.bf16.mxu1 %v9068_v7  ;;  %4961 = vmatprep.mubr.bf16.mxu0 %v9068_v7 }
 0x7a4   :  { %4768 = vmatpush1.bf16.msra.mxu1 %v4175_v48  ;;  %4932 = vmatpush1.bf16.msra.mxu0 %v4177_v4  ;;  %v4233_v48 = vld [vmem:[#allocation2 + $0x610] sm:$0xff]  ;;  %v4240_v4 = vld [vmem:[#allocation2 + $0x648] sm:$0xff] }
 0x7a5   :  { %4769 = vmatprep.subr.bf16.mxu1 %v4184_v5  ;;  %4933 = vmatprep.subr.bf16.mxu0 %v4186_v15  ;;  %v4242_v5 = vld [vmem:[#allocation2 + $0x658] sm:$0xff]  ;;  %v4239_v15 = vld [vmem:[#allocation2 + $0x640] sm:$0xff] }
 0x7a8   :  { %4770 = vmatpush1.bf16.msra.mxu1 %v4183_v18  ;;  %4934 = vmatpush1.bf16.msra.mxu0 %v4185_v41  ;;  %v4241_v18 = vld [vmem:[#allocation2 + $0x650] sm:$0xff]  ;;  %v4248_v41 = vld [vmem:[#allocation2 + $0x688] sm:$0xff] }
 0x7a9   :  { %4771 = vmatprep.subr.bf16.mxu1 %v4192_v47  ;;  %4935 = vmatprep.subr.bf16.mxu0 %v4194_v46  ;;  %v4250_v47 = vld [vmem:[#allocation2 + $0x698] sm:$0xff]  ;;  %v4247_v46 = vld [vmem:[#allocation2 + $0x680] sm:$0xff] }
 0x7ac   :  { %4772 = vmatpush1.bf16.msra.mxu1 %v4191_v6  ;;  %4936 = vmatpush1.bf16.msra.mxu0 %v4193_v62  ;;  %v4249_v6 = vld [vmem:[#allocation2 + $0x690] sm:$0xff]  ;;  %v4256_v62 = vld [vmem:[#allocation2 + $0x6c8] sm:$0xff] }
 0x7ad   :  { %4773 = vmatprep.subr.bf16.mxu1 %v4200_v42  ;;  %4937 = vmatprep.subr.bf16.mxu0 %v4202_v8  ;;  %v4258_v42 = vld [vmem:[#allocation2 + $0x6d8] sm:$0xff]  ;;  %v4017_v8 = vpack.c.bf16 %v8985_v21, %v8985_v21 }
 0x7b0   :  { %4774 = vmatpush1.bf16.msra.mxu1 %v4199_v38  ;;  %4938 = vmatpush1.bf16.msra.mxu0 %v4201_v61  ;;  %v4255_v38 = vld [vmem:[#allocation2 + $0x6c0] sm:$0xff]  ;;  %v4257_v61 = vld [vmem:[#allocation2 + $0x6d0] sm:$0xff] }
 0x7b1   :  { %4775 = vmatprep.subr.bf16.mxu1 %v4208_v20  ;;  %4939 = vmatprep.subr.bf16.mxu0 %v4210_v25  ;;  %v4264_v20 = vld [vmem:[#allocation2 + $0x708] sm:$0xff]  ;;  %v4266_v25 = vld [vmem:[#allocation2 + $0x718] sm:$0xff] }
 0x7b4   :  { %4776 = vmatpush1.bf16.msra.mxu1 %v4207_v32  ;;  %4940 = vmatpush1.bf16.msra.mxu0 %v4209_v31  ;;  %v4025_v32 = vpack.c.bf16 %v9001_v2, %v9001_v2  ;;  %v4635_v31 = vunpack.c.l.b16 %v4017_v8 }
 0x7b5   :  { %4777 = vmatprep.subr.bf16.mxu1 %v4216_v34  ;;  %4941 = vmatprep.subr.bf16.mxu0 %v4218_v55  ;;  %v4020_v34 = vpack.c.bf16 %v8991_v29, %v8991_v29  ;;  %v4009_v55 = vpack.c.bf16 %v8932_v24, %v8932_v24 }
 0x7b8   :  { %4778 = vmatpush1.bf16.msra.mxu1 %v4215_v63  ;;  %4942 = vmatpush1.bf16.msra.mxu0 %v4217_v11  ;;  %v4263_v63 = vld [vmem:[#allocation2 + $0x700] sm:$0xff]  ;;  %v4033_v11 = vpack.c.bf16 %v9017_v57, %v9017_v57 }
 0x7b9   :  { %4779 = vmatprep.subr.bf16.mxu1 %v4224_v51  ;;  %4943 = vmatprep.subr.bf16.mxu0 %v4226_v23  ;;  %v4265_v51 = vld [vmem:[#allocation2 + $0x710] sm:$0xff]  ;;  %v4028_v23 = vpack.c.bf16 %v9007_v54, %v9007_v54 }
 0x7bc   :  { %4780 = vmatpush1.bf16.msra.mxu1 %v4223_v30  ;;  %4944 = vmatpush1.bf16.msra.mxu0 %v4225_v33  ;;  %v4272_v30 = vld [vmem:[#allocation2 + $0x748] sm:$0xff]  ;;  %v4274_v33 = vld [vmem:[#allocation2 + $0x758] sm:$0xff] }
 0x7bd   :  { %4781 = vmatprep.subr.bf16.mxu1 %v4232_v1  ;;  %4945 = vmatprep.subr.bf16.mxu0 %v4234_v39  ;;  %v4643_v1 = vunpack.c.l.b16 %v4025_v32  ;;  %v4672_v39 = vrot.slane %v4635_v31, 7  ;;  %v4281_v32 = vld [vmem:[#allocation2 + $0x790] sm:$0xff] }
 0x7c0   :  { %4782 = vmatpush1.bf16.msra.mxu1 %v4231_v37  ;;  %4946 = vmatpush1.bf16.msra.mxu0 %v4233_v48  ;;  %v4012_v37 = vpack.c.bf16 %v8950_v13, %v8950_v13  ;;  %v4638_v48 = vunpack.c.l.b16 %v4020_v34  ;;  %v4288_v34 = vld [vmem:[#allocation2 + $0x7c8] sm:$0xff] }
 0x7c1   :  { %4783 = vmatprep.subr.bf16.mxu1 %v4240_v4  ;;  %4947 = vmatprep.subr.bf16.mxu0 %v4242_v5  ;;  %v4627_v4 = vunpack.c.l.b16 %v4009_v55  ;;  %v4271_v5 = vld [vmem:[#allocation2 + $0x740] sm:$0xff]  ;;  %v4290_v55 = vld [vmem:[#allocation2 + $0x7d8] sm:$0xff] }
 0x7c2   :  { %v4690_v8 = vrot.slane %v4638_v48, 7 }
 0x7c4   :  { %4784 = vmatpush1.bf16.msra.mxu1 %v4239_v15  ;;  %4948 = vmatpush1.bf16.msra.mxu0 %v4241_v18  ;;  %v4651_v15 = vunpack.c.l.b16 %v4033_v11  ;;  %v4036_v18 = vpack.c.bf16 %v9023_v27, %v9023_v27 }
 0x7c5   :  { %4785 = vmatprep.subr.bf16.mxu1 %v4248_v41  ;;  %4949 = vmatprep.subr.bf16.mxu0 %v4250_v47  ;;  %v4273_v41 = vld [vmem:[#allocation2 + $0x750] sm:$0xff]  ;;  %v4646_v47 = vunpack.c.l.b16 %v4028_v23  ;;  %v4287_v23 = vld [vmem:[#allocation2 + $0x7c0] sm:$0xff] }
 0x7c7   :  { %v4692_v31 = vrot.slane %v4646_v47, 6 }
 0x7c8   :  { %4786 = vmatpush1.bf16.msra.mxu1 %v4247_v46  ;;  %4950 = vmatpush1.bf16.msra.mxu0 %v4249_v6  ;;  %v4280_v46 = vld [vmem:[#allocation2 + $0x788] sm:$0xff]  ;;  %v4282_v6 = vld [vmem:[#allocation2 + $0x798] sm:$0xff] }
 0x7c9   :  { %4787 = vmatprep.subr.bf16.mxu1 %v4256_v62  ;;  %4951 = vmatprep.subr.bf16.mxu0 %v4258_v42  ;;  %v4674_v62 = vrot.slane %v4643_v1, 6  ;;  %v4630_v42 = vunpack.c.l.b16 %v4012_v37  ;;  %v4289_v1 = vld [vmem:[#allocation2 + $0x7d0] sm:$0xff]  ;;  %v4298_v37 = vld [vmem:[#allocation2 + $0x818] sm:$0xff] }
 0x7cb   :  { %v4691_v11 = vsel %vm4658_vm2, %v4690_v8, %v4630_v42  ;;  %v4314_v42 = vld [vmem:[#allocation2 + $0x898] sm:$0xff]  ;;  %v4311_v8 = vld [vmem:[#allocation2 + $0x880] sm:$0xff] }
 0x7cc   :  { %4788 = vmatpush1.bf16.msra.mxu1 %v4255_v38  ;;  %4952 = vmatpush1.bf16.msra.mxu0 %v4257_v61  ;;  %v4673_v38 = vsel %vm4658_vm2, %v4672_v39, %v4627_v4  ;;  %v4279_v61 = vld [vmem:[#allocation2 + $0x780] sm:$0xff]  ;;  %v4296_v39 = vld [vmem:[#allocation2 + $0x808] sm:$0xff] }
 0x7cd   :  { %4789 = vmatprep.subr.bf16.mxu1 %v4264_v20  ;;  %4953 = vmatprep.subr.bf16.mxu0 %v4266_v25  ;;  %v4676_v20 = vrot.slane %v4651_v15, 5  ;;  %v4654_v25 = vunpack.c.l.b16 %v4036_v18  ;;  %v4295_v4 = vld [vmem:[#allocation2 + $0x800] sm:$0xff]  ;;  %v4304_v18 = vld [vmem:[#allocation2 + $0x848] sm:$0xff] }
 0x7d0   :  { %4790 = vmatpush1.bf16.msra.mxu1 %v4263_v63  ;;  %4954 = vmatpush1.bf16.msra.mxu0 %v4265_v51  ;;  %v4675_v63 = vsel %vm4661_vm3, %v4674_v62, %v4673_v38  ;;  %v4694_v51 = vrot.slane %v4654_v25, 5  ;;  %v4312_v62 = vld [vmem:[#allocation2 + $0x888] sm:$0xff]  ;;  %v4313_v38 = vld [vmem:[#allocation2 + $0x890] sm:$0xff]  ;;  %v4319_v25 = vld [vmem:[#allocation2 + $0x8c0] sm:$0xff] }
 0x7d1   :  { %4791 = vmatprep.subr.bf16.mxu1 %v4272_v30  ;;  %4955 = vmatprep.subr.bf16.mxu0 %v4274_v33  ;;  %v4677_v30 = vsel %vm4664_vm4, %v4676_v20, %v4675_v63  ;;  %v4693_v33 = vsel %vm4661_vm3, %v4692_v31, %v4691_v11  ;;  %v4322_v20 = vld [vmem:[#allocation2 + $0x8d8] sm:$0xff]  ;;  %v4328_v31 = vld [vmem:[#allocation2 + $0x908] sm:$0xff]  ;;  %v4329_v63 = vld [vmem:[#allocation2 + $0x910] sm:$0xff] }
 0x7d2   :  { %v9095_v48 = vpack.c.b16 %v4677_v30, %v4677_v30  ;;  %v4695_v15 = vsel %vm4664_vm4, %v4694_v51, %v4693_v33  ;;  %v4336_v11 = vld [vmem:[#allocation2 + $0x948] sm:$0xff]  ;;  %v4338_v51 = vld [vmem:[#allocation2 + $0x958] sm:$0xff]  ;;  %v4337_v30 = vld [vmem:[#allocation2 + $0x950] sm:$0xff] }
 0x7d3   :  { %v9098_v47 = vpack.c.b16 %v4695_v15, %v4695_v15  ;;  %v4344_v33 = vld [vmem:[#allocation2 + $0x988] sm:$0xff]  ;;  %v4351_v15 = vld [vmem:[#allocation2 + $0x9c0] sm:$0xff] }
 0x7d4   :  { %4792 = vmatpush1.bf16.msra.mxu1 %v4271_v5  ;;  %4956 = vmatpush1.bf16.msra.mxu0 %v4273_v41  ;;  %v4297_v5 = vld [vmem:[#allocation2 + $0x810] sm:$0xff]  ;;  %v4306_v41 = vld [vmem:[#allocation2 + $0x858] sm:$0xff] }
 0x7d5   :  { %4793 = vmatprep.subr.bf16.mxu1 %v4280_v46  ;;  %4957 = vmatprep.subr.bf16.mxu0 %v4282_v6  ;;  %v4303_v46 = vld [vmem:[#allocation2 + $0x840] sm:$0xff]  ;;  %v4305_v6 = vld [vmem:[#allocation2 + $0x850] sm:$0xff] }
 0x7d8   :  { %4794 = vmatpush1.bf16.msra.mxu1 %v4279_v61  ;;  %4958 = vmatpush1.bf16.msra.mxu0 %v4281_v32  ;;  %v4320_v61 = vld [vmem:[#allocation2 + $0x8c8] sm:$0xff]  ;;  %v4321_v32 = vld [vmem:[#allocation2 + $0x8d0] sm:$0xff] }
 0x7d9   :  { %4795 = vmatprep.subr.bf16.mxu1 %v4288_v34  ;;  %4959 = vmatprep.subr.bf16.mxu0 %v4290_v55  ;;  %v4330_v34 = vld [vmem:[#allocation2 + $0x918] sm:$0xff]  ;;  %v4327_v55 = vld [vmem:[#allocation2 + $0x900] sm:$0xff] }
 0x7dc   :  { %4796 = vmatpush1.bf16.msra.mxu1 %v4287_v23  ;;  %4960 = vmatpush1.bf16.msra.mxu0 %v4289_v1  ;;  %v4335_v23 = vld [vmem:[#allocation2 + $0x940] sm:$0xff]  ;;  %v4346_v1 = vld [vmem:[#allocation2 + $0x998] sm:$0xff] }
 0x7dd   :  { %4806 = vmatprep.subr.bf16.mxu1 %v4296_v39  ;;  %4970 = vmatprep.subr.bf16.mxu0 %v4298_v37  ;;  %v4343_v39 = vld [vmem:[#allocation2 + $0x980] sm:$0xff]  ;;  %v4345_v37 = vld [vmem:[#allocation2 + $0x990] sm:$0xff] }
 0x7df   :  { %4798 = vmatmul.mubr.bf16.vlgmr.msra.gmra.mrb[96].mxu1 %v9095_v48  ;;  %4962 = vmatmul.mubr.bf16.vlgmr.msra.gmra.mrb[64].mxu0 %v9095_v48 }
 0x7e0   :  { %4807 = vmatpush1.bf16.msra.mxu1 %v4295_v4  ;;  %4971 = vmatpush1.bf16.msra.mxu0 %v4297_v5  ;;  %v4352_v4 = vld [vmem:[#allocation2 + $0x9c8] sm:$0xff]  ;;  %v4354_v5 = vld [vmem:[#allocation2 + $0x9d8] sm:$0xff] }
 0x7e1   :  { %4808 = vmatprep.subr.bf16.mxu1 %v4304_v18  ;;  %4972 = vmatprep.subr.bf16.mxu0 %v4306_v41  ;;  %v4353_v18 = vld [vmem:[#allocation2 + $0x9d0] sm:$0xff]  ;;  %v4360_v41 = vld [vmem:[#allocation2 + $0xa08] sm:$0xff] }
 0x7e2   :  { %4838 = vmatprep.mubr.bf16.mxu1 %v9098_v47  ;;  %5002 = vmatprep.mubr.bf16.mxu0 %v9098_v47 }
 0x7e4   :  { %4809 = vmatpush1.bf16.msra.mxu1 %v4303_v46  ;;  %4973 = vmatpush1.bf16.msra.mxu0 %v4305_v6  ;;  %v4362_v46 = vld [vmem:[#allocation2 + $0xa18] sm:$0xff]  ;;  %v4359_v6 = vld [vmem:[#allocation2 + $0xa00] sm:$0xff] }
 0x7e5   :  { %4810 = vmatprep.subr.bf16.mxu1 %v4312_v62  ;;  %4974 = vmatprep.subr.bf16.mxu0 %v4314_v42  ;;  %v4361_v62 = vld [vmem:[#allocation2 + $0xa10] sm:$0xff]  ;;  %v4368_v42 = vld [vmem:[#allocation2 + $0xa48] sm:$0xff] }
 0x7e8   :  { %4811 = vmatpush1.bf16.msra.mxu1 %v4311_v8  ;;  %4975 = vmatpush1.bf16.msra.mxu0 %v4313_v38  ;;  %v4370_v8 = vld [vmem:[#allocation2 + $0xa58] sm:$0xff]  ;;  %v4367_v38 = vld [vmem:[#allocation2 + $0xa40] sm:$0xff] }
 0x7e9   :  { %4812 = vmatprep.subr.bf16.mxu1 %v4320_v61  ;;  %4976 = vmatprep.subr.bf16.mxu0 %v4322_v20  ;;  %v4369_v61 = vld [vmem:[#allocation2 + $0xa50] sm:$0xff]  ;;  %v4376_v20 = vld [vmem:[#allocation2 + $0xa88] sm:$0xff] }
 0x7ec   :  { %4813 = vmatpush1.bf16.msra.mxu1 %v4319_v25  ;;  %4977 = vmatpush1.bf16.msra.mxu0 %v4321_v32  ;;  %v4378_v25 = vld [vmem:[#allocation2 + $0xa98] sm:$0xff]  ;;  %v4375_v32 = vld [vmem:[#allocation2 + $0xa80] sm:$0xff] }
 0x7ed   :  { %4814 = vmatprep.subr.bf16.mxu1 %v4328_v31  ;;  %4978 = vmatprep.subr.bf16.mxu0 %v4330_v34  ;;  %v4377_v31 = vld [vmem:[#allocation2 + $0xa90] sm:$0xff]  ;;  %v4384_v34 = vld [vmem:[#allocation2 + $0xac8] sm:$0xff] }
 0x7f0   :  { %4815 = vmatpush1.bf16.msra.mxu1 %v4327_v55  ;;  %4979 = vmatpush1.bf16.msra.mxu0 %v4329_v63  ;;  %v4386_v55 = vld [vmem:[#allocation2 + $0xad8] sm:$0xff]  ;;  %v4019_v63 = vpack.c.bf16 %v8989_v35, %v8989_v35 }
 0x7f1   :  { %4816 = vmatprep.subr.bf16.mxu1 %v4336_v11  ;;  %4980 = vmatprep.subr.bf16.mxu0 %v4338_v51  ;;  %v4383_v11 = vld [vmem:[#allocation2 + $0xac0] sm:$0xff]  ;;  %v4385_v51 = vld [vmem:[#allocation2 + $0xad0] sm:$0xff] }
 0x7f4   :  { %4817 = vmatpush1.bf16.msra.mxu1 %v4335_v23  ;;  %4981 = vmatpush1.bf16.msra.mxu0 %v4337_v30  ;;  %v4027_v23 = vpack.c.bf16 %v9005_v59, %v9005_v59  ;;  %v4022_v30 = vpack.c.bf16 %v8995_v26, %v8995_v26 }
 0x7f5   :  { %4818 = vmatprep.subr.bf16.mxu1 %v4344_v33  ;;  %4982 = vmatprep.subr.bf16.mxu0 %v4346_v1  ;;  %v4392_v33 = vld [vmem:[#allocation2 + $0xb08] sm:$0xff]  ;;  %v4394_v1 = vld [vmem:[#allocation2 + $0xb18] sm:$0xff] }
 0x7f8   :  { %4819 = vmatpush1.bf16.msra.mxu1 %v4343_v39  ;;  %4983 = vmatpush1.bf16.msra.mxu0 %v4345_v37  ;;  %v4011_v39 = vpack.c.bf16 %v8947_v53, %v8947_v53  ;;  %v4637_v37 = vunpack.c.l.b16 %v4019_v63 }
 0x7f9   :  { %4820 = vmatprep.subr.bf16.mxu1 %v4352_v4  ;;  %4984 = vmatprep.subr.bf16.mxu0 %v4354_v5  ;;  %v4035_v4 = vpack.c.bf16 %v9021_v43, %v9021_v43  ;;  %v4030_v5 = vpack.c.bf16 %v9011_v14, %v9011_v14 }
 0x7fc   :  { %4821 = vmatpush1.bf16.msra.mxu1 %v4351_v15  ;;  %4985 = vmatpush1.bf16.msra.mxu0 %v4353_v18  ;;  %v4391_v15 = vld [vmem:[#allocation2 + $0xb00] sm:$0xff]  ;;  %v4393_v18 = vld [vmem:[#allocation2 + $0xb10] sm:$0xff] }
 0x7fd   :  { %4822 = vmatprep.subr.bf16.mxu1 %v4360_v41  ;;  %4986 = vmatprep.subr.bf16.mxu0 %v4362_v46  ;;  %v4645_v41 = vunpack.c.l.b16 %v4027_v23  ;;  %v4014_v46 = vpack.c.bf16 %v8964_v49, %v8964_v49 }
 0x800   :  { %4823 = vmatpush1.bf16.msra.mxu1 %v4359_v6  ;;  %4987 = vmatpush1.bf16.msra.mxu0 %v4361_v62  ;;  %v4640_v6 = vunpack.c.l.b16 %v4022_v30  ;;  %v4400_v62 = vld [vmem:[#allocation2 + $0xb48] sm:$0xff] }
 0x801   :  { %4824 = vmatprep.subr.bf16.mxu1 %v4368_v42  ;;  %4988 = vmatprep.subr.bf16.mxu0 %v4370_v8  ;;  %v4402_v42 = vld [vmem:[#allocation2 + $0xb58] sm:$0xff]  ;;  %v4629_v8 = vunpack.c.l.b16 %v4011_v39  ;;  %v4407_v39 = vld [vmem:[#allocation2 + $0xb80] sm:$0xff] }
 0x802   :  { %v4702_v63 = vrot.slane %v4640_v6, 7 }
 0x804   :  { %4825 = vmatpush1.bf16.msra.mxu1 %v4367_v38  ;;  %4989 = vmatpush1.bf16.msra.mxu0 %v4369_v61  ;;  %v4684_v38 = vrot.slane %v4637_v37, 7  ;;  %v4038_v61 = vpack.c.bf16 %v9027_v3, %v9027_v3  ;;  %v4409_v37 = vld [vmem:[#allocation2 + $0xb90] sm:$0xff] }
 0x805   :  { %4826 = vmatprep.subr.bf16.mxu1 %v4376_v20  ;;  %4990 = vmatprep.subr.bf16.mxu0 %v4378_v25  ;;  %v4653_v20 = vunpack.c.l.b16 %v4035_v4  ;;  %v4648_v25 = vunpack.c.l.b16 %v4030_v5 }
 0x806   :  { %v4685_v23 = vsel %vm4658_vm2, %v4684_v38, %v4629_v8  ;;  %v4656_v30 = vunpack.c.l.b16 %v4038_v61  ;;  %v4424_v8 = vld [vmem:[#allocation2 + $0xc08] sm:$0xff]  ;;  %v4426_v38 = vld [vmem:[#allocation2 + $0xc18] sm:$0xff] }
 0x808   :  { %4827 = vmatpush1.bf16.msra.mxu1 %v4375_v32  ;;  %4991 = vmatpush1.bf16.msra.mxu0 %v4377_v31  ;;  %v4399_v32 = vld [vmem:[#allocation2 + $0xb40] sm:$0xff]  ;;  %v4401_v31 = vld [vmem:[#allocation2 + $0xb50] sm:$0xff] }
 0x809   :  { %4828 = vmatprep.subr.bf16.mxu1 %v4384_v34  ;;  %4992 = vmatprep.subr.bf16.mxu0 %v4386_v55  ;;  %v4686_v34 = vrot.slane %v4645_v41, 6  ;;  %v4632_v55 = vunpack.c.l.b16 %v4014_v46  ;;  %v4706_v41 = vrot.slane %v4656_v30, 5  ;;  %v4439_v30 = vld [vmem:[#allocation2 + $0xc80] sm:$0xff] }
 0x80b   :  { %v4687_v4 = vsel %vm4661_vm3, %v4686_v34, %v4685_v23  ;;  %v4703_v5 = vsel %vm4658_vm2, %v4702_v63, %v4632_v55  ;;  %v4434_v34 = vld [vmem:[#allocation2 + $0xc58] sm:$0xff]  ;;  %v4431_v63 = vld [vmem:[#allocation2 + $0xc40] sm:$0xff] }
 0x80c   :  { %4829 = vmatpush1.bf16.msra.mxu1 %v4383_v11  ;;  %4993 = vmatpush1.bf16.msra.mxu0 %v4385_v51  ;;  %v4408_v11 = vld [vmem:[#allocation2 + $0xb88] sm:$0xff]  ;;  %v4410_v51 = vld [vmem:[#allocation2 + $0xb98] sm:$0xff] }
 0x80d   :  { %4830 = vmatprep.subr.bf16.mxu1 %v4392_v33  ;;  %4994 = vmatprep.subr.bf16.mxu0 %v4394_v1  ;;  %v4688_v33 = vrot.slane %v4653_v20, 5  ;;  %v4704_v1 = vrot.slane %v4648_v25, 6  ;;  %v4423_v25 = vld [vmem:[#allocation2 + $0xc00] sm:$0xff]  ;;  %v4442_v23 = vld [vmem:[#allocation2 + $0xc98] sm:$0xff] }
 0x80f   :  { %v4689_v46 = vsel %vm4664_vm4, %v4688_v33, %v4687_v4  ;;  %v4705_v6 = vsel %vm4661_vm3, %v4704_v1, %v4703_v5  ;;  %v4441_v33 = vld [vmem:[#allocation2 + $0xc90] sm:$0xff]  ;;  %v4448_v1 = vld [vmem:[#allocation2 + $0xcc8] sm:$0xff] }
 0x810   :  { %4831 = vmatpush1.bf16.msra.mxu1 %v4391_v15  ;;  %4995 = vmatpush1.bf16.msra.mxu0 %v4393_v18  ;;  %v4416_v15 = vld [vmem:[#allocation2 + $0xbc8] sm:$0xff]  ;;  %v4418_v18 = vld [vmem:[#allocation2 + $0xbd8] sm:$0xff]  ;;  %v9125_v61 = vpack.c.b16 %v4689_v46, %v4689_v46  ;;  %v4707_v20 = vsel %vm4664_vm4, %v4706_v41, %v4705_v6  ;;  %v4449_v4 = vld [vmem:[#allocation2 + $0xcd0] sm:$0xff] }
 0x811   :  { %4832 = vmatprep.subr.bf16.mxu1 %v4400_v62  ;;  %4996 = vmatprep.subr.bf16.mxu0 %v4402_v42  ;;  %v4415_v62 = vld [vmem:[#allocation2 + $0xbc0] sm:$0xff]  ;;  %v4417_v42 = vld [vmem:[#allocation2 + $0xbd0] sm:$0xff]  ;;  %v9128_v55 = vpack.c.b16 %v4707_v20, %v4707_v20  ;;  %v4456_v5 = vld [vmem:[#allocation2 + $0xd08] sm:$0xff] }
 0x812   :  { %v4457_v41 = vld [vmem:[#allocation2 + $0xd10] sm:$0xff]  ;;  %v4464_v46 = vld [vmem:[#allocation2 + $0xd48] sm:$0xff]  ;;  %v4466_v6 = vld [vmem:[#allocation2 + $0xd58] sm:$0xff] }
 0x813   :  { %v4471_v20 = vld [vmem:[#allocation2 + $0xd80] sm:$0xff] }
 0x814   :  { %4833 = vmatpush1.bf16.msra.mxu1 %v4399_v32  ;;  %4997 = vmatpush1.bf16.msra.mxu0 %v4401_v31  ;;  %v4425_v32 = vld [vmem:[#allocation2 + $0xc10] sm:$0xff]  ;;  %v4432_v31 = vld [vmem:[#allocation2 + $0xc48] sm:$0xff] }
 0x815   :  { %4834 = vmatprep.subr.bf16.mxu1 %v4408_v11  ;;  %4998 = vmatprep.subr.bf16.mxu0 %v4410_v51  ;;  %v4433_v11 = vld [vmem:[#allocation2 + $0xc50] sm:$0xff]  ;;  %v4440_v51 = vld [vmem:[#allocation2 + $0xc88] sm:$0xff] }
 0x818   :  { %4835 = vmatpush1.bf16.msra.mxu1 %v4407_v39  ;;  %4999 = vmatpush1.bf16.msra.mxu0 %v4409_v37  ;;  %v4450_v39 = vld [vmem:[#allocation2 + $0xcd8] sm:$0xff]  ;;  %v4447_v37 = vld [vmem:[#allocation2 + $0xcc0] sm:$0xff] }
 0x819   :  { %4836 = vmatprep.subr.bf16.mxu1 %v4416_v15  ;;  %5000 = vmatprep.subr.bf16.mxu0 %v4418_v18  ;;  %v4458_v15 = vld [vmem:[#allocation2 + $0xd18] sm:$0xff]  ;;  %v4455_v18 = vld [vmem:[#allocation2 + $0xd00] sm:$0xff] }
 0x81c   :  { %4837 = vmatpush1.bf16.msra.mxu1 %v4415_v62  ;;  %5001 = vmatpush1.bf16.msra.mxu0 %v4417_v42  ;;  %v4463_v62 = vld [vmem:[#allocation2 + $0xd40] sm:$0xff]  ;;  %v4465_v42 = vld [vmem:[#allocation2 + $0xd50] sm:$0xff] }
 0x81d   :  { %4847 = vmatprep.subr.bf16.mxu1 %v4424_v8  ;;  %5011 = vmatprep.subr.bf16.mxu0 %v4426_v38  ;;  %v4472_v8 = vld [vmem:[#allocation2 + $0xd88] sm:$0xff]  ;;  %v4474_v38 = vld [vmem:[#allocation2 + $0xd98] sm:$0xff] }
 0x81f   :  { %4839 = vmatmul.mubr.bf16.vlgmr.msra.gmra.mrb[96].mxu1 %v9125_v61  ;;  %5003 = vmatmul.mubr.bf16.vlgmr.msra.gmra.mrb[64].mxu0 %v9125_v61 }
 0x820   :  { %4848 = vmatpush1.bf16.msra.mxu1 %v4423_v25  ;;  %5012 = vmatpush1.bf16.msra.mxu0 %v4425_v32  ;;  %v4473_v25 = vld [vmem:[#allocation2 + $0xd90] sm:$0xff]  ;;  %v4480_v32 = vld [vmem:[#allocation2 + $0xdc8] sm:$0xff] }
 0x821   :  { %4849 = vmatprep.subr.bf16.mxu1 %v4432_v31  ;;  %5013 = vmatprep.subr.bf16.mxu0 %v4434_v34  ;;  %v4482_v31 = vld [vmem:[#allocation2 + $0xdd8] sm:$0xff]  ;;  %v4479_v34 = vld [vmem:[#allocation2 + $0xdc0] sm:$0xff] }
 0x822   :  { %4879 = vmatprep.mubr.bf16.mxu1 %v9128_v55  ;;  %5043 = vmatprep.mubr.bf16.mxu0 %v9128_v55 }
 0x824   :  { %4850 = vmatpush1.bf16.msra.mxu1 %v4431_v63  ;;  %5014 = vmatpush1.bf16.msra.mxu0 %v4433_v11  ;;  %v4481_v63 = vld [vmem:[#allocation2 + $0xdd0] sm:$0xff]  ;;  %v4488_v11 = vld [vmem:[#allocation2 + $0xe08] sm:$0xff] }
 0x825   :  { %4851 = vmatprep.subr.bf16.mxu1 %v4440_v51  ;;  %5015 = vmatprep.subr.bf16.mxu0 %v4442_v23  ;;  %v4490_v51 = vld [vmem:[#allocation2 + $0xe18] sm:$0xff]  ;;  %v4487_v23 = vld [vmem:[#allocation2 + $0xe00] sm:$0xff] }
 0x828   :  { %4852 = vmatpush1.bf16.msra.mxu1 %v4439_v30  ;;  %5016 = vmatpush1.bf16.msra.mxu0 %v4441_v33  ;;  %v4489_v30 = vld [vmem:[#allocation2 + $0xe10] sm:$0xff]  ;;  %v4496_v33 = vld [vmem:[#allocation2 + $0xe48] sm:$0xff] }
 0x829   :  { %4853 = vmatprep.subr.bf16.mxu1 %v4448_v1  ;;  %5017 = vmatprep.subr.bf16.mxu0 %v4450_v39  ;;  %v4498_v1 = vld [vmem:[#allocation2 + $0xe58] sm:$0xff]  ;;  %v4495_v39 = vld [vmem:[#allocation2 + $0xe40] sm:$0xff] }
 0x82c   :  { %4854 = vmatpush1.bf16.msra.mxu1 %v4447_v37  ;;  %5018 = vmatpush1.bf16.msra.mxu0 %v4449_v4  ;;  %v4497_v37 = vld [vmem:[#allocation2 + $0xe50] sm:$0xff]  ;;  %v4504_v4 = vld [vmem:[#allocation2 + $0xe88] sm:$0xff] }
 0x82d   :  { %4855 = vmatprep.subr.bf16.mxu1 %v4456_v5  ;;  %5019 = vmatprep.subr.bf16.mxu0 %v4458_v15  ;;  %v4506_v5 = vld [vmem:[#allocation2 + $0xe98] sm:$0xff]  ;;  %v4503_v15 = vld [vmem:[#allocation2 + $0xe80] sm:$0xff] }
 0x830   :  { %4856 = vmatpush1.bf16.msra.mxu1 %v4455_v18  ;;  %5020 = vmatpush1.bf16.msra.mxu0 %v4457_v41  ;;  %v4505_v18 = vld [vmem:[#allocation2 + $0xe90] sm:$0xff]  ;;  %v4512_v41 = vld [vmem:[#allocation2 + $0xec8] sm:$0xff] }
 0x831   :  { %4857 = vmatprep.subr.bf16.mxu1 %v4464_v46  ;;  %5021 = vmatprep.subr.bf16.mxu0 %v4466_v6  ;;  %v4514_v46 = vld [vmem:[#allocation2 + $0xed8] sm:$0xff]  ;;  %v4021_v6 = vpack.c.bf16 %v8993_v12, %v8993_v12 }
 0x834   :  { %4858 = vmatpush1.bf16.msra.mxu1 %v4463_v62  ;;  %5022 = vmatpush1.bf16.msra.mxu0 %v4465_v42  ;;  %v4511_v62 = vld [vmem:[#allocation2 + $0xec0] sm:$0xff]  ;;  %v4513_v42 = vld [vmem:[#allocation2 + $0xed0] sm:$0xff] }
 0x835   :  { %4859 = vmatprep.subr.bf16.mxu1 %v4472_v8  ;;  %5023 = vmatprep.subr.bf16.mxu0 %v4474_v38  ;;  %v4029_v8 = vpack.c.bf16 %v9009_v10, %v9009_v10  ;;  %v4520_v38 = vld [vmem:[#allocation2 + $0xf08] sm:$0xff] }
 0x838   :  { %4860 = vmatpush1.bf16.msra.mxu1 %v4471_v20  ;;  %5024 = vmatpush1.bf16.msra.mxu0 %v4473_v25  ;;  %v4522_v20 = vld [vmem:[#allocation2 + $0xf18] sm:$0xff]  ;;  %v4013_v25 = vpack.c.bf16 %v8961_v58, %v8961_v58 }
 0x839   :  { %4861 = vmatprep.subr.bf16.mxu1 %v4480_v32  ;;  %5025 = vmatprep.subr.bf16.mxu0 %v4482_v31  ;;  %v4639_v32 = vunpack.c.l.b16 %v4021_v6  ;;  %v4037_v31 = vpack.c.bf16 %v9025_v28, %v9025_v28  ;;  %v4537_v6 = vld [vmem:[#allocation2 + $0xf90] sm:$0xff] }
 0x83c   :  { %4862 = vmatpush1.bf16.msra.mxu1 %v4479_v34  ;;  %5026 = vmatpush1.bf16.msra.mxu0 %v4481_v63  ;;  %v4519_v34 = vld [vmem:[#allocation2 + $0xf00] sm:$0xff]  ;;  %v4521_v63 = vld [vmem:[#allocation2 + $0xf10] sm:$0xff] }
 0x83d   :  { %4863 = vmatprep.subr.bf16.mxu1 %v4488_v11  ;;  %5027 = vmatprep.subr.bf16.mxu0 %v4490_v51  ;;  %v4647_v11 = vunpack.c.l.b16 %v4029_v8  ;;  %v4528_v51 = vld [vmem:[#allocation2 + $0xf48] sm:$0xff]  ;;  %v4546_v8 = vld [vmem:[#allocation2 + $0xfd8] sm:$0xff] }
 0x840   :  { %4864 = vmatpush1.bf16.msra.mxu1 %v4487_v23  ;;  %5028 = vmatpush1.bf16.msra.mxu0 %v4489_v30  ;;  %v4530_v23 = vld [vmem:[#allocation2 + $0xf58] sm:$0xff]  ;;  %v4631_v30 = vunpack.c.l.b16 %v4013_v25  ;;  %v4545_v25 = vld [vmem:[#allocation2 + $0xfd0] sm:$0xff] }
 0x841   :  { %4865 = vmatprep.subr.bf16.mxu1 %v4496_v33  ;;  %5029 = vmatprep.subr.bf16.mxu0 %v4498_v1  ;;  %v4696_v33 = vrot.slane %v4639_v32, 7  ;;  %v4655_v1 = vunpack.c.l.b16 %v4037_v31  ;;  %v4044_v32 = vld [vmem:[#allocation2 + $0x28] sm:$0xff]  ;;  %v4046_v31 = vld [vmem:[#allocation2 + $0x38] sm:$0xff] }
 0x844   :  { %4866 = vmatpush1.bf16.msra.mxu1 %v4495_v39  ;;  %5030 = vmatpush1.bf16.msra.mxu0 %v4497_v37  ;;  %v4527_v39 = vld [vmem:[#allocation2 + $0xf40] sm:$0xff]  ;;  %v4529_v37 = vld [vmem:[#allocation2 + $0xf50] sm:$0xff] }
 0x845   :  { %4867 = vmatprep.subr.bf16.mxu1 %v4504_v4  ;;  %5031 = vmatprep.subr.bf16.mxu0 %v4506_v5  ;;  %v4698_v4 = vrot.slane %v4647_v11, 6  ;;  %v4536_v5 = vld [vmem:[#allocation2 + $0xf88] sm:$0xff]  ;;  %v4045_v11 = vld [vmem:[#allocation2 + $0x30] sm:$0xff] }
 0x848   :  { %4868 = vmatpush1.bf16.msra.mxu1 %v4503_v15  ;;  %5032 = vmatpush1.bf16.msra.mxu0 %v4505_v18  ;;  %v4538_v15 = vld [vmem:[#allocation2 + $0xf98] sm:$0xff]  ;;  %v4697_v18 = vsel %vm4658_vm2, %v4696_v33, %v4631_v30  ;;  %v4051_v30 = vld [vmem:[#allocation2 + $0x60] sm:$0xff]  ;;  %v4053_v33 = vld [vmem:[#allocation2 + $0x70] sm:$0xff] }
 0x849   :  { %4869 = vmatprep.subr.bf16.mxu1 %v4512_v41  ;;  %5033 = vmatprep.subr.bf16.mxu0 %v4514_v46  ;;  %v4700_v41 = vrot.slane %v4655_v1, 5  ;;  %v4535_v46 = vld [vmem:[#allocation2 + $0xf80] sm:$0xff]  ;;  %v4060_v1 = vld [vmem:[#allocation2 + $0xa8] sm:$0xff] }
 0x84c   :  { %4870 = vmatpush1.bf16.msra.mxu1 %v4511_v62  ;;  %5034 = vmatpush1.bf16.msra.mxu0 %v4513_v42  ;;  %v4699_v62 = vsel %vm4661_vm3, %v4698_v4, %v4697_v18  ;;  %v4544_v42 = vld [vmem:[#allocation2 + $0xfc8] sm:$0xff]  ;;  %v4061_v4 = vld [vmem:[#allocation2 + $0xb0] sm:$0xff]  ;;  %v4067_v18 = vld [vmem:[#allocation2 + $0xe0] sm:$0xff] }
 0x84d   :  { %4871 = vmatprep.subr.bf16.mxu1 %v4520_v38  ;;  %5035 = vmatprep.subr.bf16.mxu0 %v4522_v20  ;;  %v4701_v38 = vsel %vm4664_vm4, %v4700_v41, %v4699_v62  ;;  %v4543_v20 = vld [vmem:[#allocation2 + $0xfc0] sm:$0xff]  ;;  %v4069_v41 = vld [vmem:[#allocation2 + $0xf0] sm:$0xff] }
 0x84e   :  { %v4077_v62 = vld [vmem:[#allocation2 + $0x130] sm:$0xff] }
 0x850   :  { %4872 = vmatpush1.bf16.msra.mxu1 %v4519_v34  ;;  %5036 = vmatpush1.bf16.msra.mxu0 %v4521_v63  ;;  %v9145_v34 = vpack.c.b16 %v4701_v38, %v4701_v38  ;;  %v4043_v63 = vld [vmem:[#allocation2 + $0x20] sm:$0xff] }
 0x851   :  { %4873 = vmatprep.subr.bf16.mxu1 %v4528_v51  ;;  %5037 = vmatprep.subr.bf16.mxu0 %v4530_v23  ;;  %v4052_v51 = vld [vmem:[#allocation2 + $0x68] sm:$0xff]  ;;  %v4054_v23 = vld [vmem:[#allocation2 + $0x78] sm:$0xff]  ;;  %v4083_v38 = vld [vmem:[#allocation2 + $0x160] sm:$0xff] }
 0x854   :  { %4874 = vmatpush1.bf16.msra.mxu1 %v4527_v39  ;;  %5038 = vmatpush1.bf16.msra.mxu0 %v4529_v37  ;;  %v4062_v39 = vld [vmem:[#allocation2 + $0xb8] sm:$0xff]  ;;  %v4059_v37 = vld [vmem:[#allocation2 + $0xa0] sm:$0xff] }
 0x855   :  { %4875 = vmatprep.subr.bf16.mxu1 %v4536_v5  ;;  %5039 = vmatprep.subr.bf16.mxu0 %v4538_v15  ;;  %v4068_v5 = vld [vmem:[#allocation2 + $0xe8] sm:$0xff]  ;;  %v4070_v15 = vld [vmem:[#allocation2 + $0xf8] sm:$0xff] }
 0x858   :  { %4876 = vmatpush1.bf16.msra.mxu1 %v4535_v46  ;;  %5040 = vmatpush1.bf16.msra.mxu0 %v4537_v6  ;;  %v4076_v46 = vld [vmem:[#allocation2 + $0x128] sm:$0xff]  ;;  %v4078_v6 = vld [vmem:[#allocation2 + $0x138] sm:$0xff] }
 0x859   :  { %4877 = vmatprep.subr.bf16.mxu1 %v4544_v42  ;;  %5041 = vmatprep.subr.bf16.mxu0 %v4546_v8  ;;  %v4084_v42 = vld [vmem:[#allocation2 + $0x168] sm:$0xff]  ;;  %v4086_v8 = vld [vmem:[#allocation2 + $0x178] sm:$0xff] }
 0x85c   :  { %4878 = vmatpush1.bf16.msra.mxu1 %v4543_v20  ;;  %5042 = vmatpush1.bf16.msra.mxu0 %v4545_v25  ;;  %v4085_v20 = vld [vmem:[#allocation2 + $0x170] sm:$0xff]  ;;  %v4092_v25 = vld [vmem:[#allocation2 + $0x1a8] sm:$0xff] }
 0x85d   :  { %5052 = vmatprep.subr.bf16.mxu1 %v4044_v32  ;;  %5216 = vmatprep.subr.bf16.mxu0 %v4046_v31  ;;  %v4094_v32 = vld [vmem:[#allocation2 + $0x1b8] sm:$0xff]  ;;  %v4091_v31 = vld [vmem:[#allocation2 + $0x1a0] sm:$0xff] }
 0x85f   :  { %4880 = vmatmul.mubr.bf16.vlgmr.msra.gmra.mrb[96].mxu1 %v9145_v34  ;;  %5044 = vmatmul.mubr.bf16.vlgmr.msra.gmra.mrb[64].mxu0 %v9145_v34 }
 0x860   :  { %5053 = vmatpush1.bf16.msra.mxu1 %v4043_v63  ;;  %5217 = vmatpush1.bf16.msra.mxu0 %v4045_v11  ;;  %v4093_v63 = vld [vmem:[#allocation2 + $0x1b0] sm:$0xff]  ;;  %v4100_v11 = vld [vmem:[#allocation2 + $0x1e8] sm:$0xff] }
 0x861   :  { %5054 = vmatprep.subr.bf16.mxu1 %v4052_v51  ;;  %5218 = vmatprep.subr.bf16.mxu0 %v4054_v23  ;;  %v4102_v51 = vld [vmem:[#allocation2 + $0x1f8] sm:$0xff]  ;;  %v4099_v23 = vld [vmem:[#allocation2 + $0x1e0] sm:$0xff] }
 0x862   :  { %5084 = vmatprep.mubr.bf16.mxu1 %v9040_v56  ;;  %5248 = vmatprep.mubr.bf16.mxu0 %v9040_v56  ;;  %v4075_v56 = vld [vmem:[#allocation2 + $0x120] sm:$0xff] }
 0x864   :  { %5055 = vmatpush1.bf16.msra.mxu1 %v4051_v30  ;;  %5219 = vmatpush1.bf16.msra.mxu0 %v4053_v33  ;;  %v4101_v30 = vld [vmem:[#allocation2 + $0x1f0] sm:$0xff]  ;;  %v4108_v33 = vld [vmem:[#allocation2 + $0x228] sm:$0xff] }
 0x865   :  { %5056 = vmatprep.subr.bf16.mxu1 %v4060_v1  ;;  %5220 = vmatprep.subr.bf16.mxu0 %v4062_v39  ;;  %v4110_v1 = vld [vmem:[#allocation2 + $0x238] sm:$0xff]  ;;  %v4107_v39 = vld [vmem:[#allocation2 + $0x220] sm:$0xff] }
 0x868   :  { %5057 = vmatpush1.bf16.msra.mxu1 %v4059_v37  ;;  %5221 = vmatpush1.bf16.msra.mxu0 %v4061_v4  ;;  %v4109_v37 = vld [vmem:[#allocation2 + $0x230] sm:$0xff]  ;;  %v4116_v4 = vld [vmem:[#allocation2 + $0x268] sm:$0xff] }
 0x869   :  { %5058 = vmatprep.subr.bf16.mxu1 %v4068_v5  ;;  %5222 = vmatprep.subr.bf16.mxu0 %v4070_v15  ;;  %v4118_v5 = vld [vmem:[#allocation2 + $0x278] sm:$0xff]  ;;  %v4115_v15 = vld [vmem:[#allocation2 + $0x260] sm:$0xff] }
 0x86c   :  { %5059 = vmatpush1.bf16.msra.mxu1 %v4067_v18  ;;  %5223 = vmatpush1.bf16.msra.mxu0 %v4069_v41  ;;  %v4117_v18 = vld [vmem:[#allocation2 + $0x270] sm:$0xff]  ;;  %v4124_v41 = vld [vmem:[#allocation2 + $0x2a8] sm:$0xff] }
 0x86d   :  { %5060 = vmatprep.subr.bf16.mxu1 %v4076_v46  ;;  %5224 = vmatprep.subr.bf16.mxu0 %v4078_v6  ;;  %v4126_v46 = vld [vmem:[#allocation2 + $0x2b8] sm:$0xff]  ;;  %v4123_v6 = vld [vmem:[#allocation2 + $0x2a0] sm:$0xff] }
 0x870   :  { %5061 = vmatpush1.bf16.msra.mxu1 %v4075_v56  ;;  %5225 = vmatpush1.bf16.msra.mxu0 %v4077_v62  ;;  %v4125_v56 = vld [vmem:[#allocation2 + $0x2b0] sm:$0xff]  ;;  %v4132_v62 = vld [vmem:[#allocation2 + $0x2e8] sm:$0xff] }
 0x871   :  { %5062 = vmatprep.subr.bf16.mxu1 %v4084_v42  ;;  %5226 = vmatprep.subr.bf16.mxu0 %v4086_v8  ;;  %v4134_v42 = vld [vmem:[#allocation2 + $0x2f8] sm:$0xff]  ;;  %v4131_v8 = vld [vmem:[#allocation2 + $0x2e0] sm:$0xff] }
 0x874   :  { %5063 = vmatpush1.bf16.msra.mxu1 %v4083_v38  ;;  %5227 = vmatpush1.bf16.msra.mxu0 %v4085_v20  ;;  %v4133_v38 = vld [vmem:[#allocation2 + $0x2f0] sm:$0xff]  ;;  %v4140_v20 = vld [vmem:[#allocation2 + $0x328] sm:$0xff] }
 0x875   :  { %5064 = vmatprep.subr.bf16.mxu1 %v4092_v25  ;;  %5228 = vmatprep.subr.bf16.mxu0 %v4094_v32  ;;  %v4142_v25 = vld [vmem:[#allocation2 + $0x338] sm:$0xff]  ;;  %v4139_v32 = vld [vmem:[#allocation2 + $0x320] sm:$0xff] }
 0x878   :  { %5065 = vmatpush1.bf16.msra.mxu1 %v4091_v31  ;;  %5229 = vmatpush1.bf16.msra.mxu0 %v4093_v63  ;;  %v4141_v31 = vld [vmem:[#allocation2 + $0x330] sm:$0xff]  ;;  %v4148_v63 = vld [vmem:[#allocation2 + $0x368] sm:$0xff] }
 0x879   :  { %5066 = vmatprep.subr.bf16.mxu1 %v4100_v11  ;;  %5230 = vmatprep.subr.bf16.mxu0 %v4102_v51  ;;  %v4150_v11 = vld [vmem:[#allocation2 + $0x378] sm:$0xff]  ;;  %v4147_v51 = vld [vmem:[#allocation2 + $0x360] sm:$0xff] }
 0x87c   :  { %5067 = vmatpush1.bf16.msra.mxu1 %v4099_v23  ;;  %5231 = vmatpush1.bf16.msra.mxu0 %v4101_v30  ;;  %v4149_v23 = vld [vmem:[#allocation2 + $0x370] sm:$0xff]  ;;  %v4156_v30 = vld [vmem:[#allocation2 + $0x3a8] sm:$0xff] }
 0x87d   :  { %5068 = vmatprep.subr.bf16.mxu1 %v4108_v33  ;;  %5232 = vmatprep.subr.bf16.mxu0 %v4110_v1  ;;  %v4158_v33 = vld [vmem:[#allocation2 + $0x3b8] sm:$0xff]  ;;  %v4155_v1 = vld [vmem:[#allocation2 + $0x3a0] sm:$0xff] }
 0x880   :  { %5069 = vmatpush1.bf16.msra.mxu1 %v4107_v39  ;;  %5233 = vmatpush1.bf16.msra.mxu0 %v4109_v37  ;;  %v4157_v39 = vld [vmem:[#allocation2 + $0x3b0] sm:$0xff]  ;;  %v4164_v37 = vld [vmem:[#allocation2 + $0x3e8] sm:$0xff] }
 0x881   :  { %5070 = vmatprep.subr.bf16.mxu1 %v4116_v4  ;;  %5234 = vmatprep.subr.bf16.mxu0 %v4118_v5  ;;  %v4166_v4 = vld [vmem:[#allocation2 + $0x3f8] sm:$0xff]  ;;  %v4163_v5 = vld [vmem:[#allocation2 + $0x3e0] sm:$0xff] }
 0x884   :  { %5071 = vmatpush1.bf16.msra.mxu1 %v4115_v15  ;;  %5235 = vmatpush1.bf16.msra.mxu0 %v4117_v18  ;;  %v4165_v15 = vld [vmem:[#allocation2 + $0x3f0] sm:$0xff]  ;;  %v4172_v18 = vld [vmem:[#allocation2 + $0x428] sm:$0xff] }
 0x885   :  { %5072 = vmatprep.subr.bf16.mxu1 %v4124_v41  ;;  %5236 = vmatprep.subr.bf16.mxu0 %v4126_v46  ;;  %v4174_v41 = vld [vmem:[#allocation2 + $0x438] sm:$0xff]  ;;  %v4171_v46 = vld [vmem:[#allocation2 + $0x420] sm:$0xff] }
 0x888   :  { %5073 = vmatpush1.bf16.msra.mxu1 %v4123_v6  ;;  %5237 = vmatpush1.bf16.msra.mxu0 %v4125_v56  ;;  %v4173_v6 = vld [vmem:[#allocation2 + $0x430] sm:$0xff]  ;;  %v4180_v56 = vld [vmem:[#allocation2 + $0x468] sm:$0xff] }
 0x889   :  { %5074 = vmatprep.subr.bf16.mxu1 %v4132_v62  ;;  %5238 = vmatprep.subr.bf16.mxu0 %v4134_v42  ;;  %v4182_v62 = vld [vmem:[#allocation2 + $0x478] sm:$0xff]  ;;  %v4179_v42 = vld [vmem:[#allocation2 + $0x460] sm:$0xff] }
 0x88c   :  { %5075 = vmatpush1.bf16.msra.mxu1 %v4131_v8  ;;  %5239 = vmatpush1.bf16.msra.mxu0 %v4133_v38  ;;  %v4181_v8 = vld [vmem:[#allocation2 + $0x470] sm:$0xff]  ;;  %v4188_v38 = vld [vmem:[#allocation2 + $0x4a8] sm:$0xff] }
 0x88d   :  { %5076 = vmatprep.subr.bf16.mxu1 %v4140_v20  ;;  %5240 = vmatprep.subr.bf16.mxu0 %v4142_v25  ;;  %v4190_v20 = vld [vmem:[#allocation2 + $0x4b8] sm:$0xff]  ;;  %v4187_v25 = vld [vmem:[#allocation2 + $0x4a0] sm:$0xff] }
 0x890   :  { %5077 = vmatpush1.bf16.msra.mxu1 %v4139_v32  ;;  %5241 = vmatpush1.bf16.msra.mxu0 %v4141_v31  ;;  %v4189_v32 = vld [vmem:[#allocation2 + $0x4b0] sm:$0xff]  ;;  %v4196_v31 = vld [vmem:[#allocation2 + $0x4e8] sm:$0xff] }
 0x891   :  { %5078 = vmatprep.subr.bf16.mxu1 %v4148_v63  ;;  %5242 = vmatprep.subr.bf16.mxu0 %v4150_v11  ;;  %v4195_v63 = vld [vmem:[#allocation2 + $0x4e0] sm:$0xff]  ;;  %v4197_v11 = vld [vmem:[#allocation2 + $0x4f0] sm:$0xff] }
 0x894   :  { %5079 = vmatpush1.bf16.msra.mxu1 %v4147_v51  ;;  %5243 = vmatpush1.bf16.msra.mxu0 %v4149_v23  ;;  %v4204_v51 = vld [vmem:[#allocation2 + $0x528] sm:$0xff]  ;;  %v4206_v23 = vld [vmem:[#allocation2 + $0x538] sm:$0xff] }
 0x895   :  { %5080 = vmatprep.subr.bf16.mxu1 %v4156_v30  ;;  %5244 = vmatprep.subr.bf16.mxu0 %v4158_v33  ;;  %v4205_v30 = vld [vmem:[#allocation2 + $0x530] sm:$0xff]  ;;  %v4212_v33 = vld [vmem:[#allocation2 + $0x568] sm:$0xff] }
 0x898   :  { %5081 = vmatpush1.bf16.msra.mxu1 %v4155_v1  ;;  %5245 = vmatpush1.bf16.msra.mxu0 %v4157_v39  ;;  %v4214_v1 = vld [vmem:[#allocation2 + $0x578] sm:$0xff]  ;;  %v4211_v39 = vld [vmem:[#allocation2 + $0x560] sm:$0xff] }
 0x899   :  { %5082 = vmatprep.subr.bf16.mxu1 %v4164_v37  ;;  %5246 = vmatprep.subr.bf16.mxu0 %v4166_v4  ;;  %v4213_v37 = vld [vmem:[#allocation2 + $0x570] sm:$0xff]  ;;  %v4220_v4 = vld [vmem:[#allocation2 + $0x5a8] sm:$0xff] }
 0x89c   :  { %5083 = vmatpush1.bf16.msra.mxu1 %v4163_v5  ;;  %5247 = vmatpush1.bf16.msra.mxu0 %v4165_v15  ;;  %v4222_v5 = vld [vmem:[#allocation2 + $0x5b8] sm:$0xff]  ;;  %v4219_v15 = vld [vmem:[#allocation2 + $0x5a0] sm:$0xff] }
 0x89d   :  { %5093 = vmatprep.subr.bf16.mxu1 %v4172_v18  ;;  %5257 = vmatprep.subr.bf16.mxu0 %v4174_v41  ;;  %v4221_v18 = vld [vmem:[#allocation2 + $0x5b0] sm:$0xff]  ;;  %v4228_v41 = vld [vmem:[#allocation2 + $0x5e8] sm:$0xff] }
 0x89f   :  { %5085 = vmatmul.mubr.bf16.vlgmr.msra.gmra.mrb[100].mxu1 %v9065_v60  ;;  %5249 = vmatmul.mubr.bf16.vlgmr.msra.gmra.mrb[68].mxu0 %v9065_v60  ;;  %v4198_v60 = vld [vmem:[#allocation2 + $0x4f8] sm:$0xff] }
 0x8a0   :  { %5094 = vmatpush1.bf16.msra.mxu1 %v4171_v46  ;;  %5258 = vmatpush1.bf16.msra.mxu0 %v4173_v6  ;;  %v4230_v46 = vld [vmem:[#allocation2 + $0x5f8] sm:$0xff]  ;;  %v4227_v6 = vld [vmem:[#allocation2 + $0x5e0] sm:$0xff] }
 0x8a1   :  { %5095 = vmatprep.subr.bf16.mxu1 %v4180_v56  ;;  %5259 = vmatprep.subr.bf16.mxu0 %v4182_v62  ;;  %v4229_v56 = vld [vmem:[#allocation2 + $0x5f0] sm:$0xff]  ;;  %v4236_v62 = vld [vmem:[#allocation2 + $0x628] sm:$0xff] }
 0x8a2   :  { %5125 = vmatprep.mubr.bf16.mxu1 %v9068_v7  ;;  %5289 = vmatprep.mubr.bf16.mxu0 %v9068_v7  ;;  %v4203_v7 = vld [vmem:[#allocation2 + $0x520] sm:$0xff] }
 0x8a4   :  { %5096 = vmatpush1.bf16.msra.mxu1 %v4179_v42  ;;  %5260 = vmatpush1.bf16.msra.mxu0 %v4181_v8  ;;  %v4238_v42 = vld [vmem:[#allocation2 + $0x638] sm:$0xff]  ;;  %v4235_v8 = vld [vmem:[#allocation2 + $0x620] sm:$0xff] }
 0x8a5   :  { %5097 = vmatprep.subr.bf16.mxu1 %v4188_v38  ;;  %5261 = vmatprep.subr.bf16.mxu0 %v4190_v20  ;;  %v4237_v38 = vld [vmem:[#allocation2 + $0x630] sm:$0xff]  ;;  %v4244_v20 = vld [vmem:[#allocation2 + $0x668] sm:$0xff] }
 0x8a8   :  { %5098 = vmatpush1.bf16.msra.mxu1 %v4187_v25  ;;  %5262 = vmatpush1.bf16.msra.mxu0 %v4189_v32  ;;  %v4246_v25 = vld [vmem:[#allocation2 + $0x678] sm:$0xff]  ;;  %v4243_v32 = vld [vmem:[#allocation2 + $0x660] sm:$0xff] }
 0x8a9   :  { %5099 = vmatprep.subr.bf16.mxu1 %v4196_v31  ;;  %5263 = vmatprep.subr.bf16.mxu0 %v4198_v60  ;;  %v4245_v31 = vld [vmem:[#allocation2 + $0x670] sm:$0xff]  ;;  %v4252_v60 = vld [vmem:[#allocation2 + $0x6a8] sm:$0xff] }
 0x8ac   :  { %5100 = vmatpush1.bf16.msra.mxu1 %v4195_v63  ;;  %5264 = vmatpush1.bf16.msra.mxu0 %v4197_v11  ;;  %v4254_v63 = vld [vmem:[#allocation2 + $0x6b8] sm:$0xff]  ;;  %v4251_v11 = vld [vmem:[#allocation2 + $0x6a0] sm:$0xff] }
 0x8ad   :  { %5101 = vmatprep.subr.bf16.mxu1 %v4204_v51  ;;  %5265 = vmatprep.subr.bf16.mxu0 %v4206_v23  ;;  %v4253_v51 = vld [vmem:[#allocation2 + $0x6b0] sm:$0xff]  ;;  %v4260_v23 = vld [vmem:[#allocation2 + $0x6e8] sm:$0xff] }
 0x8b0   :  { %5102 = vmatpush1.bf16.msra.mxu1 %v4203_v7  ;;  %5266 = vmatpush1.bf16.msra.mxu0 %v4205_v30  ;;  %v4262_v7 = vld [vmem:[#allocation2 + $0x6f8] sm:$0xff]  ;;  %v4259_v30 = vld [vmem:[#allocation2 + $0x6e0] sm:$0xff] }
 0x8b1   :  { %5103 = vmatprep.subr.bf16.mxu1 %v4212_v33  ;;  %5267 = vmatprep.subr.bf16.mxu0 %v4214_v1  ;;  %v4261_v33 = vld [vmem:[#allocation2 + $0x6f0] sm:$0xff]  ;;  %v4268_v1 = vld [vmem:[#allocation2 + $0x728] sm:$0xff] }
 0x8b4   :  { %5104 = vmatpush1.bf16.msra.mxu1 %v4211_v39  ;;  %5268 = vmatpush1.bf16.msra.mxu0 %v4213_v37  ;;  %v4270_v39 = vld [vmem:[#allocation2 + $0x738] sm:$0xff]  ;;  %v4267_v37 = vld [vmem:[#allocation2 + $0x720] sm:$0xff] }
 0x8b5   :  { %5105 = vmatprep.subr.bf16.mxu1 %v4220_v4  ;;  %5269 = vmatprep.subr.bf16.mxu0 %v4222_v5  ;;  %v4269_v4 = vld [vmem:[#allocation2 + $0x730] sm:$0xff]  ;;  %v4276_v5 = vld [vmem:[#allocation2 + $0x768] sm:$0xff] }
 0x8b8   :  { %5106 = vmatpush1.bf16.msra.mxu1 %v4219_v15  ;;  %5270 = vmatpush1.bf16.msra.mxu0 %v4221_v18  ;;  %v4278_v15 = vld [vmem:[#allocation2 + $0x778] sm:$0xff]  ;;  %v4275_v18 = vld [vmem:[#allocation2 + $0x760] sm:$0xff] }
 0x8b9   :  { %5107 = vmatprep.subr.bf16.mxu1 %v4228_v41  ;;  %5271 = vmatprep.subr.bf16.mxu0 %v4230_v46  ;;  %v4277_v41 = vld [vmem:[#allocation2 + $0x770] sm:$0xff]  ;;  %v4284_v46 = vld [vmem:[#allocation2 + $0x7a8] sm:$0xff] }
 0x8bc   :  { %5108 = vmatpush1.bf16.msra.mxu1 %v4227_v6  ;;  %5272 = vmatpush1.bf16.msra.mxu0 %v4229_v56  ;;  %v4286_v6 = vld [vmem:[#allocation2 + $0x7b8] sm:$0xff]  ;;  %v4283_v56 = vld [vmem:[#allocation2 + $0x7a0] sm:$0xff] }
 0x8bd   :  { %5109 = vmatprep.subr.bf16.mxu1 %v4236_v62  ;;  %5273 = vmatprep.subr.bf16.mxu0 %v4238_v42  ;;  %v4285_v62 = vld [vmem:[#allocation2 + $0x7b0] sm:$0xff]  ;;  %v4292_v42 = vld [vmem:[#allocation2 + $0x7e8] sm:$0xff] }
 0x8c0   :  { %5110 = vmatpush1.bf16.msra.mxu1 %v4235_v8  ;;  %5274 = vmatpush1.bf16.msra.mxu0 %v4237_v38  ;;  %v4294_v8 = vld [vmem:[#allocation2 + $0x7f8] sm:$0xff]  ;;  %v4291_v38 = vld [vmem:[#allocation2 + $0x7e0] sm:$0xff] }
 0x8c1   :  { %5111 = vmatprep.subr.bf16.mxu1 %v4244_v20  ;;  %5275 = vmatprep.subr.bf16.mxu0 %v4246_v25  ;;  %v4293_v20 = vld [vmem:[#allocation2 + $0x7f0] sm:$0xff]  ;;  %v4300_v25 = vld [vmem:[#allocation2 + $0x828] sm:$0xff] }
 0x8c4   :  { %5112 = vmatpush1.bf16.msra.mxu1 %v4243_v32  ;;  %5276 = vmatpush1.bf16.msra.mxu0 %v4245_v31  ;;  %v4302_v32 = vld [vmem:[#allocation2 + $0x838] sm:$0xff]  ;;  %v4299_v31 = vld [vmem:[#allocation2 + $0x820] sm:$0xff] }
 0x8c5   :  { %5113 = vmatprep.subr.bf16.mxu1 %v4252_v60  ;;  %5277 = vmatprep.subr.bf16.mxu0 %v4254_v63  ;;  %v4301_v60 = vld [vmem:[#allocation2 + $0x830] sm:$0xff]  ;;  %v4308_v63 = vld [vmem:[#allocation2 + $0x868] sm:$0xff] }
 0x8c8   :  { %5114 = vmatpush1.bf16.msra.mxu1 %v4251_v11  ;;  %5278 = vmatpush1.bf16.msra.mxu0 %v4253_v51  ;;  %v4310_v11 = vld [vmem:[#allocation2 + $0x878] sm:$0xff]  ;;  %v4307_v51 = vld [vmem:[#allocation2 + $0x860] sm:$0xff] }
 0x8c9   :  { %5115 = vmatprep.subr.bf16.mxu1 %v4260_v23  ;;  %5279 = vmatprep.subr.bf16.mxu0 %v4262_v7  ;;  %v4309_v23 = vld [vmem:[#allocation2 + $0x870] sm:$0xff]  ;;  %v4316_v7 = vld [vmem:[#allocation2 + $0x8a8] sm:$0xff] }
 0x8cc   :  { %5116 = vmatpush1.bf16.msra.mxu1 %v4259_v30  ;;  %5280 = vmatpush1.bf16.msra.mxu0 %v4261_v33  ;;  %v4318_v30 = vld [vmem:[#allocation2 + $0x8b8] sm:$0xff]  ;;  %v4315_v33 = vld [vmem:[#allocation2 + $0x8a0] sm:$0xff] }
 0x8cd   :  { %5117 = vmatprep.subr.bf16.mxu1 %v4268_v1  ;;  %5281 = vmatprep.subr.bf16.mxu0 %v4270_v39  ;;  %v4317_v1 = vld [vmem:[#allocation2 + $0x8b0] sm:$0xff]  ;;  %v4324_v39 = vld [vmem:[#allocation2 + $0x8e8] sm:$0xff] }
 0x8d0   :  { %5118 = vmatpush1.bf16.msra.mxu1 %v4267_v37  ;;  %5282 = vmatpush1.bf16.msra.mxu0 %v4269_v4  ;;  %v4323_v37 = vld [vmem:[#allocation2 + $0x8e0] sm:$0xff]  ;;  %v4325_v4 = vld [vmem:[#allocation2 + $0x8f0] sm:$0xff] }
 0x8d1   :  { %5119 = vmatprep.subr.bf16.mxu1 %v4276_v5  ;;  %5283 = vmatprep.subr.bf16.mxu0 %v4278_v15  ;;  %v4332_v5 = vld [vmem:[#allocation2 + $0x928] sm:$0xff]  ;;  %v4334_v15 = vld [vmem:[#allocation2 + $0x938] sm:$0xff] }
 0x8d4   :  { %5120 = vmatpush1.bf16.msra.mxu1 %v4275_v18  ;;  %5284 = vmatpush1.bf16.msra.mxu0 %v4277_v41  ;;  %v4333_v18 = vld [vmem:[#allocation2 + $0x930] sm:$0xff]  ;;  %v4340_v41 = vld [vmem:[#allocation2 + $0x968] sm:$0xff] }
 0x8d5   :  { %5121 = vmatprep.subr.bf16.mxu1 %v4284_v46  ;;  %5285 = vmatprep.subr.bf16.mxu0 %v4286_v6  ;;  %v4342_v46 = vld [vmem:[#allocation2 + $0x978] sm:$0xff]  ;;  %v4339_v6 = vld [vmem:[#allocation2 + $0x960] sm:$0xff] }
 0x8d8   :  { %5122 = vmatpush1.bf16.msra.mxu1 %v4283_v56  ;;  %5286 = vmatpush1.bf16.msra.mxu0 %v4285_v62  ;;  %v4341_v56 = vld [vmem:[#allocation2 + $0x970] sm:$0xff]  ;;  %v4348_v62 = vld [vmem:[#allocation2 + $0x9a8] sm:$0xff] }
 0x8d9   :  { %5123 = vmatprep.subr.bf16.mxu1 %v4292_v42  ;;  %5287 = vmatprep.subr.bf16.mxu0 %v4294_v8  ;;  %v4350_v42 = vld [vmem:[#allocation2 + $0x9b8] sm:$0xff]  ;;  %v4347_v8 = vld [vmem:[#allocation2 + $0x9a0] sm:$0xff] }
 0x8dc   :  { %5124 = vmatpush1.bf16.msra.mxu1 %v4291_v38  ;;  %5288 = vmatpush1.bf16.msra.mxu0 %v4293_v20  ;;  %v4349_v38 = vld [vmem:[#allocation2 + $0x9b0] sm:$0xff]  ;;  %v4356_v20 = vld [vmem:[#allocation2 + $0x9e8] sm:$0xff] }
 0x8dd   :  { %5134 = vmatprep.subr.bf16.mxu1 %v4300_v25  ;;  %5298 = vmatprep.subr.bf16.mxu0 %v4302_v32  ;;  %v4358_v25 = vld [vmem:[#allocation2 + $0x9f8] sm:$0xff]  ;;  %v4355_v32 = vld [vmem:[#allocation2 + $0x9e0] sm:$0xff] }
 0x8df   :  { %5126 = vmatmul.mubr.bf16.vlgmr.msra.gmra.mrb[100].mxu1 %v9095_v48  ;;  %5290 = vmatmul.mubr.bf16.vlgmr.msra.gmra.mrb[68].mxu0 %v9095_v48  ;;  %v4326_v48 = vld [vmem:[#allocation2 + $0x8f8] sm:$0xff] }
 0x8e0   :  { %5135 = vmatpush1.bf16.msra.mxu1 %v4299_v31  ;;  %5299 = vmatpush1.bf16.msra.mxu0 %v4301_v60  ;;  %v4357_v31 = vld [vmem:[#allocation2 + $0x9f0] sm:$0xff]  ;;  %v4364_v60 = vld [vmem:[#allocation2 + $0xa28] sm:$0xff] }
 0x8e1   :  { %5136 = vmatprep.subr.bf16.mxu1 %v4308_v63  ;;  %5300 = vmatprep.subr.bf16.mxu0 %v4310_v11  ;;  %v4366_v63 = vld [vmem:[#allocation2 + $0xa38] sm:$0xff]  ;;  %v4363_v11 = vld [vmem:[#allocation2 + $0xa20] sm:$0xff] }
 0x8e2   :  { %5166 = vmatprep.mubr.bf16.mxu1 %v9098_v47  ;;  %5330 = vmatprep.mubr.bf16.mxu0 %v9098_v47  ;;  %v4331_v47 = vld [vmem:[#allocation2 + $0x920] sm:$0xff] }
 0x8e4   :  { %5137 = vmatpush1.bf16.msra.mxu1 %v4307_v51  ;;  %5301 = vmatpush1.bf16.msra.mxu0 %v4309_v23  ;;  %v4365_v51 = vld [vmem:[#allocation2 + $0xa30] sm:$0xff]  ;;  %v4372_v23 = vld [vmem:[#allocation2 + $0xa68] sm:$0xff] }
 0x8e5   :  { %5138 = vmatprep.subr.bf16.mxu1 %v4316_v7  ;;  %5302 = vmatprep.subr.bf16.mxu0 %v4318_v30  ;;  %v4374_v7 = vld [vmem:[#allocation2 + $0xa78] sm:$0xff]  ;;  %v4371_v30 = vld [vmem:[#allocation2 + $0xa60] sm:$0xff] }
 0x8e8   :  { %5139 = vmatpush1.bf16.msra.mxu1 %v4315_v33  ;;  %5303 = vmatpush1.bf16.msra.mxu0 %v4317_v1  ;;  %v4373_v33 = vld [vmem:[#allocation2 + $0xa70] sm:$0xff]  ;;  %v4380_v1 = vld [vmem:[#allocation2 + $0xaa8] sm:$0xff] }
 0x8e9   :  { %5140 = vmatprep.subr.bf16.mxu1 %v4324_v39  ;;  %5304 = vmatprep.subr.bf16.mxu0 %v4326_v48  ;;  %v4382_v39 = vld [vmem:[#allocation2 + $0xab8] sm:$0xff]  ;;  %v4379_v48 = vld [vmem:[#allocation2 + $0xaa0] sm:$0xff] }
 0x8ec   :  { %5141 = vmatpush1.bf16.msra.mxu1 %v4323_v37  ;;  %5305 = vmatpush1.bf16.msra.mxu0 %v4325_v4  ;;  %v4381_v37 = vld [vmem:[#allocation2 + $0xab0] sm:$0xff]  ;;  %v4388_v4 = vld [vmem:[#allocation2 + $0xae8] sm:$0xff] }
 0x8ed   :  { %5142 = vmatprep.subr.bf16.mxu1 %v4332_v5  ;;  %5306 = vmatprep.subr.bf16.mxu0 %v4334_v15  ;;  %v4390_v5 = vld [vmem:[#allocation2 + $0xaf8] sm:$0xff]  ;;  %v4387_v15 = vld [vmem:[#allocation2 + $0xae0] sm:$0xff] }
 0x8f0   :  { %5143 = vmatpush1.bf16.msra.mxu1 %v4331_v47  ;;  %5307 = vmatpush1.bf16.msra.mxu0 %v4333_v18  ;;  %v4389_v47 = vld [vmem:[#allocation2 + $0xaf0] sm:$0xff]  ;;  %v4396_v18 = vld [vmem:[#allocation2 + $0xb28] sm:$0xff] }
 0x8f1   :  { %5144 = vmatprep.subr.bf16.mxu1 %v4340_v41  ;;  %5308 = vmatprep.subr.bf16.mxu0 %v4342_v46  ;;  %v4398_v41 = vld [vmem:[#allocation2 + $0xb38] sm:$0xff]  ;;  %v4395_v46 = vld [vmem:[#allocation2 + $0xb20] sm:$0xff] }
 0x8f4   :  { %5145 = vmatpush1.bf16.msra.mxu1 %v4339_v6  ;;  %5309 = vmatpush1.bf16.msra.mxu0 %v4341_v56  ;;  %v4397_v6 = vld [vmem:[#allocation2 + $0xb30] sm:$0xff]  ;;  %v4404_v56 = vld [vmem:[#allocation2 + $0xb68] sm:$0xff] }
 0x8f5   :  { %5146 = vmatprep.subr.bf16.mxu1 %v4348_v62  ;;  %5310 = vmatprep.subr.bf16.mxu0 %v4350_v42  ;;  %v4406_v62 = vld [vmem:[#allocation2 + $0xb78] sm:$0xff]  ;;  %v4403_v42 = vld [vmem:[#allocation2 + $0xb60] sm:$0xff] }
 0x8f8   :  { %5147 = vmatpush1.bf16.msra.mxu1 %v4347_v8  ;;  %5311 = vmatpush1.bf16.msra.mxu0 %v4349_v38  ;;  %v4405_v8 = vld [vmem:[#allocation2 + $0xb70] sm:$0xff]  ;;  %v4412_v38 = vld [vmem:[#allocation2 + $0xba8] sm:$0xff] }
 0x8f9   :  { %5148 = vmatprep.subr.bf16.mxu1 %v4356_v20  ;;  %5312 = vmatprep.subr.bf16.mxu0 %v4358_v25  ;;  %v4414_v20 = vld [vmem:[#allocation2 + $0xbb8] sm:$0xff]  ;;  %v4411_v25 = vld [vmem:[#allocation2 + $0xba0] sm:$0xff] }
 0x8fc   :  { %5149 = vmatpush1.bf16.msra.mxu1 %v4355_v32  ;;  %5313 = vmatpush1.bf16.msra.mxu0 %v4357_v31  ;;  %v4413_v32 = vld [vmem:[#allocation2 + $0xbb0] sm:$0xff]  ;;  %v4420_v31 = vld [vmem:[#allocation2 + $0xbe8] sm:$0xff] }
 0x8fd   :  { %5150 = vmatprep.subr.bf16.mxu1 %v4364_v60  ;;  %5314 = vmatprep.subr.bf16.mxu0 %v4366_v63  ;;  %v4422_v60 = vld [vmem:[#allocation2 + $0xbf8] sm:$0xff]  ;;  %v4419_v63 = vld [vmem:[#allocation2 + $0xbe0] sm:$0xff] }
 0x900   :  { %5151 = vmatpush1.bf16.msra.mxu1 %v4363_v11  ;;  %5315 = vmatpush1.bf16.msra.mxu0 %v4365_v51  ;;  %v4421_v11 = vld [vmem:[#allocation2 + $0xbf0] sm:$0xff]  ;;  %v4428_v51 = vld [vmem:[#allocation2 + $0xc28] sm:$0xff] }
 0x901   :  { %5152 = vmatprep.subr.bf16.mxu1 %v4372_v23  ;;  %5316 = vmatprep.subr.bf16.mxu0 %v4374_v7  ;;  %v4430_v23 = vld [vmem:[#allocation2 + $0xc38] sm:$0xff]  ;;  %v4427_v7 = vld [vmem:[#allocation2 + $0xc20] sm:$0xff] }
 0x904   :  { %5153 = vmatpush1.bf16.msra.mxu1 %v4371_v30  ;;  %5317 = vmatpush1.bf16.msra.mxu0 %v4373_v33  ;;  %v4429_v30 = vld [vmem:[#allocation2 + $0xc30] sm:$0xff]  ;;  %v4436_v33 = vld [vmem:[#allocation2 + $0xc68] sm:$0xff] }
 0x905   :  { %5154 = vmatprep.subr.bf16.mxu1 %v4380_v1  ;;  %5318 = vmatprep.subr.bf16.mxu0 %v4382_v39  ;;  %v4438_v1 = vld [vmem:[#allocation2 + $0xc78] sm:$0xff]  ;;  %v4435_v39 = vld [vmem:[#allocation2 + $0xc60] sm:$0xff] }
 0x908   :  { %5155 = vmatpush1.bf16.msra.mxu1 %v4379_v48  ;;  %5319 = vmatpush1.bf16.msra.mxu0 %v4381_v37  ;;  %v4437_v48 = vld [vmem:[#allocation2 + $0xc70] sm:$0xff]  ;;  %v4444_v37 = vld [vmem:[#allocation2 + $0xca8] sm:$0xff] }
 0x909   :  { %5156 = vmatprep.subr.bf16.mxu1 %v4388_v4  ;;  %5320 = vmatprep.subr.bf16.mxu0 %v4390_v5  ;;  %v4446_v4 = vld [vmem:[#allocation2 + $0xcb8] sm:$0xff]  ;;  %v4443_v5 = vld [vmem:[#allocation2 + $0xca0] sm:$0xff] }
 0x90c   :  { %5157 = vmatpush1.bf16.msra.mxu1 %v4387_v15  ;;  %5321 = vmatpush1.bf16.msra.mxu0 %v4389_v47  ;;  %v4445_v15 = vld [vmem:[#allocation2 + $0xcb0] sm:$0xff]  ;;  %v4452_v47 = vld [vmem:[#allocation2 + $0xce8] sm:$0xff] }
 0x90d   :  { %5158 = vmatprep.subr.bf16.mxu1 %v4396_v18  ;;  %5322 = vmatprep.subr.bf16.mxu0 %v4398_v41  ;;  %v4451_v18 = vld [vmem:[#allocation2 + $0xce0] sm:$0xff]  ;;  %v4453_v41 = vld [vmem:[#allocation2 + $0xcf0] sm:$0xff] }
 0x910   :  { %5159 = vmatpush1.bf16.msra.mxu1 %v4395_v46  ;;  %5323 = vmatpush1.bf16.msra.mxu0 %v4397_v6  ;;  %v4460_v46 = vld [vmem:[#allocation2 + $0xd28] sm:$0xff]  ;;  %v4462_v6 = vld [vmem:[#allocation2 + $0xd38] sm:$0xff] }
 0x911   :  { %5160 = vmatprep.subr.bf16.mxu1 %v4404_v56  ;;  %5324 = vmatprep.subr.bf16.mxu0 %v4406_v62  ;;  %v4461_v56 = vld [vmem:[#allocation2 + $0xd30] sm:$0xff]  ;;  %v4468_v62 = vld [vmem:[#allocation2 + $0xd68] sm:$0xff] }
 0x914   :  { %5161 = vmatpush1.bf16.msra.mxu1 %v4403_v42  ;;  %5325 = vmatpush1.bf16.msra.mxu0 %v4405_v8  ;;  %v4470_v42 = vld [vmem:[#allocation2 + $0xd78] sm:$0xff]  ;;  %v4467_v8 = vld [vmem:[#allocation2 + $0xd60] sm:$0xff] }
 0x915   :  { %5162 = vmatprep.subr.bf16.mxu1 %v4412_v38  ;;  %5326 = vmatprep.subr.bf16.mxu0 %v4414_v20  ;;  %v4469_v38 = vld [vmem:[#allocation2 + $0xd70] sm:$0xff] }
 0x918   :  { %5163 = vmatpush1.bf16.msra.mxu1 %v4411_v25  ;;  %5327 = vmatpush1.bf16.msra.mxu0 %v4413_v32  ;;  %v4476_v32 = vld [vmem:[#allocation2 + $0xda8] sm:$0xff] }
 0x919   :  { %5164 = vmatprep.subr.bf16.mxu1 %v4420_v31  ;;  %5328 = vmatprep.subr.bf16.mxu0 %v4422_v60  ;;  %v4478_v31 = vld [vmem:[#allocation2 + $0xdb8] sm:$0xff] }
 0x91c   :  { %5165 = vmatpush1.bf16.msra.mxu1 %v4419_v63  ;;  %5329 = vmatpush1.bf16.msra.mxu0 %v4421_v11 }
 0x91d   :  { %5175 = vmatprep.subr.bf16.mxu1 %v4428_v51  ;;  %5339 = vmatprep.subr.bf16.mxu0 %v4430_v23 }
 0x91f   :  { %5167 = vmatmul.mubr.bf16.vlgmr.msra.gmra.mrb[100].mxu1 %v9125_v61  ;;  %5331 = vmatmul.mubr.bf16.vlgmr.msra.gmra.mrb[68].mxu0 %v9125_v61  ;;  %v4454_v61 = vld [vmem:[#allocation2 + $0xcf8] sm:$0xff] }
 0x920   :  { %5176 = vmatpush1.bf16.msra.mxu1 %v4427_v7  ;;  %5340 = vmatpush1.bf16.msra.mxu0 %v4429_v30  ;;  %v4475_v30 = vld [vmem:[#allocation2 + $0xda0] sm:$0xff] }
 0x921   :  { %5177 = vmatprep.subr.bf16.mxu1 %v4436_v33  ;;  %5341 = vmatprep.subr.bf16.mxu0 %v4438_v1  ;;  %v4477_v33 = vld [vmem:[#allocation2 + $0xdb0] sm:$0xff]  ;;  %v4484_v1 = vld [vmem:[#allocation2 + $0xde8] sm:$0xff] }
 0x922   :  { %5207 = vmatprep.mubr.bf16.mxu1 %v9128_v55  ;;  %5371 = vmatprep.mubr.bf16.mxu0 %v9128_v55  ;;  %v4459_v55 = vld [vmem:[#allocation2 + $0xd20] sm:$0xff] }
 0x924   :  { %5178 = vmatpush1.bf16.msra.mxu1 %v4435_v39  ;;  %5342 = vmatpush1.bf16.msra.mxu0 %v4437_v48  ;;  %v4486_v39 = vld [vmem:[#allocation2 + $0xdf8] sm:$0xff]  ;;  %v4483_v48 = vld [vmem:[#allocation2 + $0xde0] sm:$0xff] }
 0x925   :  { %5179 = vmatprep.subr.bf16.mxu1 %v4444_v37  ;;  %5343 = vmatprep.subr.bf16.mxu0 %v4446_v4  ;;  %v4485_v37 = vld [vmem:[#allocation2 + $0xdf0] sm:$0xff]  ;;  %v4492_v4 = vld [vmem:[#allocation2 + $0xe28] sm:$0xff] }
 0x928   :  { %5180 = vmatpush1.bf16.msra.mxu1 %v4443_v5  ;;  %5344 = vmatpush1.bf16.msra.mxu0 %v4445_v15  ;;  %v4494_v5 = vld [vmem:[#allocation2 + $0xe38] sm:$0xff]  ;;  %v4491_v15 = vld [vmem:[#allocation2 + $0xe20] sm:$0xff] }
 0x929   :  { %5181 = vmatprep.subr.bf16.mxu1 %v4452_v47  ;;  %5345 = vmatprep.subr.bf16.mxu0 %v4454_v61  ;;  %v4493_v47 = vld [vmem:[#allocation2 + $0xe30] sm:$0xff]  ;;  %v4500_v61 = vld [vmem:[#allocation2 + $0xe68] sm:$0xff] }
 0x92c   :  { %5182 = vmatpush1.bf16.msra.mxu1 %v4451_v18  ;;  %5346 = vmatpush1.bf16.msra.mxu0 %v4453_v41  ;;  %v4502_v18 = vld [vmem:[#allocation2 + $0xe78] sm:$0xff]  ;;  %v4499_v41 = vld [vmem:[#allocation2 + $0xe60] sm:$0xff] }
 0x92d   :  { %5183 = vmatprep.subr.bf16.mxu1 %v4460_v46  ;;  %5347 = vmatprep.subr.bf16.mxu0 %v4462_v6  ;;  %v4501_v46 = vld [vmem:[#allocation2 + $0xe70] sm:$0xff]  ;;  %v4508_v6 = vld [vmem:[#allocation2 + $0xea8] sm:$0xff] }
 0x930   :  { %5184 = vmatpush1.bf16.msra.mxu1 %v4459_v55  ;;  %5348 = vmatpush1.bf16.msra.mxu0 %v4461_v56  ;;  %v4510_v55 = vld [vmem:[#allocation2 + $0xeb8] sm:$0xff]  ;;  %v4507_v56 = vld [vmem:[#allocation2 + $0xea0] sm:$0xff] }
 0x931   :  { %5185 = vmatprep.subr.bf16.mxu1 %v4468_v62  ;;  %5349 = vmatprep.subr.bf16.mxu0 %v4470_v42  ;;  %v4509_v62 = vld [vmem:[#allocation2 + $0xeb0] sm:$0xff]  ;;  %v4516_v42 = vld [vmem:[#allocation2 + $0xee8] sm:$0xff] }
 0x932   :  { %v9163_v20 = vpop.f32.mrb[96].mxu1  ;;  %v9165_v25 = vpop.f32.mrb[64].mxu0 }
 0x933   :  { %v9167_v60 = vpop.f32.mrb[97].mxu1  ;;  %v9169_v63 = vpop.f32.mrb[65].mxu0 }
 0x934   :  { %v4885_v11 = vpop.f32.mrb[98].mxu1  ;;  %v5049_v51 = vpop.f32.mrb[66].mxu0  ;;  %5186 = vmatpush1.bf16.msra.mxu1 %v4467_v8  ;;  %5350 = vmatpush1.bf16.msra.mxu0 %v4469_v38  ;;  %v4518_v8 = vld [vmem:[#allocation2 + $0xef8] sm:$0xff]  ;;  %v4515_v38 = vld [vmem:[#allocation2 + $0xee0] sm:$0xff] }
 0x935   :  { %v4886_v23 = vpop.f32.mrb[99].mxu1  ;;  %v5050_v7 = vpop.f32.mrb[67].mxu0  ;;  %5187 = vmatprep.subr.bf16.mxu1 %v4476_v32  ;;  %5351 = vmatprep.subr.bf16.mxu0 %v4478_v31  ;;  %v4517_v32 = vld [vmem:[#allocation2 + $0xef0] sm:$0xff]  ;;  %v4524_v31 = vld [vmem:[#allocation2 + $0xf28] sm:$0xff]  ;;  %v4526_v11 = vld [vmem:[#allocation2 + $0xf38] sm:$0xff] }
 0x936   :  { %v4523_v51 = vld [vmem:[#allocation2 + $0xf20] sm:$0xff]  ;;  %v4525_v23 = vld [vmem:[#allocation2 + $0xf30] sm:$0xff]  ;;  %v4532_v7 = vld [vmem:[#allocation2 + $0xf68] sm:$0xff] }
 0x938   :  { %5188 = vmatpush1.bf16.msra.mxu1 %v4475_v30  ;;  %5352 = vmatpush1.bf16.msra.mxu0 %v4477_v33  ;;  %v4534_v30 = vld [vmem:[#allocation2 + $0xf78] sm:$0xff]  ;;  %v9171_v33 = vld [vmem:[#allocation10] sm:$0xff] }
 0x939   :  { %5189 = vmatprep.subr.bf16.mxu1 %v4484_v1  ;;  %5353 = vmatprep.subr.bf16.mxu0 %v4486_v39  ;;  %v4531_v1 = vld [vmem:[#allocation2 + $0xf60] sm:$0xff]  ;;  %v4533_v39 = vld [vmem:[#allocation2 + $0xf70] sm:$0xff] }
 0x93c   :  { %5190 = vmatpush1.bf16.msra.mxu1 %v4483_v48  ;;  %5354 = vmatpush1.bf16.msra.mxu0 %v4485_v37  ;;  %v5428_v48 = vrot.slane %v8920_v19, 1  ;;  %v9811_v37 = vld [vmem:[#allocation124_spill] sm:$0xff]  ;;  %v4548_v19 = vld [vmem:[#allocation2 + $0xfe8] sm:$0xff] }
 0x93d   :  { %5191 = vmatprep.subr.bf16.mxu1 %v4492_v4  ;;  %5355 = vmatprep.subr.bf16.mxu0 %v4494_v5  ;;  %v9812_v4 = vsub.s32 1, %v9811_v37 }
 0x93f   :  { %v4560_v5 = vrot.slane %v9171_v33, %v9812_v4  ;;  %v5422_v4 = vrot.slane %v8918_v50, 1  ;;  %v5424_v50 = vrot.slane %v8997_v36, 7 }
 0x940   :  { %5192 = vmatpush1.bf16.msra.mxu1 %v4491_v15  ;;  %5356 = vmatpush1.bf16.msra.mxu0 %v4493_v47  ;;  %v4540_v15 = vld [vmem:[#allocation2 + $0xfa8] sm:$0xff]  ;;  %v4542_v47 = vld [vmem:[#allocation2 + $0xfb8] sm:$0xff] }
 0x941   :  { %5193 = vmatprep.subr.bf16.mxu1 %v4500_v61  ;;  %5357 = vmatprep.subr.bf16.mxu0 %v4502_v18  ;;  %v5430_v61 = vrot.slane %v8999_v52, 7  ;;  %v4539_v18 = vld [vmem:[#allocation2 + $0xfa0] sm:$0xff] }
 0x944   :  { %5194 = vmatpush1.bf16.msra.mxu1 %v4499_v41  ;;  %5358 = vmatpush1.bf16.msra.mxu0 %v4501_v46  ;;  %v4541_v41 = vld [vmem:[#allocation2 + $0xfb0] sm:$0xff]  ;;  %v5429_v46 = vsel %vm4658_vm2, %v8978_v0, %v5428_v48  ;;  %v7612_v0 = vld [vmem:[%s9492_s6 + $0x40] sm:$0xff]   ;;  %v4567_v48 = vsub.s32 3, %v9811_v37 }
 0x945   :  { %5195 = vmatprep.subr.bf16.mxu1 %v4508_v6  ;;  %5359 = vmatprep.subr.bf16.mxu0 %v4510_v55  ;;  %v7024_v6 = vadd.f32 %v9167_v60, %v4560_v5  ;;  %v4550_v55 = vld [vmem:[#allocation2 + $0xff8] sm:$0xff]  ;;  %v5431_v52 = vsel %vm4661_vm3, %v5430_v61, %v5429_v46  ;;  %v7623_v5 = vld [vmem:[%s9492_s6 + $0x28] sm:$0xff]   ;;  %v7624_v61 = vld [vmem:[%s9492_s6 + $0x70] sm:$0xff]   ;;  %v5423_v46 = vsel %vm4658_vm2, %v8975_v45, %v5422_v4 }
 0x948   :  { %5196 = vmatpush1.bf16.msra.mxu1 %v4507_v56  ;;  %5360 = vmatpush1.bf16.msra.mxu0 %v4509_v62  ;;  %v9184_v56 = vstv %s9491_s5  ;;  %v5432_v62 = vrot.slane %v9015_v9, 6  ;;  %v7613_v9 = vld [vmem:[%s9492_s6] sm:$0xff]  }
 0x949   :  { %5197 = vmatprep.subr.bf16.mxu1 %v4516_v42  ;;  %5361 = vmatprep.subr.bf16.mxu0 %v4518_v8  ;;  %v4547_v42 = vld [vmem:[#allocation2 + $0xfe0] sm:$0xff]  ;;  %v4549_v8 = vld [vmem:[#allocation2 + $0xff0] sm:$0xff]  ;;  %v5383_v60 = vmul.f32 %v7024_v6, %v9184_v56 }
 0x94a   :  { %v7625_v6 = vld [vmem:[%s9492_s6 + $0x30] sm:$0xff]  }
 0x94c   :  { %5198 = vmatpush1.bf16.msra.mxu1 %v4515_v38  ;;  %5362 = vmatpush1.bf16.msra.mxu0 %v4517_v32  ;;  %v5433_v38 = vsel %vm4664_vm4, %v5432_v62, %v5431_v52  ;;  %v7614_v32 = vld [vmem:[%s9492_s6 + $0x48] sm:$0xff]   ;;  %v5426_v62 = vrot.slane %v9013_v16, 6  ;;  %v5425_v52 = vsel %vm4661_vm3, %v5424_v50, %v5423_v46 }
 0x94d   :  { %5199 = vmatprep.subr.bf16.mxu1 %v4524_v31  ;;  %5363 = vmatprep.subr.bf16.mxu0 %v4526_v11  ;;  %v5479_v31 = vadd.f32 %v5433_v38, %v5383_v60  ;;  %v7615_v11 = vld [vmem:[%s9492_s6 + $0x8] sm:$0xff]  }
 0x94e   :  { %v5427_v16 = vsel %vm4664_vm4, %v5426_v62, %v5425_v52  ;;  %v7630_v38 = vld [vmem:[%s9492_s6 + $0xc8] sm:$0xff]   ;;  %v7650_v62 = vld [vmem:[%s9492_s6 + $0x158] sm:$0xff]   ;;  %v7652_v52 = vld [vmem:[%s9492_s6 + $0x160] sm:$0xff]  }
 0x950   :  { %5200 = vmatpush1.bf16.msra.mxu1 %v4523_v51  ;;  %5364 = vmatpush1.bf16.msra.mxu0 %v4525_v23  ;;  %v7616_v51 = vld [vmem:[%s9492_s6 + $0x50] sm:$0xff]  }
 0x951   :  { %5201 = vmatprep.subr.bf16.mxu1 %v4532_v7  ;;  %5365 = vmatprep.subr.bf16.mxu0 %v4534_v30  ;;  %v7617_v23 = vld [vmem:[%s9492_s6 + $0x10] sm:$0xff]   ;;  %v7619_v7 = vld [vmem:[%s9492_s6 + $0x18] sm:$0xff]   ;;  %v7620_v30 = vld [vmem:[%s9492_s6 + $0x60] sm:$0xff]  }
 0x954   :  { %5202 = vmatpush1.bf16.msra.mxu1 %v4531_v1  ;;  %5366 = vmatpush1.bf16.msra.mxu0 %v4533_v39  ;;  %v7621_v1 = vld [vmem:[%s9492_s6 + $0x20] sm:$0xff]   ;;  %v7622_v39 = vld [vmem:[%s9492_s6 + $0x68] sm:$0xff]  }
 0x955   :  { %5203 = vmatprep.subr.bf16.mxu1 %v4540_v15  ;;  %5367 = vmatprep.subr.bf16.mxu0 %v4542_v47  ;;  %v9813_v15 = vsub.s32 0, %v9811_v37 }
 0x957   :  { %v4556_v47 = vrot.slane %v9171_v33, %v9813_v15  ;;  %v5436_v15 = vrot.slane %v9001_v2, 7 }
 0x958   :  { %5204 = vmatpush1.bf16.msra.mxu1 %v4539_v18  ;;  %5368 = vmatpush1.bf16.msra.mxu0 %v4541_v41  ;;  %v5440_v18 = vrot.slane %v8935_v44, 1  ;;  %v4568_v41 = vrot.slane %v9171_v33, %v4567_v48  ;;  %v7626_v44 = vld [vmem:[%s9492_s6 + $0x78] sm:$0xff]   ;;  %v7639_v48 = vld [vmem:[%s9492_s6 + $0xa8] sm:$0xff]  }
 0x959   :  { %5205 = vmatprep.subr.bf16.mxu1 %v4548_v19  ;;  %5369 = vmatprep.subr.bf16.mxu0 %v4550_v55  ;;  %v5442_v19 = vrot.slane %v9003_v40, 7  ;;  %v7023_v55 = vadd.f32 %v9163_v20, %v4556_v47  ;;  %v7627_v40 = vld [vmem:[%s9492_s6 + $0x38] sm:$0xff]  }
 0x95a   :  { %v5441_v36 = vsel %vm4658_vm2, %v8987_v22, %v5440_v18  ;;  %v7026_v45 = vadd.f32 %v9169_v63, %v4568_v41  ;;  %v7628_v22 = vld [vmem:[%s9492_s6 + $0xc0] sm:$0xff]   ;;  %v7642_v18 = vld [vmem:[%s9492_s6 + $0xf8] sm:$0xff]   ;;  %v5438_v41 = vrot.slane %v9017_v57, 6 }
 0x95b   :  { %v5443_v20 = vsel %vm4661_vm3, %v5442_v19, %v5441_v36  ;;  %v7645_v57 = vld [vmem:[%s9492_s6 + $0x100] sm:$0xff]   ;;  %v7646_v19 = vld [vmem:[%s9492_s6 + $0x148] sm:$0xff]   ;;  %v7649_v36 = vld [vmem:[%s9492_s6 + $0x110] sm:$0xff]  }
 0x95c   :  { %5206 = vmatpush1.bf16.msra.mxu1 %v4547_v42  ;;  %5370 = vmatpush1.bf16.msra.mxu0 %v4549_v8  ;;  %v5444_v42 = vrot.slane %v9019_v17, 6  ;;  %v5382_v8 = vmul.f32 %v7023_v55, %v9184_v56  ;;  %v5385_v63 = vmul.f32 %v7026_v45, %v9184_v56  ;;  %v7647_v55 = vld [vmem:[%s9492_s6 + $0x108] sm:$0xff]   ;;  %v7651_v45 = vld [vmem:[%s9492_s6 + $0x118] sm:$0xff]  }
 0x95d   :  { %6667 = vmatprep.subr.bf16.mxu1 %v7612_v0  ;;  %v7629_v0 = vld [vmem:[%s9492_s6 + $0x80] sm:$0xff]  }
 0x95e   :  { %v5445_v17 = vsel %vm4664_vm4, %v5444_v42, %v5443_v20  ;;  %v5478_v60 = vadd.f32 %v5427_v16, %v5382_v8  ;;  %v7653_v42 = vld [vmem:[%s9492_s6 + $0x120] sm:$0xff]   ;;  %v7655_v20 = vld [vmem:[%s9492_s6 + $0x128] sm:$0xff]   ;;  %v7656_v8 = vld [vmem:[%s9492_s6 + $0x170] sm:$0xff]  }
 0x95f   :  { %5208 = vmatmul.mubr.bf16.vlgmr.msra.gmra.mrb[100].mxu1 %v9145_v34  ;;  %5372 = vmatmul.mubr.bf16.vlgmr.msra.gmra.mrb[68].mxu0 %v9145_v34  ;;  %v7618_v34 = vld [vmem:[%s9492_s6 + $0x58] sm:$0xff]  }
 0x960   :  { %6668 = vmatpush3.bf16.msra.mxu1 %v7613_v9  ;;  %6037 = vmatprep.mubr.f32.mxu1 %v5479_v31  ;;  %v5481_v9 = vadd.f32 %v5445_v17, %v5385_v63  ;;  %v7632_v31 = vld [vmem:[%s9492_s6 + $0xd0] sm:$0xff]   ;;  %v7658_v16 = vld [vmem:[%s9492_s6 + $0x178] sm:$0xff]   ;;  %v7660_v17 = vld [vmem:[%s9492_s6 + $0x1c0] sm:$0xff]  }
 0x961   :  { %6669 = vmatprep.subr.bf16.mxu1 %v7614_v32  ;;  %v7631_v32 = vld [vmem:[%s9492_s6 + $0x88] sm:$0xff]   ;;  %v7659_v63 = vld [vmem:[%s9492_s6 + $0x138] sm:$0xff]  }
 0x964   :  { %6670 = vmatpush3.bf16.msra.mxu1 %v7615_v11  ;;  %v7633_v11 = vld [vmem:[%s9492_s6 + $0x90] sm:$0xff]  }
 0x965   :  { %6671 = vmatprep.subr.bf16.mxu1 %v7616_v51  ;;  %v7634_v51 = vld [vmem:[%s9492_s6 + $0xd8] sm:$0xff]  }
 0x968   :  { %6672 = vmatpush3.bf16.msra.mxu1 %v7617_v23  ;;  %v7635_v23 = vld [vmem:[%s9492_s6 + $0x98] sm:$0xff]  }
 0x969   :  { %6673 = vmatprep.subr.bf16.mxu1 %v7618_v34  ;;  %v7636_v34 = vld [vmem:[%s9492_s6 + $0xe0] sm:$0xff]  }
 0x96c   :  { %6674 = vmatpush3.bf16.msra.mxu1 %v7619_v7  ;;  %v7637_v7 = vld [vmem:[%s9492_s6 + $0xa0] sm:$0xff]  }
 0x96d   :  { %6675 = vmatprep.subr.bf16.mxu1 %v7620_v30  ;;  %v4563_v30 = vsub.s32 2, %v9811_v37 }
 0x96f   :  { %v4564_v4 = vrot.slane %v9171_v33, %v4563_v30  ;;  %v5466_v30 = vrot.slane %v9011_v14, 7 }
 0x970   :  { %6676 = vmatpush3.bf16.msra.mxu1 %v7621_v1  ;;  %v7638_v1 = vld [vmem:[%s9492_s6 + $0xe8] sm:$0xff]  }
 0x971   :  { %6677 = vmatprep.subr.bf16.mxu1 %v7622_v39  ;;  %v5434_v39 = vrot.slane %v8932_v24, 1  ;;  %v7641_v24 = vld [vmem:[%s9492_s6 + $0xb0] sm:$0xff]  }
 0x973   :  { %v5435_v47 = vsel %vm4658_vm2, %v8985_v21, %v5434_v39  ;;  %v7643_v21 = vld [vmem:[%s9492_s6 + $0xb8] sm:$0xff]  }
 0x974   :  { %6678 = vmatpush3.bf16.msra.mxu1 %v7623_v5  ;;  %v7640_v5 = vld [vmem:[%s9492_s6 + $0xf0] sm:$0xff]   ;;  %v5437_v50 = vsel %vm4661_vm3, %v5436_v15, %v5435_v47  ;;  %v5468_v15 = vrot.slane %v9027_v3, 6 }
 0x975   :  { %6679 = vmatprep.subr.bf16.mxu1 %v7624_v61  ;;  %v7025_v61 = vadd.f32 %v9165_v25, %v4564_v4  ;;  %v7644_v25 = vld [vmem:[%s9492_s6 + $0x140] sm:$0xff]   ;;  %v5439_v46 = vsel %vm4664_vm4, %v5438_v41, %v5437_v50 }
 0x977   :  { %v5384_v2 = vmul.f32 %v7025_v61, %v9184_v56 }
 0x978   :  { %6680 = vmatpush3.bf16.msra.mxu1 %v7625_v6 }
 0x979   :  { %6681 = vmatprep.subr.bf16.mxu1 %v7626_v44  ;;  %v5480_v6 = vadd.f32 %v5439_v46, %v5384_v2  ;;  %v7648_v44 = vld [vmem:[%s9492_s6 + $0x150] sm:$0xff]   ;;  %v7661_v46 = vld [vmem:[%s9492_s6 + $0x180] sm:$0xff]  }
 0x97c   :  { %6682 = vmatpush3.bf16.msra.mxu1 %v7627_v40  ;;  %v7654_v40 = vld [vmem:[%s9492_s6 + $0x168] sm:$0xff]  }
 0x97d   :  { %6686 = vmatprep.subr.bf16.mxu1 %v7628_v22  ;;  %v7657_v22 = vld [vmem:[%s9492_s6 + $0x130] sm:$0xff]  }
 0x97f   :  { %6038 = vmatmul.mubr.f32.vlgmr.msra.gmra.mrb[104].mxu1 %v5478_v60  ;;  %v5452_v60 = vrot.slane %v8950_v13, 1 }
 0x980   :  { %6687 = vmatpush3.bf16.msra.mxu1 %v7629_v0  ;;  %6075 = vmatprep.mubr.f32.mxu1 %v5481_v9  ;;  %v4571_v0 = vsub.s32 4, %v9811_v37  ;;  %v4575_v9 = vsub.s32 5, %v9811_v37 }
 0x981   :  { %6688 = vmatprep.subr.bf16.mxu1 %v7630_v38  ;;  %v5446_v38 = vrot.slane %v8947_v53, 1 }
 0x982   :  { %v4576_v53 = vrot.slane %v9171_v33, %v4575_v9 }
 0x983   :  { %v5447_v13 = vsel %vm4658_vm2, %v8989_v35, %v5446_v38 }
 0x984   :  { %6689 = vmatpush3.bf16.msra.mxu1 %v7631_v32  ;;  %v4583_v32 = vsub.s32 7, %v9811_v37 }
 0x985   :  { %6690 = vmatprep.subr.bf16.mxu1 %v7632_v31  ;;  %v5464_v31 = vrot.slane %v8964_v49, 1  ;;  %v5456_v49 = vrot.slane %v9023_v27, 6 }
 0x988   :  { %6691 = vmatpush3.bf16.msra.mxu1 %v7633_v11  ;;  %v5454_v11 = vrot.slane %v9007_v54, 7  ;;  %v5465_v54 = vsel %vm4658_vm2, %v8995_v26, %v5464_v31 }
 0x989   :  { %6692 = vmatprep.subr.bf16.mxu1 %v7634_v51  ;;  %v4572_v51 = vrot.slane %v9171_v33, %v4571_v0  ;;  %v5467_v61 = vsel %vm4661_vm3, %v5466_v30, %v5465_v54  ;;  %v6157_v30 = vld [vmem:[%s9494_s8] sm:$0xff]  ;;  %v7836_v54 = vmov 0.0|0.0  }
 0x98a   :  { %v5469_v3 = vsel %vm4664_vm4, %v5468_v15, %v5467_v61  ;;  %6947 = vmatprep.subr.bf16.mxu0 %v7836_v54 }
 0x98c   :  { %6693 = vmatpush3.bf16.msra.mxu1 %v7635_v23  ;;  %v5448_v23 = vrot.slane %v9005_v59, 7  ;;  %v5450_v59 = vrot.slane %v9021_v43, 6 }
 0x98d   :  { %6694 = vmatprep.subr.bf16.mxu1 %v7636_v34  ;;  %v5453_v34 = vsel %vm4658_vm2, %v8991_v29, %v5452_v60  ;;  %v5462_v60 = vrot.slane %v9025_v28, 6 }
 0x98e   :  { %v5455_v29 = vsel %vm4661_vm3, %v5454_v11, %v5453_v34  ;;  %v5449_v35 = vsel %vm4661_vm3, %v5448_v23, %v5447_v13  ;;  %v6535_v23 = vld [vmem:[#allocation12] ss:$0 sm:$0xff] }
 0x98f   :  { %v5457_v41 = vsel %vm4664_vm4, %v5456_v49, %v5455_v29  ;;  %v5451_v50 = vsel %vm4664_vm4, %v5450_v59, %v5449_v35  ;;  %v6159_v49 = vld [vmem:[%s9494_s8 + $0x10] sm:$0xff]  ;;  %v6160_v59 = vld [vmem:[%s9494_s8 + $0x18] sm:$0xff]  ;;  %v6161_v29 = vld [vmem:[%s9494_s8 + $0x20] sm:$0xff] }
 0x990   :  { %6695 = vmatpush3.bf16.msra.mxu1 %v7637_v7  ;;  %v4584_v7 = vrot.slane %v9171_v33, %v4583_v32 }
 0x991   :  { %6696 = vmatprep.subr.bf16.mxu1 %v7638_v1 }
 0x994   :  { %6697 = vmatpush3.bf16.msra.mxu1 %v7639_v48 }
 0x995   :  { %6698 = vmatprep.subr.bf16.mxu1 %v7640_v5 }
 0x998   :  { %6699 = vmatpush3.bf16.msra.mxu1 %v7641_v24 }
 0x999   :  { %6700 = vmatprep.subr.bf16.mxu1 %v7642_v18 }
 0x99c   :  { %6701 = vmatpush3.bf16.msra.mxu1 %v7643_v21 }
 0x99d   :  { %6705 = vmatprep.subr.bf16.mxu1 %v7644_v25 }
 0x99f   :  { %6076 = vmatmul.mubr.f32.vlgmr.msra.gmra.mrb[106].mxu1 %v5480_v6  ;;  %v7662_v6 = vld [vmem:[%s9492_s6 + $0x1c8] sm:$0xff]  }
 0x9a0   :  { %6706 = vmatpush3.bf16.msra.mxu1 %v7645_v57 }
 0x9a1   :  { %6707 = vmatprep.subr.bf16.mxu1 %v7646_v19 }
 0x9a4   :  { %6708 = vmatpush3.bf16.msra.mxu1 %v7647_v55  ;;  %v7663_v55 = vld [vmem:[%s9492_s6 + $0x188] sm:$0xff]  }
 0x9a5   :  { %6709 = vmatprep.subr.bf16.mxu1 %v7648_v44  ;;  %v7664_v44 = vld [vmem:[%s9492_s6 + $0x1d0] sm:$0xff]  }
 0x9a8   :  { %6710 = vmatpush3.bf16.msra.mxu1 %v7649_v36  ;;  %v7665_v36 = vld [vmem:[%s9492_s6 + $0x190] sm:$0xff]  }
 0x9a9   :  { %6711 = vmatprep.subr.bf16.mxu1 %v7650_v62  ;;  %v7666_v62 = vld [vmem:[%s9492_s6 + $0x1d8] sm:$0xff]  }
 0x9ac   :  { %6712 = vmatpush3.bf16.msra.mxu1 %v7651_v45  ;;  %v7667_v45 = vld [vmem:[%s9492_s6 + $0x198] sm:$0xff]  }
 0x9ad   :  { %6713 = vmatprep.subr.bf16.mxu1 %v7652_v52  ;;  %v7668_v52 = vld [vmem:[%s9492_s6 + $0x1e0] sm:$0xff]  }
 0x9b0   :  { %6714 = vmatpush3.bf16.msra.mxu1 %v7653_v42  ;;  %v7669_v42 = vld [vmem:[%s9492_s6 + $0x1a0] sm:$0xff]  }
 0x9b1   :  { %6715 = vmatprep.subr.bf16.mxu1 %v7654_v40  ;;  %v4579_v40 = vsub.s32 6, %v9811_v37  ;;  %v5460_v37 = vrot.slane %v9009_v10, 7 }
 0x9b4   :  { %6716 = vmatpush3.bf16.msra.mxu1 %v7655_v20  ;;  %v7670_v20 = vld [vmem:[%s9492_s6 + $0x1e8] sm:$0xff]  }
 0x9b5   :  { %6717 = vmatprep.subr.bf16.mxu1 %v7656_v8  ;;  %v5458_v8 = vrot.slane %v8961_v58, 1  ;;  %v7673_v58 = vld [vmem:[%s9492_s6 + $0x1b0] sm:$0xff]  }
 0x9b8   :  { %6718 = vmatpush3.bf16.msra.mxu1 %v7657_v22  ;;  %v7671_v22 = vld [vmem:[%s9492_s6 + $0x1a8] sm:$0xff]  }
 0x9b9   :  { %6719 = vmatprep.subr.bf16.mxu1 %v7658_v16  ;;  %v4580_v16 = vrot.slane %v9171_v33, %v4579_v40  ;;  %v7674_v33 = vld [vmem:[%s9492_s6 + $0x1f8] sm:$0xff]  }
 0x9bc   :  { %6720 = vmatpush3.bf16.msra.mxu1 %v7659_v63  ;;  %v7672_v63 = vld [vmem:[%s9492_s6 + $0x1f0] sm:$0xff]  }
 0x9bd   :  { %6724 = vmatprep.subr.bf16.mxu1 %v7660_v17  ;;  %v5459_v17 = vsel %vm4658_vm2, %v8993_v12, %v5458_v8  ;;  %v7675_v12 = vld [vmem:[%s9492_s6 + $0x1b8] sm:$0xff]  }
 0x9be   :  { %v5461_v9 = vsel %vm4661_vm3, %v5460_v37, %v5459_v17 }
 0x9bf   :  { %v5463_v11 = vsel %vm4664_vm4, %v5462_v60, %v5461_v9 }
 0xa32   :  { %v5209_v1 = vpop.f32.mrb[100].mxu1  ;;  %v5373_v39 = vpop.f32.mrb[68].mxu0 }
 0xa33   :  { %v7027_v48 = vadd.f32 %v5209_v1, %v4572_v51  ;;  %v5211_v4 = vpop.f32.mrb[101].mxu1  ;;  %v5375_v5 = vpop.f32.mrb[69].mxu0  ;;  %v7029_v0 = vadd.f32 %v5373_v39, %v4580_v16  ;;  %v6951_v39 = vpack.c.bf16 %v6160_v59, %v6159_v49 }
 0xa34   :  { %v7028_v47 = vadd.f32 %v5211_v4, %v4576_v53  ;;  %v7030_v14 = vadd.f32 %v5375_v5, %v4584_v7  ;;  %v5213_v24 = vpop.f32.mrb[102].mxu1  ;;  %v5377_v27 = vpop.f32.mrb[70].mxu0  ;;  %v6163_v4 = vld [vmem:[%s9494_s8 + $0x30] sm:$0xff]  ;;  %v6164_v5 = vld [vmem:[%s9494_s8 + $0x38] sm:$0xff] }
 0xa35   :  { %v5386_v26 = vmul.f32 %v7027_v48, %v9184_v56  ;;  %v5214_v18 = vpop.f32.mrb[103].mxu1  ;;  %v5378_v43 = vpop.f32.mrb[71].mxu0  ;;  %v5388_v31 = vmul.f32 %v7029_v0, %v9184_v56  ;;  %v6162_v48 = vld [vmem:[%s9494_s8 + $0x28] sm:$0xff]  ;;  %v6957_v15 = vpack.c.bf16 %v6164_v5, %v6163_v4 }
 0xa36   :  { %v5387_v21 = vmul.f32 %v7028_v47, %v9184_v56  ;;  %v5389_v2 = vmul.f32 %v7030_v14, %v9184_v56  ;;  %v6158_v56 = vld [vmem:[%s9494_s8 + $0x8] sm:$0xff]  ;;  %v6954_v35 = vpack.c.bf16 %v6162_v48, %v6161_v29  ;;  %v7838_v47 = vmov 0.0  }
 0xa37   :  { %v5482_v57 = vadd.f32 %v5451_v50, %v5386_v26  ;;  %v5484_v51 = vadd.f32 %v5463_v11, %v5388_v31  ;;  %v6948_v1 = vpack.c.bf16 %v6158_v56, %v6157_v30  ;;  %6880 = vmatprep.mubr.msk.f32.mxu0 %vm7837_vm5, %v7838_v47  ;;  %v6600_v50 = vld [vmem:[#allocation13] ss:$0 sm:$0xff] }
 0xa38   :  { %v5483_v25 = vadd.f32 %v5457_v41, %v5387_v21  ;;  %v5485_v19 = vadd.f32 %v5469_v3, %v5389_v2 }
 0xa39   :  { %6949 = vmatpush3.bf16.msra.mxu0 %v6948_v1 }
 0xa3a   :  { %6113 = vmatprep.mubr.f32.mxu1 %v5483_v25  ;;  %6950 = vmatprep.subr.bf16.mxu0 %v7836_v54 }
 0xa3b   :  { %6114 = vmatmul.mubr.f32.vlgmr.msra.gmra.mrb[108].mxu1 %v5482_v57 }
 0xa3c   :  { %6725 = vmatpush3.bf16.msra.mxu1 %v7661_v46  ;;  %6151 = vmatprep.mubr.f32.mxu1 %v5485_v19 }
 0xa3d   :  { %6726 = vmatprep.subr.bf16.mxu1 %v7662_v6  ;;  %6952 = vmatpush3.bf16.msra.mxu0 %v6951_v39 }
 0xa3e   :  { %6953 = vmatprep.subr.bf16.mxu0 %v7836_v54 }
 0xa40   :  { %6727 = vmatpush3.bf16.msra.mxu1 %v7663_v55 }
 0xa41   :  { %6728 = vmatprep.subr.bf16.mxu1 %v7664_v44  ;;  %6955 = vmatpush3.bf16.msra.mxu0 %v6954_v35 }
 0xa42   :  { %6956 = vmatprep.subr.bf16.mxu0 %v7836_v54 }
 0xa44   :  { %6729 = vmatpush3.bf16.msra.mxu1 %v7665_v36 }
 0xa45   :  { %6730 = vmatprep.subr.bf16.mxu1 %v7666_v62  ;;  %6958 = vmatpush3.bf16.msra.mxu0 %v6957_v15 }
 0xa48   :  { %6731 = vmatpush3.bf16.msra.mxu1 %v7667_v45 }
 0xa49   :  { %6732 = vmatprep.subr.bf16.mxu1 %v7668_v52 }
 0xa4c   :  { %6733 = vmatpush3.bf16.msra.mxu1 %v7669_v42 }
 0xa4d   :  { %6734 = vmatprep.subr.bf16.mxu1 %v7670_v20 }
 0xa50   :  { %6735 = vmatpush3.bf16.msra.mxu1 %v7671_v22 }
 0xa51   :  { %6736 = vmatprep.subr.bf16.mxu1 %v7672_v63 }
 0xa52   :  { %v6683_v38 = vpop.f32.mrb[104].mxu1 }
 0xa53   :  { %v6684_v10 = vpop.f32.mrb[105].mxu1 }
 0xa54   :  { %v6685_v32 = vadd.f32 %v6684_v10, %v6683_v38  ;;  %6737 = vmatpush3.bf16.msra.mxu1 %v7673_v58 }
 0xa55   :  { %6738 = vmatprep.subr.bf16.mxu1 %v7674_v33 }
 0xa56   :  { %v6040_v13 = vadd.f32 %v6685_v32, %v6535_v23 }
 0xa58   :  { %6739 = vmatpush3.bf16.msra.mxu1 %v7675_v12 }
 0xa5b   :  { %6152 = vmatmul.mubr.f32.vlgmr.msra.gmra.mrb[110].mxu1 %v5484_v51 }
 0xa72   :  { %v6702_v28 = vpop.f32.mrb[106].mxu1 }
 0xa73   :  { %v6703_v34 = vpop.f32.mrb[107].mxu1 }
 0xa74   :  { %v6704_v53 = vadd.f32 %v6703_v34, %v6702_v28 }
 0xa76   :  { %v6078_v7 = vadd.f32 %v6704_v53, %v6040_v13 }
 0xb0e   :  { %v6721_v14 = vpop.f32.mrb[108].mxu1 }
 0xb0f   :  { %v6722_v24 = vpop.f32.mrb[109].mxu1 }
 0xb10   :  { %v6723_v27 = vadd.f32 %v6722_v24, %v6721_v14 }
 0xb12   :  { %v6116_v61 = vadd.f32 %v6723_v27, %v6078_v7 }
 0xb2e   :  { %v6740_v26 = vpop.f32.mrb[110].mxu1 }
 0xb2f   :  { %v6741_v18 = vpop.f32.mrb[111].mxu1 }
 0xb30   :  { %v6742_v43 = vadd.f32 %v6741_v18, %v6740_v26 }
 0xb32   :  { %v6154_v41 = vadd.f32 %v6742_v43, %v6116_v61 }
 0xb34   :  { %6881 = vmatmul.mubr.msk.f32.vlgmr.msra.gmra.mrb[72].mxu0 %vm2884_vm0, %v6154_v41 }
 0xc07   :  { %v6241_v21 = vpop.f32.mrb[72].mxu0 }
 0xc08   :  { %v6242_v2 = vadd.f32 %v6600_v50, %v6241_v21  ;;  %v6882_v3 = vpop.f32.mrb[73].mxu0 }
 0xc0a   :  { %6246 = vst.msk [vmem:[%s9496_s10] sm:$0xf] %vm6245_vm6, %v6242_v2 }
 0xc0b   :  { %6251 = vsyncpa [#allocation6], 1 }
 0xc0c   :  { %6252 = vsyncpa [#allocation8], 1 }
 0xc0d   :  { %6253 = vsyncpa [#allocation11], 1 }
 0xc0e   :  { %6254 = vsyncpa [#allocation14], 1 }
 0xc0f   :  { %6255 = vsyncmov [#allocation3] }
 0xc12   :  { %s6256_s22 = vpop.sfrf %6255 }
 0xc13   :  { %p6602_p6 = scmp.ne.s32.totalorder %s6256_s22, 0 }
 0xc15   :  { %6260 = shalt.err (%p6602_p6)  }

</bundles_post_ra>
